<compile_context>
chip_gen: v5e
topology: v5e:2x2
jax: 0.10.0
libtpu: 0.0.40
codegen_flags: <defaults>
</compile_context>

<pallas_src>
import math
import functools

import jax
import jax.numpy as jnp
from jax import lax
from jax.experimental import pallas as pl
from jax.experimental.pallas import tpu as pltpu


# ----------------------------------------------------------------------------
# Fused encoder-layer kernel: one grid step == one full CoAttentionEncoderLayer
# ----------------------------------------------------------------------------

def _fused_co_layer_kernel(q_ref, kv_ref,
                           wq_ref, bq_ref, wkv_ref, bkv_ref, wo_ref, bo_ref,
                           ln1g_ref, ln1b_ref,
                           w1_ref, b1_ref, w2_ref, b2_ref,
                           ln2g_ref, ln2b_ref,
                           o_ref, *, batch, nhead, eps):
    x1 = q_ref[0]                       # (B*Lq, E)  query-side activations
    x2 = kv_ref[0]                      # (B*Lk, E)  key/value-side activations
    E = x1.shape[-1]
    hd = E // nhead
    Lq = x1.shape[0] // batch
    Lk = x2.shape[0] // batch
    scale = 1.0 / math.sqrt(hd)

    # --- projections: one matmul for Q, one for packed [K | V] -----------------
    qp = jnp.dot(x1, wq_ref[0], preferred_element_type=jnp.float32) + bq_ref[0]
    kvp = jnp.dot(x2, wkv_ref[0], preferred_element_type=jnp.float32) + bkv_ref[0]
    kp = kvp[:, :E]
    vp = kvp[:, E:]

    # --- multi-head attention: heads split only in VMEM -----------------------
    batch_outs = []
    for b in range(batch):                       # static unroll (tiny B)
        qb = qp[b * Lq:(b + 1) * Lq, :]
        kb = kp[b * Lk:(b + 1) * Lk, :]
        vb = vp[b * Lk:(b + 1) * Lk, :]
        head_outs = []
        for h in range(nhead):                   # static unroll (tiny nhead)
            qh = qb[:, h * hd:(h + 1) * hd]      # (Lq, hd)
            kh = kb[:, h * hd:(h + 1) * hd]      # (Lk, hd)
            vh = vb[:, h * hd:(h + 1) * hd]      # (Lk, hd)
            s = jnp.dot(qh, kh.T, preferred_element_type=jnp.float32) * scale
            m = jnp.max(s, axis=-1, keepdims=True)
            p = jnp.exp(s - m)
            l = jnp.sum(p, axis=-1, keepdims=True)
            oh = jnp.dot(p, vh, preferred_element_type=jnp.float32)
            oh = oh * pl.reciprocal(l, approx=True)     # EUP reciprocal, frees VPU
            head_outs.append(oh)
        batch_outs.append(jnp.concatenate(head_outs, axis=-1))   # (Lq, E)
    attn = jnp.concatenate(batch_outs, axis=0)                    # (B*Lq, E)

    # --- output projection + residual + LayerNorm1 -----------------------------
    attn = jnp.dot(attn, wo_ref[0], preferred_element_type=jnp.float32) + bo_ref[0]
    x = x1 + attn
    mu = jnp.mean(x, axis=-1, keepdims=True)
    xc = x - mu
    var = jnp.mean(xc * xc, axis=-1, keepdims=True)
    x = xc * lax.rsqrt(var + eps) * ln1g_ref[0] + ln1b_ref[0]

    # --- FFN (linear1 + relu + linear2) + residual + LayerNorm2 ----------------
    h1 = jnp.dot(x, w1_ref[0], preferred_element_type=jnp.float32) + b1_ref[0]
    h1 = jnp.maximum(h1, 0.0)
    h2 = jnp.dot(h1, w2_ref[0], preferred_element_type=jnp.float32) + b2_ref[0]
    y = x + h2
    mu2 = jnp.mean(y, axis=-1, keepdims=True)
    yc = y - mu2
    var2 = jnp.mean(yc * yc, axis=-1, keepdims=True)
    y = yc * lax.rsqrt(var2 + eps) * ln2g_ref[0] + ln2b_ref[0]

    o_ref[0] = y.astype(o_ref.dtype)


def fused_co_layers(q_stack, kv_stack, w, *, batch, nhead, eps=1e-5):
    """q_stack: (NL, B*Lq, E); kv_stack: (NL, B*Lk, E); w: dict of (NL, ...) params.

    Runs NL independent CoAttentionEncoderLayer forwards, one per grid step
    (grid axis is 'parallel' -> sharded across TensorCores on v7x)."""
    NL, Mq, E = q_stack.shape
    Mk = kv_stack.shape[1]
    F = w["w1"].shape[-1]
    Lq, Lk = Mq // batch, Mk // batch
    hd = E // nhead

    flops = NL * (2 * Mq * E * E                 # q projection
                  + 2 * Mk * E * (2 * E)         # packed kv projection
                  + batch * nhead * 4 * Lq * Lk * hd   # scores + p@v
                  + 2 * Mq * E * E               # output projection
                  + 4 * Mq * E * F)              # FFN
    bytes_accessed = 4 * (2 * q_stack.size + kv_stack.size
                          + sum(int(v.size) for v in w.values()))
    cost = pl.CostEstimate(flops=int(flops),
                           transcendentals=int(NL * batch * nhead * Lq * Lk),
                           bytes_accessed=int(bytes_accessed))

    def imap(i):
        return (i, 0, 0)

    def spec(a):
        return pl.BlockSpec((1,) + a.shape[1:], imap)

    in_arrays = [q_stack, kv_stack,
                 w["wq"], w["bq"], w["wkv"], w["bkv"], w["wo"], w["bo"],
                 w["ln1_g"], w["ln1_b"],
                 w["w1"], w["b1"], w["w2"], w["b2"],
                 w["ln2_g"], w["ln2_b"]]

    return pl.pallas_call(
        functools.partial(_fused_co_layer_kernel,
                          batch=batch, nhead=nhead, eps=eps),
        out_shape=jax.ShapeDtypeStruct((NL, Mq, E), q_stack.dtype),
        grid=(NL,),
        in_specs=[spec(a) for a in in_arrays],
        out_specs=pl.BlockSpec((1, Mq, E), imap),
        compiler_params=pltpu.CompilerParams(
            dimension_semantics=("parallel",)),
        cost_estimate=cost,
    )(*in_arrays)


# ----------------------------------------------------------------------------
# Module-level forward (NCHW in / NCHW out), matching the PyTorch spec
# ----------------------------------------------------------------------------

def encoder_layer_co_attention(featx, featy, params, nhead, eps=1e-5):
    """featx, featy: (B, C, H, W) NCHW, as in the PyTorch module."""
    bx, cx, hx, wx = featx.shape
    by, cy, hy, wy = featy.shape
    # batch-major token layout: (B, H*W, C) -> flattened (B*H*W, C) slabs.
    fx = featx.reshape(bx, cx, hx * wx).transpose(0, 2, 1).reshape(bx * hx * wx, cx)
    fy = featy.reshape(by, cy, hy * wy).transpose(0, 2, 1).reshape(by * hy * wy, cy)

    p12, p21 = params["layer12"], params["layer21"]
    if fx.shape == fy.shape and bx == by:
        # Stack the two independent layers on a parallel grid axis (1 launch).
        stacked = {k: jnp.stack([p12[k], p21[k]]) for k in p12}
        q_stack = jnp.stack([fx, fy])          # layer12 queries x, layer21 queries y
        kv_stack = jnp.stack([fy, fx])         # layer12 attends to y, layer21 to x
        out = fused_co_layers(q_stack, kv_stack, stacked,
                              batch=bx, nhead=nhead, eps=eps)
        outx2, outy2 = out[0], out[1]
    else:
        # Different spatial sizes: run each fused layer as its own launch.
        outx2 = fused_co_layers(fx[None], fy[None],
                                {k: v[None] for k, v in p12.items()},
                                batch=bx, nhead=nhead, eps=eps)[0]
        outy2 = fused_co_layers(fy[None], fx[None],
                                {k: v[None] for k, v in p21.items()},
                                batch=by, nhead=nhead, eps=eps)[0]

    outx = outx2.reshape(bx, hx * wx, cx).transpose(0, 2, 1).reshape(bx, cx, hx, wx)
    outy = outy2.reshape(by, hy * wy, cy).transpose(0, 2, 1).reshape(by, cy, hy, wy)
    return outx, outy


# ----------------------------------------------------------------------------
# Deterministic synthetic parameters (packed K|V weights)
# ----------------------------------------------------------------------------

def init_layer_params(key, d_model, dim_ff):
    ks = jax.random.split(key, 6)
    s = 0.02
    wk = s * jax.random.normal(ks[1], (d_model, d_model), jnp.float32)
    wv = s * jax.random.normal(ks[2], (d_model, d_model), jnp.float32)
    return {
        "wq": s * jax.random.normal(ks[0], (d_model, d_model), jnp.float32),
        "bq": jnp.zeros((1, d_model), jnp.float32),
        "wkv": jnp.concatenate([wk, wv], axis=1),          # packed (E, 2E)
        "bkv": jnp.zeros((1, 2 * d_model), jnp.float32),
        "wo": s * jax.random.normal(ks[3], (d_model, d_model), jnp.float32),
        "bo": jnp.zeros((1, d_model), jnp.float32),
        "w1": s * jax.random.normal(ks[4], (d_model, dim_ff), jnp.float32),
        "b1": jnp.zeros((1, dim_ff), jnp.float32),
        "w2": s * jax.random.normal(ks[5], (dim_ff, d_model), jnp.float32),
        "b2": jnp.zeros((1, d_model), jnp.float32),
        "ln1_g": jnp.ones((1, d_model), jnp.float32),
        "ln1_b": jnp.zeros((1, d_model), jnp.float32),
        "ln2_g": jnp.ones((1, d_model), jnp.float32),
        "ln2_b": jnp.zeros((1, d_model), jnp.float32),
    }


def init_params(key, d_model, dim_ff):
    k1, k2 = jax.random.split(key)
    return {"layer12": init_layer_params(k1, d_model, dim_ff),
            "layer21": init_layer_params(k2, d_model, dim_ff)}


# ----------------------------------------------------------------------------
# Main
# ----------------------------------------------------------------------------

if __name__ == "__main__":
    d_model = 32
    nhead = 4
    dim_feedforward = 64
    B, H, W = 2, 8, 8

    key = jax.random.PRNGKey(0)
    kx, ky, kp = jax.random.split(key, 3)
    featx = jax.random.normal(kx, (B, d_model, H, W), jnp.float32)
    featy = jax.random.normal(ky, (B, d_model, H, W), jnp.float32)
    params = init_params(kp, d_model, dim_feedforward)

    fwd = jax.jit(functools.partial(encoder_layer_co_attention, nhead=nhead))
    outx, outy = fwd(featx, featy, params)
    jax.block_until_ready((outx, outy))

    assert outx.shape == featx.shape and outy.shape == featy.shape
    assert jnp.all(jnp.isfinite(outx)) and jnp.all(jnp.isfinite(outy))
    print("KERNEL_OK")
</pallas_src>

<mosaic_0001>
module attributes {stable_mosaic.version = 11 : i64} {
  func.func @_fused_co_layer_kernel(%arg0: i32, %arg1: memref<1x128x32xf32, #tpu.memory_space<vmem>>, %arg2: memref<1x128x32xf32, #tpu.memory_space<vmem>>, %arg3: memref<1x32x32xf32, #tpu.memory_space<vmem>>, %arg4: memref<1x1x32xf32, #tpu.memory_space<vmem>>, %arg5: memref<1x32x64xf32, #tpu.memory_space<vmem>>, %arg6: memref<1x1x64xf32, #tpu.memory_space<vmem>>, %arg7: memref<1x32x32xf32, #tpu.memory_space<vmem>>, %arg8: memref<1x1x32xf32, #tpu.memory_space<vmem>>, %arg9: memref<1x1x32xf32, #tpu.memory_space<vmem>>, %arg10: memref<1x1x32xf32, #tpu.memory_space<vmem>>, %arg11: memref<1x32x64xf32, #tpu.memory_space<vmem>>, %arg12: memref<1x1x64xf32, #tpu.memory_space<vmem>>, %arg13: memref<1x64x32xf32, #tpu.memory_space<vmem>>, %arg14: memref<1x1x32xf32, #tpu.memory_space<vmem>>, %arg15: memref<1x1x32xf32, #tpu.memory_space<vmem>>, %arg16: memref<1x1x32xf32, #tpu.memory_space<vmem>>, %arg17: memref<1x128x32xf32, #tpu.memory_space<vmem>>) attributes {dimension_semantics = [#tpu.dimension_semantics<parallel>], iteration_bounds = array<i64: 2>, scalar_prefetch = 0 : i64, scratch_operands = 0 : i64, tpu.core_type = #tpu.core_type<tc>, window_params = [{transform_indices = @transform_0, window_bounds = array<i64: 1, 128, 32>}, {transform_indices = @transform_1, window_bounds = array<i64: 1, 128, 32>}, {transform_indices = @transform_2, window_bounds = array<i64: 1, 32, 32>}, {transform_indices = @transform_3, window_bounds = array<i64: 1, 1, 32>}, {transform_indices = @transform_4, window_bounds = array<i64: 1, 32, 64>}, {transform_indices = @transform_5, window_bounds = array<i64: 1, 1, 64>}, {transform_indices = @transform_6, window_bounds = array<i64: 1, 32, 32>}, {transform_indices = @transform_7, window_bounds = array<i64: 1, 1, 32>}, {transform_indices = @transform_8, window_bounds = array<i64: 1, 1, 32>}, {transform_indices = @transform_9, window_bounds = array<i64: 1, 1, 32>}, {transform_indices = @transform_10, window_bounds = array<i64: 1, 32, 64>}, {transform_indices = @transform_11, window_bounds = array<i64: 1, 1, 64>}, {transform_indices = @transform_12, window_bounds = array<i64: 1, 64, 32>}, {transform_indices = @transform_13, window_bounds = array<i64: 1, 1, 32>}, {transform_indices = @transform_14, window_bounds = array<i64: 1, 1, 32>}, {transform_indices = @transform_15, window_bounds = array<i64: 1, 1, 32>}, {transform_indices = @transform_16, window_bounds = array<i64: 1, 128, 32>}]} {
    %c0 = arith.constant 0 : index
    %c0_0 = arith.constant 0 : index
    %c0_1 = arith.constant 0 : index
    %0 = vector.load %arg1[%c0, %c0_0, %c0_1] : memref<1x128x32xf32, #tpu.memory_space<vmem>>, vector<1x128x32xf32>
    %1 = vector.shape_cast %0 : vector<1x128x32xf32> to vector<128x32xf32>
    %c0_2 = arith.constant 0 : index
    %c0_3 = arith.constant 0 : index
    %c0_4 = arith.constant 0 : index
    %2 = vector.load %arg2[%c0_2, %c0_3, %c0_4] : memref<1x128x32xf32, #tpu.memory_space<vmem>>, vector<1x128x32xf32>
    %3 = vector.shape_cast %2 : vector<1x128x32xf32> to vector<128x32xf32>
    %c0_5 = arith.constant 0 : index
    %c0_6 = arith.constant 0 : index
    %c0_7 = arith.constant 0 : index
    %4 = vector.load %arg3[%c0_5, %c0_6, %c0_7] : memref<1x32x32xf32, #tpu.memory_space<vmem>>, vector<1x32x32xf32>
    %5 = vector.shape_cast %4 : vector<1x32x32xf32> to vector<32x32xf32>
    %cst = arith.constant dense<0.000000e+00> : vector<128x32xf32>
    %6 = tpu.matmul %1, %5, %cst {dimension_numbers = #tpu.dot_dimension_numbers<[1], [0], [0], [1], [0, 0, 1, 1], [], []>} : vector<128x32xf32>, vector<32x32xf32>, vector<128x32xf32> -> vector<128x32xf32>
    %c0_8 = arith.constant 0 : index
    %c0_9 = arith.constant 0 : index
    %c0_10 = arith.constant 0 : index
    %7 = vector.load %arg4[%c0_8, %c0_9, %c0_10] : memref<1x1x32xf32, #tpu.memory_space<vmem>>, vector<1x1x32xf32>
    %8 = vector.shape_cast %7 : vector<1x1x32xf32> to vector<1x32xf32>
    %9 = vector.broadcast %8 : vector<1x32xf32> to vector<128x32xf32>
    %10 = arith.addf %6, %9 : vector<128x32xf32>
    %c0_11 = arith.constant 0 : index
    %c0_12 = arith.constant 0 : index
    %c0_13 = arith.constant 0 : index
    %11 = vector.load %arg5[%c0_11, %c0_12, %c0_13] : memref<1x32x64xf32, #tpu.memory_space<vmem>>, vector<1x32x64xf32>
    %12 = vector.shape_cast %11 : vector<1x32x64xf32> to vector<32x64xf32>
    %cst_14 = arith.constant dense<0.000000e+00> : vector<128x64xf32>
    %13 = tpu.matmul %3, %12, %cst_14 {dimension_numbers = #tpu.dot_dimension_numbers<[1], [0], [0], [1], [0, 0, 1, 1], [], []>} : vector<128x32xf32>, vector<32x64xf32>, vector<128x64xf32> -> vector<128x64xf32>
    %c0_15 = arith.constant 0 : index
    %c0_16 = arith.constant 0 : index
    %c0_17 = arith.constant 0 : index
    %14 = vector.load %arg6[%c0_15, %c0_16, %c0_17] : memref<1x1x64xf32, #tpu.memory_space<vmem>>, vector<1x1x64xf32>
    %15 = vector.shape_cast %14 : vector<1x1x64xf32> to vector<1x64xf32>
    %16 = vector.broadcast %15 : vector<1x64xf32> to vector<128x64xf32>
    %17 = arith.addf %13, %16 : vector<128x64xf32>
    %18 = vector.extract_strided_slice %17 {offsets = [0, 0], sizes = [128, 32], strides = [1, 1]} : vector<128x64xf32> to vector<128x32xf32>
    %19 = vector.extract_strided_slice %17 {offsets = [0, 32], sizes = [128, 32], strides = [1, 1]} : vector<128x64xf32> to vector<128x32xf32>
    %20 = vector.extract_strided_slice %10 {offsets = [0, 0], sizes = [64, 32], strides = [1, 1]} : vector<128x32xf32> to vector<64x32xf32>
    %21 = vector.extract_strided_slice %18 {offsets = [0, 0], sizes = [64, 32], strides = [1, 1]} : vector<128x32xf32> to vector<64x32xf32>
    %22 = vector.extract_strided_slice %19 {offsets = [0, 0], sizes = [64, 32], strides = [1, 1]} : vector<128x32xf32> to vector<64x32xf32>
    %23 = vector.extract_strided_slice %20 {offsets = [0, 0], sizes = [64, 8], strides = [1, 1]} : vector<64x32xf32> to vector<64x8xf32>
    %24 = vector.extract_strided_slice %21 {offsets = [0, 0], sizes = [64, 8], strides = [1, 1]} : vector<64x32xf32> to vector<64x8xf32>
    %25 = vector.extract_strided_slice %22 {offsets = [0, 0], sizes = [64, 8], strides = [1, 1]} : vector<64x32xf32> to vector<64x8xf32>
    %26 = tpu.transpose %24, [1, 0] : vector<64x8xf32> -> vector<8x64xf32>
    %cst_18 = arith.constant dense<0.000000e+00> : vector<64x64xf32>
    %27 = tpu.matmul %23, %26, %cst_18 {dimension_numbers = #tpu.dot_dimension_numbers<[1], [0], [0], [1], [0, 0, 1, 1], [], []>} : vector<64x8xf32>, vector<8x64xf32>, vector<64x64xf32> -> vector<64x64xf32>
    %cst_19 = arith.constant 0.353553385 : f32
    %28 = vector.broadcast %cst_19 : f32 to vector<64x64xf32>
    %29 = arith.mulf %27, %28 : vector<64x64xf32>
    %cst_20 = arith.constant dense<0xFF800000> : vector<64xf32>
    %30 = vector.multi_reduction <maximumf>, %29, %cst_20 [1] : vector<64x64xf32> to vector<64xf32>
    %31 = vector.shape_cast %30 : vector<64xf32> to vector<64x1xf32>
    %32 = vector.broadcast %31 : vector<64x1xf32> to vector<64x64xf32>
    %33 = arith.subf %29, %32 : vector<64x64xf32>
    %34 = math.exp %33 : vector<64x64xf32>
    %cst_21 = arith.constant dense<0.000000e+00> : vector<64xf32>
    %35 = vector.multi_reduction <add>, %34, %cst_21 [1] : vector<64x64xf32> to vector<64xf32>
    %36 = vector.shape_cast %35 : vector<64xf32> to vector<64x1xf32>
    %cst_22 = arith.constant dense<0.000000e+00> : vector<64x8xf32>
    %37 = tpu.matmul %34, %25, %cst_22 {dimension_numbers = #tpu.dot_dimension_numbers<[1], [0], [0], [1], [0, 0, 1, 1], [], []>} : vector<64x64xf32>, vector<64x8xf32>, vector<64x8xf32> -> vector<64x8xf32>
    %38 = tpu.reciprocal %36 {approx = true} : vector<64x1xf32> -> vector<64x1xf32>
    %39 = vector.broadcast %38 : vector<64x1xf32> to vector<64x8xf32>
    %40 = arith.mulf %37, %39 : vector<64x8xf32>
    %41 = vector.extract_strided_slice %20 {offsets = [0, 8], sizes = [64, 8], strides = [1, 1]} : vector<64x32xf32> to vector<64x8xf32>
    %42 = vector.extract_strided_slice %21 {offsets = [0, 8], sizes = [64, 8], strides = [1, 1]} : vector<64x32xf32> to vector<64x8xf32>
    %43 = vector.extract_strided_slice %22 {offsets = [0, 8], sizes = [64, 8], strides = [1, 1]} : vector<64x32xf32> to vector<64x8xf32>
    %44 = tpu.transpose %42, [1, 0] : vector<64x8xf32> -> vector<8x64xf32>
    %cst_23 = arith.constant dense<0.000000e+00> : vector<64x64xf32>
    %45 = tpu.matmul %41, %44, %cst_23 {dimension_numbers = #tpu.dot_dimension_numbers<[1], [0], [0], [1], [0, 0, 1, 1], [], []>} : vector<64x8xf32>, vector<8x64xf32>, vector<64x64xf32> -> vector<64x64xf32>
    %cst_24 = arith.constant 0.353553385 : f32
    %46 = vector.broadcast %cst_24 : f32 to vector<64x64xf32>
    %47 = arith.mulf %45, %46 : vector<64x64xf32>
    %cst_25 = arith.constant dense<0xFF800000> : vector<64xf32>
    %48 = vector.multi_reduction <maximumf>, %47, %cst_25 [1] : vector<64x64xf32> to vector<64xf32>
    %49 = vector.shape_cast %48 : vector<64xf32> to vector<64x1xf32>
    %50 = vector.broadcast %49 : vector<64x1xf32> to vector<64x64xf32>
    %51 = arith.subf %47, %50 : vector<64x64xf32>
    %52 = math.exp %51 : vector<64x64xf32>
    %cst_26 = arith.constant dense<0.000000e+00> : vector<64xf32>
    %53 = vector.multi_reduction <add>, %52, %cst_26 [1] : vector<64x64xf32> to vector<64xf32>
    %54 = vector.shape_cast %53 : vector<64xf32> to vector<64x1xf32>
    %cst_27 = arith.constant dense<0.000000e+00> : vector<64x8xf32>
    %55 = tpu.matmul %52, %43, %cst_27 {dimension_numbers = #tpu.dot_dimension_numbers<[1], [0], [0], [1], [0, 0, 1, 1], [], []>} : vector<64x64xf32>, vector<64x8xf32>, vector<64x8xf32> -> vector<64x8xf32>
    %56 = tpu.reciprocal %54 {approx = true} : vector<64x1xf32> -> vector<64x1xf32>
    %57 = vector.broadcast %56 : vector<64x1xf32> to vector<64x8xf32>
    %58 = arith.mulf %55, %57 : vector<64x8xf32>
    %59 = vector.extract_strided_slice %20 {offsets = [0, 16], sizes = [64, 8], strides = [1, 1]} : vector<64x32xf32> to vector<64x8xf32>
    %60 = vector.extract_strided_slice %21 {offsets = [0, 16], sizes = [64, 8], strides = [1, 1]} : vector<64x32xf32> to vector<64x8xf32>
    %61 = vector.extract_strided_slice %22 {offsets = [0, 16], sizes = [64, 8], strides = [1, 1]} : vector<64x32xf32> to vector<64x8xf32>
    %62 = tpu.transpose %60, [1, 0] : vector<64x8xf32> -> vector<8x64xf32>
    %cst_28 = arith.constant dense<0.000000e+00> : vector<64x64xf32>
    %63 = tpu.matmul %59, %62, %cst_28 {dimension_numbers = #tpu.dot_dimension_numbers<[1], [0], [0], [1], [0, 0, 1, 1], [], []>} : vector<64x8xf32>, vector<8x64xf32>, vector<64x64xf32> -> vector<64x64xf32>
    %cst_29 = arith.constant 0.353553385 : f32
    %64 = vector.broadcast %cst_29 : f32 to vector<64x64xf32>
    %65 = arith.mulf %63, %64 : vector<64x64xf32>
    %cst_30 = arith.constant dense<0xFF800000> : vector<64xf32>
    %66 = vector.multi_reduction <maximumf>, %65, %cst_30 [1] : vector<64x64xf32> to vector<64xf32>
    %67 = vector.shape_cast %66 : vector<64xf32> to vector<64x1xf32>
    %68 = vector.broadcast %67 : vector<64x1xf32> to vector<64x64xf32>
    %69 = arith.subf %65, %68 : vector<64x64xf32>
    %70 = math.exp %69 : vector<64x64xf32>
    %cst_31 = arith.constant dense<0.000000e+00> : vector<64xf32>
    %71 = vector.multi_reduction <add>, %70, %cst_31 [1] : vector<64x64xf32> to vector<64xf32>
    %72 = vector.shape_cast %71 : vector<64xf32> to vector<64x1xf32>
    %cst_32 = arith.constant dense<0.000000e+00> : vector<64x8xf32>
    %73 = tpu.matmul %70, %61, %cst_32 {dimension_numbers = #tpu.dot_dimension_numbers<[1], [0], [0], [1], [0, 0, 1, 1], [], []>} : vector<64x64xf32>, vector<64x8xf32>, vector<64x8xf32> -> vector<64x8xf32>
    %74 = tpu.reciprocal %72 {approx = true} : vector<64x1xf32> -> vector<64x1xf32>
    %75 = vector.broadcast %74 : vector<64x1xf32> to vector<64x8xf32>
    %76 = arith.mulf %73, %75 : vector<64x8xf32>
    %77 = vector.extract_strided_slice %20 {offsets = [0, 24], sizes = [64, 8], strides = [1, 1]} : vector<64x32xf32> to vector<64x8xf32>
    %78 = vector.extract_strided_slice %21 {offsets = [0, 24], sizes = [64, 8], strides = [1, 1]} : vector<64x32xf32> to vector<64x8xf32>
    %79 = vector.extract_strided_slice %22 {offsets = [0, 24], sizes = [64, 8], strides = [1, 1]} : vector<64x32xf32> to vector<64x8xf32>
    %80 = tpu.transpose %78, [1, 0] : vector<64x8xf32> -> vector<8x64xf32>
    %cst_33 = arith.constant dense<0.000000e+00> : vector<64x64xf32>
    %81 = tpu.matmul %77, %80, %cst_33 {dimension_numbers = #tpu.dot_dimension_numbers<[1], [0], [0], [1], [0, 0, 1, 1], [], []>} : vector<64x8xf32>, vector<8x64xf32>, vector<64x64xf32> -> vector<64x64xf32>
    %cst_34 = arith.constant 0.353553385 : f32
    %82 = vector.broadcast %cst_34 : f32 to vector<64x64xf32>
    %83 = arith.mulf %81, %82 : vector<64x64xf32>
    %cst_35 = arith.constant dense<0xFF800000> : vector<64xf32>
    %84 = vector.multi_reduction <maximumf>, %83, %cst_35 [1] : vector<64x64xf32> to vector<64xf32>
    %85 = vector.shape_cast %84 : vector<64xf32> to vector<64x1xf32>
    %86 = vector.broadcast %85 : vector<64x1xf32> to vector<64x64xf32>
    %87 = arith.subf %83, %86 : vector<64x64xf32>
    %88 = math.exp %87 : vector<64x64xf32>
    %cst_36 = arith.constant dense<0.000000e+00> : vector<64xf32>
    %89 = vector.multi_reduction <add>, %88, %cst_36 [1] : vector<64x64xf32> to vector<64xf32>
    %90 = vector.shape_cast %89 : vector<64xf32> to vector<64x1xf32>
    %cst_37 = arith.constant dense<0.000000e+00> : vector<64x8xf32>
    %91 = tpu.matmul %88, %79, %cst_37 {dimension_numbers = #tpu.dot_dimension_numbers<[1], [0], [0], [1], [0, 0, 1, 1], [], []>} : vector<64x64xf32>, vector<64x8xf32>, vector<64x8xf32> -> vector<64x8xf32>
    %92 = tpu.reciprocal %90 {approx = true} : vector<64x1xf32> -> vector<64x1xf32>
    %93 = vector.broadcast %92 : vector<64x1xf32> to vector<64x8xf32>
    %94 = arith.mulf %91, %93 : vector<64x8xf32>
    %95 = tpu.concatenate %40, %58, %76, %94 in 1 : vector<64x8xf32>, vector<64x8xf32>, vector<64x8xf32>, vector<64x8xf32> -> vector<64x32xf32>
    %96 = vector.extract_strided_slice %10 {offsets = [64, 0], sizes = [64, 32], strides = [1, 1]} : vector<128x32xf32> to vector<64x32xf32>
    %97 = vector.extract_strided_slice %18 {offsets = [64, 0], sizes = [64, 32], strides = [1, 1]} : vector<128x32xf32> to vector<64x32xf32>
    %98 = vector.extract_strided_slice %19 {offsets = [64, 0], sizes = [64, 32], strides = [1, 1]} : vector<128x32xf32> to vector<64x32xf32>
    %99 = vector.extract_strided_slice %96 {offsets = [0, 0], sizes = [64, 8], strides = [1, 1]} : vector<64x32xf32> to vector<64x8xf32>
    %100 = vector.extract_strided_slice %97 {offsets = [0, 0], sizes = [64, 8], strides = [1, 1]} : vector<64x32xf32> to vector<64x8xf32>
    %101 = vector.extract_strided_slice %98 {offsets = [0, 0], sizes = [64, 8], strides = [1, 1]} : vector<64x32xf32> to vector<64x8xf32>
    %102 = tpu.transpose %100, [1, 0] : vector<64x8xf32> -> vector<8x64xf32>
    %cst_38 = arith.constant dense<0.000000e+00> : vector<64x64xf32>
    %103 = tpu.matmul %99, %102, %cst_38 {dimension_numbers = #tpu.dot_dimension_numbers<[1], [0], [0], [1], [0, 0, 1, 1], [], []>} : vector<64x8xf32>, vector<8x64xf32>, vector<64x64xf32> -> vector<64x64xf32>
    %cst_39 = arith.constant 0.353553385 : f32
    %104 = vector.broadcast %cst_39 : f32 to vector<64x64xf32>
    %105 = arith.mulf %103, %104 : vector<64x64xf32>
    %cst_40 = arith.constant dense<0xFF800000> : vector<64xf32>
    %106 = vector.multi_reduction <maximumf>, %105, %cst_40 [1] : vector<64x64xf32> to vector<64xf32>
    %107 = vector.shape_cast %106 : vector<64xf32> to vector<64x1xf32>
    %108 = vector.broadcast %107 : vector<64x1xf32> to vector<64x64xf32>
    %109 = arith.subf %105, %108 : vector<64x64xf32>
    %110 = math.exp %109 : vector<64x64xf32>
    %cst_41 = arith.constant dense<0.000000e+00> : vector<64xf32>
    %111 = vector.multi_reduction <add>, %110, %cst_41 [1] : vector<64x64xf32> to vector<64xf32>
    %112 = vector.shape_cast %111 : vector<64xf32> to vector<64x1xf32>
    %cst_42 = arith.constant dense<0.000000e+00> : vector<64x8xf32>
    %113 = tpu.matmul %110, %101, %cst_42 {dimension_numbers = #tpu.dot_dimension_numbers<[1], [0], [0], [1], [0, 0, 1, 1], [], []>} : vector<64x64xf32>, vector<64x8xf32>, vector<64x8xf32> -> vector<64x8xf32>
    %114 = tpu.reciprocal %112 {approx = true} : vector<64x1xf32> -> vector<64x1xf32>
    %115 = vector.broadcast %114 : vector<64x1xf32> to vector<64x8xf32>
    %116 = arith.mulf %113, %115 : vector<64x8xf32>
    %117 = vector.extract_strided_slice %96 {offsets = [0, 8], sizes = [64, 8], strides = [1, 1]} : vector<64x32xf32> to vector<64x8xf32>
    %118 = vector.extract_strided_slice %97 {offsets = [0, 8], sizes = [64, 8], strides = [1, 1]} : vector<64x32xf32> to vector<64x8xf32>
    %119 = vector.extract_strided_slice %98 {offsets = [0, 8], sizes = [64, 8], strides = [1, 1]} : vector<64x32xf32> to vector<64x8xf32>
    %120 = tpu.transpose %118, [1, 0] : vector<64x8xf32> -> vector<8x64xf32>
    %cst_43 = arith.constant dense<0.000000e+00> : vector<64x64xf32>
    %121 = tpu.matmul %117, %120, %cst_43 {dimension_numbers = #tpu.dot_dimension_numbers<[1], [0], [0], [1], [0, 0, 1, 1], [], []>} : vector<64x8xf32>, vector<8x64xf32>, vector<64x64xf32> -> vector<64x64xf32>
    %cst_44 = arith.constant 0.353553385 : f32
    %122 = vector.broadcast %cst_44 : f32 to vector<64x64xf32>
    %123 = arith.mulf %121, %122 : vector<64x64xf32>
    %cst_45 = arith.constant dense<0xFF800000> : vector<64xf32>
    %124 = vector.multi_reduction <maximumf>, %123, %cst_45 [1] : vector<64x64xf32> to vector<64xf32>
    %125 = vector.shape_cast %124 : vector<64xf32> to vector<64x1xf32>
    %126 = vector.broadcast %125 : vector<64x1xf32> to vector<64x64xf32>
    %127 = arith.subf %123, %126 : vector<64x64xf32>
    %128 = math.exp %127 : vector<64x64xf32>
    %cst_46 = arith.constant dense<0.000000e+00> : vector<64xf32>
    %129 = vector.multi_reduction <add>, %128, %cst_46 [1] : vector<64x64xf32> to vector<64xf32>
    %130 = vector.shape_cast %129 : vector<64xf32> to vector<64x1xf32>
    %cst_47 = arith.constant dense<0.000000e+00> : vector<64x8xf32>
    %131 = tpu.matmul %128, %119, %cst_47 {dimension_numbers = #tpu.dot_dimension_numbers<[1], [0], [0], [1], [0, 0, 1, 1], [], []>} : vector<64x64xf32>, vector<64x8xf32>, vector<64x8xf32> -> vector<64x8xf32>
    %132 = tpu.reciprocal %130 {approx = true} : vector<64x1xf32> -> vector<64x1xf32>
    %133 = vector.broadcast %132 : vector<64x1xf32> to vector<64x8xf32>
    %134 = arith.mulf %131, %133 : vector<64x8xf32>
    %135 = vector.extract_strided_slice %96 {offsets = [0, 16], sizes = [64, 8], strides = [1, 1]} : vector<64x32xf32> to vector<64x8xf32>
    %136 = vector.extract_strided_slice %97 {offsets = [0, 16], sizes = [64, 8], strides = [1, 1]} : vector<64x32xf32> to vector<64x8xf32>
    %137 = vector.extract_strided_slice %98 {offsets = [0, 16], sizes = [64, 8], strides = [1, 1]} : vector<64x32xf32> to vector<64x8xf32>
    %138 = tpu.transpose %136, [1, 0] : vector<64x8xf32> -> vector<8x64xf32>
    %cst_48 = arith.constant dense<0.000000e+00> : vector<64x64xf32>
    %139 = tpu.matmul %135, %138, %cst_48 {dimension_numbers = #tpu.dot_dimension_numbers<[1], [0], [0], [1], [0, 0, 1, 1], [], []>} : vector<64x8xf32>, vector<8x64xf32>, vector<64x64xf32> -> vector<64x64xf32>
    %cst_49 = arith.constant 0.353553385 : f32
    %140 = vector.broadcast %cst_49 : f32 to vector<64x64xf32>
    %141 = arith.mulf %139, %140 : vector<64x64xf32>
    %cst_50 = arith.constant dense<0xFF800000> : vector<64xf32>
    %142 = vector.multi_reduction <maximumf>, %141, %cst_50 [1] : vector<64x64xf32> to vector<64xf32>
    %143 = vector.shape_cast %142 : vector<64xf32> to vector<64x1xf32>
    %144 = vector.broadcast %143 : vector<64x1xf32> to vector<64x64xf32>
    %145 = arith.subf %141, %144 : vector<64x64xf32>
    %146 = math.exp %145 : vector<64x64xf32>
    %cst_51 = arith.constant dense<0.000000e+00> : vector<64xf32>
    %147 = vector.multi_reduction <add>, %146, %cst_51 [1] : vector<64x64xf32> to vector<64xf32>
    %148 = vector.shape_cast %147 : vector<64xf32> to vector<64x1xf32>
    %cst_52 = arith.constant dense<0.000000e+00> : vector<64x8xf32>
    %149 = tpu.matmul %146, %137, %cst_52 {dimension_numbers = #tpu.dot_dimension_numbers<[1], [0], [0], [1], [0, 0, 1, 1], [], []>} : vector<64x64xf32>, vector<64x8xf32>, vector<64x8xf32> -> vector<64x8xf32>
    %150 = tpu.reciprocal %148 {approx = true} : vector<64x1xf32> -> vector<64x1xf32>
    %151 = vector.broadcast %150 : vector<64x1xf32> to vector<64x8xf32>
    %152 = arith.mulf %149, %151 : vector<64x8xf32>
    %153 = vector.extract_strided_slice %96 {offsets = [0, 24], sizes = [64, 8], strides = [1, 1]} : vector<64x32xf32> to vector<64x8xf32>
    %154 = vector.extract_strided_slice %97 {offsets = [0, 24], sizes = [64, 8], strides = [1, 1]} : vector<64x32xf32> to vector<64x8xf32>
    %155 = vector.extract_strided_slice %98 {offsets = [0, 24], sizes = [64, 8], strides = [1, 1]} : vector<64x32xf32> to vector<64x8xf32>
    %156 = tpu.transpose %154, [1, 0] : vector<64x8xf32> -> vector<8x64xf32>
    %cst_53 = arith.constant dense<0.000000e+00> : vector<64x64xf32>
    %157 = tpu.matmul %153, %156, %cst_53 {dimension_numbers = #tpu.dot_dimension_numbers<[1], [0], [0], [1], [0, 0, 1, 1], [], []>} : vector<64x8xf32>, vector<8x64xf32>, vector<64x64xf32> -> vector<64x64xf32>
    %cst_54 = arith.constant 0.353553385 : f32
    %158 = vector.broadcast %cst_54 : f32 to vector<64x64xf32>
    %159 = arith.mulf %157, %158 : vector<64x64xf32>
    %cst_55 = arith.constant dense<0xFF800000> : vector<64xf32>
    %160 = vector.multi_reduction <maximumf>, %159, %cst_55 [1] : vector<64x64xf32> to vector<64xf32>
    %161 = vector.shape_cast %160 : vector<64xf32> to vector<64x1xf32>
    %162 = vector.broadcast %161 : vector<64x1xf32> to vector<64x64xf32>
    %163 = arith.subf %159, %162 : vector<64x64xf32>
    %164 = math.exp %163 : vector<64x64xf32>
    %cst_56 = arith.constant dense<0.000000e+00> : vector<64xf32>
    %165 = vector.multi_reduction <add>, %164, %cst_56 [1] : vector<64x64xf32> to vector<64xf32>
    %166 = vector.shape_cast %165 : vector<64xf32> to vector<64x1xf32>
    %cst_57 = arith.constant dense<0.000000e+00> : vector<64x8xf32>
    %167 = tpu.matmul %164, %155, %cst_57 {dimension_numbers = #tpu.dot_dimension_numbers<[1], [0], [0], [1], [0, 0, 1, 1], [], []>} : vector<64x64xf32>, vector<64x8xf32>, vector<64x8xf32> -> vector<64x8xf32>
    %168 = tpu.reciprocal %166 {approx = true} : vector<64x1xf32> -> vector<64x1xf32>
    %169 = vector.broadcast %168 : vector<64x1xf32> to vector<64x8xf32>
    %170 = arith.mulf %167, %169 : vector<64x8xf32>
    %171 = tpu.concatenate %116, %134, %152, %170 in 1 : vector<64x8xf32>, vector<64x8xf32>, vector<64x8xf32>, vector<64x8xf32> -> vector<64x32xf32>
    %172 = tpu.concatenate %95, %171 in 0 : vector<64x32xf32>, vector<64x32xf32> -> vector<128x32xf32>
    %c0_58 = arith.constant 0 : index
    %c0_59 = arith.constant 0 : index
    %c0_60 = arith.constant 0 : index
    %173 = vector.load %arg7[%c0_58, %c0_59, %c0_60] : memref<1x32x32xf32, #tpu.memory_space<vmem>>, vector<1x32x32xf32>
    %174 = vector.shape_cast %173 : vector<1x32x32xf32> to vector<32x32xf32>
    %cst_61 = arith.constant dense<0.000000e+00> : vector<128x32xf32>
    %175 = tpu.matmul %172, %174, %cst_61 {dimension_numbers = #tpu.dot_dimension_numbers<[1], [0], [0], [1], [0, 0, 1, 1], [], []>} : vector<128x32xf32>, vector<32x32xf32>, vector<128x32xf32> -> vector<128x32xf32>
    %c0_62 = arith.constant 0 : index
    %c0_63 = arith.constant 0 : index
    %c0_64 = arith.constant 0 : index
    %176 = vector.load %arg8[%c0_62, %c0_63, %c0_64] : memref<1x1x32xf32, #tpu.memory_space<vmem>>, vector<1x1x32xf32>
    %177 = vector.shape_cast %176 : vector<1x1x32xf32> to vector<1x32xf32>
    %178 = vector.broadcast %177 : vector<1x32xf32> to vector<128x32xf32>
    %179 = arith.addf %175, %178 : vector<128x32xf32>
    %180 = arith.addf %1, %179 : vector<128x32xf32>
    %cst_65 = arith.constant dense<0.000000e+00> : vector<128xf32>
    %181 = vector.multi_reduction <add>, %180, %cst_65 [1] : vector<128x32xf32> to vector<128xf32>
    %182 = vector.shape_cast %181 : vector<128xf32> to vector<128x1xf32>
    %cst_66 = arith.constant 3.200000e+01 : f32
    %183 = vector.broadcast %cst_66 : f32 to vector<128x1xf32>
    %184 = arith.divf %182, %183 : vector<128x1xf32>
    %185 = vector.broadcast %184 : vector<128x1xf32> to vector<128x32xf32>
    %186 = arith.subf %180, %185 : vector<128x32xf32>
    %187 = arith.mulf %186, %186 : vector<128x32xf32>
    %cst_67 = arith.constant dense<0.000000e+00> : vector<128xf32>
    %188 = vector.multi_reduction <add>, %187, %cst_67 [1] : vector<128x32xf32> to vector<128xf32>
    %189 = vector.shape_cast %188 : vector<128xf32> to vector<128x1xf32>
    %cst_68 = arith.constant 3.200000e+01 : f32
    %190 = vector.broadcast %cst_68 : f32 to vector<128x1xf32>
    %191 = arith.divf %189, %190 : vector<128x1xf32>
    %cst_69 = arith.constant 9.99999974E-6 : f32
    %192 = vector.broadcast %cst_69 : f32 to vector<128x1xf32>
    %193 = arith.addf %191, %192 : vector<128x1xf32>
    %194 = math.rsqrt %193 : vector<128x1xf32>
    %195 = vector.broadcast %194 : vector<128x1xf32> to vector<128x32xf32>
    %196 = arith.mulf %186, %195 : vector<128x32xf32>
    %c0_70 = arith.constant 0 : index
    %c0_71 = arith.constant 0 : index
    %c0_72 = arith.constant 0 : index
    %197 = vector.load %arg9[%c0_70, %c0_71, %c0_72] : memref<1x1x32xf32, #tpu.memory_space<vmem>>, vector<1x1x32xf32>
    %198 = vector.shape_cast %197 : vector<1x1x32xf32> to vector<1x32xf32>
    %199 = vector.broadcast %198 : vector<1x32xf32> to vector<128x32xf32>
    %200 = arith.mulf %196, %199 : vector<128x32xf32>
    %c0_73 = arith.constant 0 : index
    %c0_74 = arith.constant 0 : index
    %c0_75 = arith.constant 0 : index
    %201 = vector.load %arg10[%c0_73, %c0_74, %c0_75] : memref<1x1x32xf32, #tpu.memory_space<vmem>>, vector<1x1x32xf32>
    %202 = vector.shape_cast %201 : vector<1x1x32xf32> to vector<1x32xf32>
    %203 = vector.broadcast %202 : vector<1x32xf32> to vector<128x32xf32>
    %204 = arith.addf %200, %203 : vector<128x32xf32>
    %c0_76 = arith.constant 0 : index
    %c0_77 = arith.constant 0 : index
    %c0_78 = arith.constant 0 : index
    %205 = vector.load %arg11[%c0_76, %c0_77, %c0_78] : memref<1x32x64xf32, #tpu.memory_space<vmem>>, vector<1x32x64xf32>
    %206 = vector.shape_cast %205 : vector<1x32x64xf32> to vector<32x64xf32>
    %cst_79 = arith.constant dense<0.000000e+00> : vector<128x64xf32>
    %207 = tpu.matmul %204, %206, %cst_79 {dimension_numbers = #tpu.dot_dimension_numbers<[1], [0], [0], [1], [0, 0, 1, 1], [], []>} : vector<128x32xf32>, vector<32x64xf32>, vector<128x64xf32> -> vector<128x64xf32>
    %c0_80 = arith.constant 0 : index
    %c0_81 = arith.constant 0 : index
    %c0_82 = arith.constant 0 : index
    %208 = vector.load %arg12[%c0_80, %c0_81, %c0_82] : memref<1x1x64xf32, #tpu.memory_space<vmem>>, vector<1x1x64xf32>
    %209 = vector.shape_cast %208 : vector<1x1x64xf32> to vector<1x64xf32>
    %210 = vector.broadcast %209 : vector<1x64xf32> to vector<128x64xf32>
    %211 = arith.addf %207, %210 : vector<128x64xf32>
    %cst_83 = arith.constant 0.000000e+00 : f32
    %212 = vector.broadcast %cst_83 : f32 to vector<128x64xf32>
    %213 = arith.maximumf %211, %212 : vector<128x64xf32>
    %c0_84 = arith.constant 0 : index
    %c0_85 = arith.constant 0 : index
    %c0_86 = arith.constant 0 : index
    %214 = vector.load %arg13[%c0_84, %c0_85, %c0_86] : memref<1x64x32xf32, #tpu.memory_space<vmem>>, vector<1x64x32xf32>
    %215 = vector.shape_cast %214 : vector<1x64x32xf32> to vector<64x32xf32>
    %cst_87 = arith.constant dense<0.000000e+00> : vector<128x32xf32>
    %216 = tpu.matmul %213, %215, %cst_87 {dimension_numbers = #tpu.dot_dimension_numbers<[1], [0], [0], [1], [0, 0, 1, 1], [], []>} : vector<128x64xf32>, vector<64x32xf32>, vector<128x32xf32> -> vector<128x32xf32>
    %c0_88 = arith.constant 0 : index
    %c0_89 = arith.constant 0 : index
    %c0_90 = arith.constant 0 : index
    %217 = vector.load %arg14[%c0_88, %c0_89, %c0_90] : memref<1x1x32xf32, #tpu.memory_space<vmem>>, vector<1x1x32xf32>
    %218 = vector.shape_cast %217 : vector<1x1x32xf32> to vector<1x32xf32>
    %219 = vector.broadcast %218 : vector<1x32xf32> to vector<128x32xf32>
    %220 = arith.addf %216, %219 : vector<128x32xf32>
    %221 = arith.addf %204, %220 : vector<128x32xf32>
    %cst_91 = arith.constant dense<0.000000e+00> : vector<128xf32>
    %222 = vector.multi_reduction <add>, %221, %cst_91 [1] : vector<128x32xf32> to vector<128xf32>
    %223 = vector.shape_cast %222 : vector<128xf32> to vector<128x1xf32>
    %cst_92 = arith.constant 3.200000e+01 : f32
    %224 = vector.broadcast %cst_92 : f32 to vector<128x1xf32>
    %225 = arith.divf %223, %224 : vector<128x1xf32>
    %226 = vector.broadcast %225 : vector<128x1xf32> to vector<128x32xf32>
    %227 = arith.subf %221, %226 : vector<128x32xf32>
    %228 = arith.mulf %227, %227 : vector<128x32xf32>
    %cst_93 = arith.constant dense<0.000000e+00> : vector<128xf32>
    %229 = vector.multi_reduction <add>, %228, %cst_93 [1] : vector<128x32xf32> to vector<128xf32>
    %230 = vector.shape_cast %229 : vector<128xf32> to vector<128x1xf32>
    %cst_94 = arith.constant 3.200000e+01 : f32
    %231 = vector.broadcast %cst_94 : f32 to vector<128x1xf32>
    %232 = arith.divf %230, %231 : vector<128x1xf32>
    %cst_95 = arith.constant 9.99999974E-6 : f32
    %233 = vector.broadcast %cst_95 : f32 to vector<128x1xf32>
    %234 = arith.addf %232, %233 : vector<128x1xf32>
    %235 = math.rsqrt %234 : vector<128x1xf32>
    %236 = vector.broadcast %235 : vector<128x1xf32> to vector<128x32xf32>
    %237 = arith.mulf %227, %236 : vector<128x32xf32>
    %c0_96 = arith.constant 0 : index
    %c0_97 = arith.constant 0 : index
    %c0_98 = arith.constant 0 : index
    %238 = vector.load %arg15[%c0_96, %c0_97, %c0_98] : memref<1x1x32xf32, #tpu.memory_space<vmem>>, vector<1x1x32xf32>
    %239 = vector.shape_cast %238 : vector<1x1x32xf32> to vector<1x32xf32>
    %240 = vector.broadcast %239 : vector<1x32xf32> to vector<128x32xf32>
    %241 = arith.mulf %237, %240 : vector<128x32xf32>
    %c0_99 = arith.constant 0 : index
    %c0_100 = arith.constant 0 : index
    %c0_101 = arith.constant 0 : index
    %242 = vector.load %arg16[%c0_99, %c0_100, %c0_101] : memref<1x1x32xf32, #tpu.memory_space<vmem>>, vector<1x1x32xf32>
    %243 = vector.shape_cast %242 : vector<1x1x32xf32> to vector<1x32xf32>
    %244 = vector.broadcast %243 : vector<1x32xf32> to vector<128x32xf32>
    %245 = arith.addf %241, %244 : vector<128x32xf32>
    %c0_102 = arith.constant 0 : index
    %c0_103 = arith.constant 0 : index
    %c0_104 = arith.constant 0 : index
    %246 = vector.load %arg17[%c0_102, %c0_103, %c0_104] : memref<1x128x32xf32, #tpu.memory_space<vmem>>, vector<1x128x32xf32>
    %247 = vector.shape_cast %246 : vector<1x128x32xf32> to vector<128x32xf32>
    %248 = vector.shape_cast %245 : vector<128x32xf32> to vector<1x128x32xf32>
    tpu.vector_store %arg17[%c0_102, %c0_103, %c0_104], %248 {strides = array<i32>} : memref<1x128x32xf32, #tpu.memory_space<vmem>>, vector<1x128x32xf32>,
    return
  }
  func.func @transform_0(%arg0: i32) -> (i32, i32, i32) {
    %c0_i32 = arith.constant 0 : i32
    %c0_i32_0 = arith.constant 0 : i32
    %c0_i32_1 = arith.constant 0 : i32
    return %arg0, %c0_i32, %c0_i32_0 : i32, i32, i32
  }
  func.func @transform_1(%arg0: i32) -> (i32, i32, i32) {
    %c0_i32 = arith.constant 0 : i32
    %c0_i32_0 = arith.constant 0 : i32
    %c0_i32_1 = arith.constant 0 : i32
    return %arg0, %c0_i32, %c0_i32_0 : i32, i32, i32
  }
  func.func @transform_2(%arg0: i32) -> (i32, i32, i32) {
    %c0_i32 = arith.constant 0 : i32
    %c0_i32_0 = arith.constant 0 : i32
    %c0_i32_1 = arith.constant 0 : i32
    return %arg0, %c0_i32, %c0_i32_0 : i32, i32, i32
  }
  func.func @transform_3(%arg0: i32) -> (i32, i32, i32) {
    %c0_i32 = arith.constant 0 : i32
    %c0_i32_0 = arith.constant 0 : i32
    %c0_i32_1 = arith.constant 0 : i32
    return %arg0, %c0_i32, %c0_i32_0 : i32, i32, i32
  }
  func.func @transform_4(%arg0: i32) -> (i32, i32, i32) {
    %c0_i32 = arith.constant 0 : i32
    %c0_i32_0 = arith.constant 0 : i32
    %c0_i32_1 = arith.constant 0 : i32
    return %arg0, %c0_i32, %c0_i32_0 : i32, i32, i32
  }
  func.func @transform_5(%arg0: i32) -> (i32, i32, i32) {
    %c0_i32 = arith.constant 0 : i32
    %c0_i32_0 = arith.constant 0 : i32
    %c0_i32_1 = arith.constant 0 : i32
    return %arg0, %c0_i32, %c0_i32_0 : i32, i32, i32
  }
  func.func @transform_6(%arg0: i32) -> (i32, i32, i32) {
    %c0_i32 = arith.constant 0 : i32
    %c0_i32_0 = arith.constant 0 : i32
    %c0_i32_1 = arith.constant 0 : i32
    return %arg0, %c0_i32, %c0_i32_0 : i32, i32, i32
  }
  func.func @transform_7(%arg0: i32) -> (i32, i32, i32) {
    %c0_i32 = arith.constant 0 : i32
    %c0_i32_0 = arith.constant 0 : i32
    %c0_i32_1 = arith.constant 0 : i32
    return %arg0, %c0_i32, %c0_i32_0 : i32, i32, i32
  }
  func.func @transform_8(%arg0: i32) -> (i32, i32, i32) {
    %c0_i32 = arith.constant 0 : i32
    %c0_i32_0 = arith.constant 0 : i32
    %c0_i32_1 = arith.constant 0 : i32
    return %arg0, %c0_i32, %c0_i32_0 : i32, i32, i32
  }
  func.func @transform_9(%arg0: i32) -> (i32, i32, i32) {
    %c0_i32 = arith.constant 0 : i32
    %c0_i32_0 = arith.constant 0 : i32
    %c0_i32_1 = arith.constant 0 : i32
    return %arg0, %c0_i32, %c0_i32_0 : i32, i32, i32
  }
  func.func @transform_10(%arg0: i32) -> (i32, i32, i32) {
    %c0_i32 = arith.constant 0 : i32
    %c0_i32_0 = arith.constant 0 : i32
    %c0_i32_1 = arith.constant 0 : i32
    return %arg0, %c0_i32, %c0_i32_0 : i32, i32, i32
  }
  func.func @transform_11(%arg0: i32) -> (i32, i32, i32) {
    %c0_i32 = arith.constant 0 : i32
    %c0_i32_0 = arith.constant 0 : i32
    %c0_i32_1 = arith.constant 0 : i32
    return %arg0, %c0_i32, %c0_i32_0 : i32, i32, i32
  }
  func.func @transform_12(%arg0: i32) -> (i32, i32, i32) {
    %c0_i32 = arith.constant 0 : i32
    %c0_i32_0 = arith.constant 0 : i32
    %c0_i32_1 = arith.constant 0 : i32
    return %arg0, %c0_i32, %c0_i32_0 : i32, i32, i32
  }
  func.func @transform_13(%arg0: i32) -> (i32, i32, i32) {
    %c0_i32 = arith.constant 0 : i32
    %c0_i32_0 = arith.constant 0 : i32
    %c0_i32_1 = arith.constant 0 : i32
    return %arg0, %c0_i32, %c0_i32_0 : i32, i32, i32
  }
  func.func @transform_14(%arg0: i32) -> (i32, i32, i32) {
    %c0_i32 = arith.constant 0 : i32
    %c0_i32_0 = arith.constant 0 : i32
    %c0_i32_1 = arith.constant 0 : i32
    return %arg0, %c0_i32, %c0_i32_0 : i32, i32, i32
  }
  func.func @transform_15(%arg0: i32) -> (i32, i32, i32) {
    %c0_i32 = arith.constant 0 : i32
    %c0_i32_0 = arith.constant 0 : i32
    %c0_i32_1 = arith.constant 0 : i32
    return %arg0, %c0_i32, %c0_i32_0 : i32, i32, i32
  }
  func.func @transform_16(%arg0: i32) -> (i32, i32, i32) {
    %c0_i32 = arith.constant 0 : i32
    %c0_i32_0 = arith.constant 0 : i32
    %c0_i32_1 = arith.constant 0 : i32
    return %arg0, %c0_i32, %c0_i32_0 : i32, i32, i32
  }
}

</mosaic_0001>

<bundles_post_ra>
// kernel: encoder_layer_co_attention.1
= control target key start
LH: loop header
LB: loop body
LE: loop exit
PB: predicated region body
PF: predicated region fallthrough
CT: control target
= control target key end

     0   :  { %s5950_s21 = smov 0   ;;  %s8751_s0 = inlined_call_operand.vmem [shape: f32[2,128,32], index: 0, kind: input, shape index: {}]   ;;  %s8752_s1 = inlined_call_operand.vmem [shape: f32[2,128,32], index: 1, kind: input, shape index: {}]   ;;  %s8753_s2 = inlined_call_operand.vmem [shape: f32[2,32,32], index: 2, kind: input, shape index: {}]   ;;  %s8754_s3 = inlined_call_operand.vmem [shape: f32[2,1,32], index: 3, kind: input, shape index: {}]   ;;  %s8755_s4 = inlined_call_operand.vmem [shape: f32[2,32,64], index: 4, kind: input, shape index: {}]   ;;  %s8756_s5 = inlined_call_operand.vmem [shape: f32[2,1,64], index: 5, kind: input, shape index: {}]   ;;  %s8757_s6 = inlined_call_operand.vmem [shape: f32[2,32,32], index: 6, kind: input, shape index: {}]   ;;  %s8758_s7 = inlined_call_operand.vmem [shape: f32[2,1,32], index: 7, kind: input, shape index: {}]   ;;  %s8759_s8 = inlined_call_operand.vmem [shape: f32[2,1,32], index: 8, kind: input, shape index: {}]   ;;  %s8760_s9 = inlined_call_operand.vmem [shape: f32[2,1,32], index: 9, kind: input, shape index: {}]   ;;  %s8761_s10 = inlined_call_operand.vmem [shape: f32[2,32,64], index: 10, kind: input, shape index: {}]   ;;  %s8762_s11 = inlined_call_operand.vmem [shape: f32[2,1,64], index: 11, kind: input, shape index: {}]   ;;  %s8763_s12 = inlined_call_operand.vmem [shape: f32[2,64,32], index: 12, kind: input, shape index: {}]   ;;  %s8764_s13 = inlined_call_operand.vmem [shape: f32[2,1,32], index: 13, kind: input, shape index: {}]   ;;  %s8765_s14 = inlined_call_operand.vmem [shape: f32[2,1,32], index: 14, kind: input, shape index: {}]   ;;  %s8766_s15 = inlined_call_operand.vmem [shape: f32[2,1,32], index: 15, kind: input, shape index: {}]   ;;  %s8767_s16 = inlined_call_operand.vmem [shape: f32[2,128,32], index: 16, kind: output, shape index: {}]  }
   0x1   :  { %8785 = sst [smem:[#allocation35_spill]] %s8751_s0 }
   0x2 LB: > { %s5005_s22 = sadd.s32 4294967295, %s5852_s21   ;;  %p5009_p0 = scmp.ge.s32.totalorder %s5852_s21, 1  ;;  %s5852_s21 = sphi %s5950_s21, %s26_s21  }
   0x3   : > { %p594_p1 = scmp.lt.s32.totalorder %s5852_s21, 3 }
   0x5   : > { %p595_p2 = pnand %p5009_p0, %p594_p1 }
   0x7   : > { %598 = sbr.rel (%p595_p2) target bundleno = 2986 (0xbaa), region = 84 }
   0xc   : > { %p701_p3 = scmp.lt.s32.totalorder %s5005_s22, 1  ;;  %s8786_s18 = sld [smem:[#allocation35_spill]]  ;;  %vm808_vm0 = vcmask 261120   ;;  %vm1043_vm1 = vcmask 64512   ;;  %vm1141_vm2 = vcmask 523264   ;;  %vm2293_vm3 = vcmask 130048  }
   0xd   : > { %s5854_s29 = smov 112   ;;  %s5856_s17 = smov 104   ;;  %vm2302_vm4 = vcmask 195584  }
   0xe   : > { %s8856_s22 = smov (!%p701_p3, %s5005_s22), 1  ;;  %s5862_s25 = smov 16  }
   0xf   : > { %s5961_s23 = sshll.u32 %s8856_s22, 5  ;;  %s5964_s24 = sshll.u32 %s8856_s22, 7 }
  0x10   : > { %s715_s27 = scalar_lea.vmem %s8753_s2, %s5961_s23  ;;  %s723_s30 = scalar_lea.vmem %s8755_s4, %s5961_s23 }
  0x11   : > { %v803_v0 = vld [vmem:[%s715_s27 + $0x18] sm:$0xff]  ;;  %v802_v2 = vld [vmem:[%s715_s27 + $0x10] sm:$0xff]  ;;  %v801_v4 = vld [vmem:[%s715_s27 + $0x8] sm:$0xff]  ;;  %s5984_s26 = scalar_lea.vmem %s8752_s1, %s5964_s24  ;;  %s718_s0 = scalar_lea.vmem %s8754_s3, %s8856_s22 }
  0x12   : > { %v925_v1 = vld [vmem:[%s723_s30 + $0x18] sm:$0xff]  ;;  %869 = vmatpush.msra.mxu0 %v803_v0  ;;  %v924_v3 = vld [vmem:[%s723_s30 + $0x10] sm:$0xff]  ;;  %s5978_s19 = scalar_lea.vmem %s8786_s18, %s5964_s24  ;;  %v923_v5 = vld [vmem:[%s723_s30 + $0x8] sm:$0xff]  ;;  %s726_s20 = scalar_lea.vmem %s8756_s5, %s8856_s22 }
  0x13   : > { %990 = vmatpush.msra.mxu1 %v925_v1  ;;  %v800_v6 = vld [vmem:[%s715_s27] sm:$0xff]  ;;  %v785_v10 = vld [vmem:[%s5984_s26 + $0x8] sm:$0xff]  ;;  %v786_v12 = vld [vmem:[%s5984_s26 + $0x10] sm:$0xff]  ;;  %s5857_s18 = smov 96   ;;  %s5860_s27 = smov 80  }
  0x14   : > { %870 = vmatpush.msra.mxu0 %v802_v2  ;;  %v922_v7 = vld [vmem:[%s723_s30] sm:$0xff]  ;;  %v769_v11 = vld [vmem:[%s5978_s19 + $0x8] sm:$0xff]  ;;  %v770_v13 = vld [vmem:[%s5978_s19 + $0x10] sm:$0xff]  ;;  %s5861_s30 = smov 24   ;;  %s5863_s28 = smov 8  }
  0x15   : > { %991 = vmatpush.msra.mxu1 %v924_v3  ;;  %v768_v8 = vld [vmem:[%s5978_s19] sm:$0xff]  ;;  %v787_v14 = vld [vmem:[%s5984_s26 + $0x18] sm:$0xff]  ;;  %v789_v18 = vld [vmem:[%s5984_s26 + $0x28] sm:$0xff] }
  0x16   : > { %871 = vmatpush.msra.mxu0 %v801_v4  ;;  %v784_v9 = vld [vmem:[%s5984_s26] sm:$0xff]  ;;  %v771_v15 = vld [vmem:[%s5978_s19 + $0x18] sm:$0xff]  ;;  %v773_v19 = vld [vmem:[%s5978_s19 + $0x28] sm:$0xff] }
  0x17   : > { %992 = vmatpush.msra.mxu1 %v923_v5  ;;  %v788_v16 = vld [vmem:[%s5984_s26 + $0x20] sm:$0xff]  ;;  %v790_v20 = vld [vmem:[%s5984_s26 + $0x30] sm:$0xff]  ;;  %v791_v22 = vld [vmem:[%s5984_s26 + $0x38] sm:$0xff] }
  0x18   : > { %872 = vmatpush.msra.mxu0 %v800_v6  ;;  %v772_v17 = vld [vmem:[%s5978_s19 + $0x20] sm:$0xff]  ;;  %v774_v21 = vld [vmem:[%s5978_s19 + $0x30] sm:$0xff]  ;;  %v775_v23 = vld [vmem:[%s5978_s19 + $0x38] sm:$0xff] }
  0x19   : > { %993 = vmatpush.msra.mxu1 %v922_v7  ;;  %5026 = vmatmul.msk.f32.vlgmr.msra.gmra.mxu0 %vm808_vm0, %v768_v8  ;;  %v792_v24 = vld [vmem:[%s5984_s26 + $0x40] sm:$0xff]  ;;  %v793_v26 = vld [vmem:[%s5984_s26 + $0x48] sm:$0xff]  ;;  %v794_v28 = vld [vmem:[%s5984_s26 + $0x50] sm:$0xff] }
  0x1a   : > { %5042 = vmatmul.msk.f32.vlgmr.msra.gmra.mxu1 %vm808_vm0, %v784_v9  ;;  %v776_v25 = vld [vmem:[%s5978_s19 + $0x40] sm:$0xff]  ;;  %v777_v27 = vld [vmem:[%s5978_s19 + $0x48] sm:$0xff]  ;;  %v795_v29 = vld [vmem:[%s5984_s26 + $0x58] sm:$0xff] }
  0x1b   : > { %v796_v30 = vld [vmem:[%s5984_s26 + $0x60] sm:$0xff]  ;;  %v778_v31 = vld [vmem:[%s5978_s19 + $0x50] sm:$0xff]  ;;  %v797_v32 = vld [vmem:[%s5984_s26 + $0x68] sm:$0xff] }
  0x1c   : > { %v779_v33 = vld [vmem:[%s5978_s19 + $0x58] sm:$0xff]  ;;  %v798_v34 = vld [vmem:[%s5984_s26 + $0x70] sm:$0xff]  ;;  %v6053_v35 = vld [vmem:[%s718_s0] ss:$0 sm:$0xff]  ;;  %s5855_s0 = smov 120  }
  0x1d   : > { %v6060_v36 = vld [vmem:[%s726_s20] ss:$0 sm:$0xff]  ;;  %v781_v45 = vld [vmem:[%s5978_s19 + $0x68] sm:$0xff]  ;;  %s5858_s20 = smov 88   ;;  %v799_v56 = vld [vmem:[%s5984_s26 + $0x78] sm:$0xff]  ;;  %s5859_s26 = smov 72  }
  0x1e   : > { %v780_v41 = vld [vmem:[%s5978_s19 + $0x60] sm:$0xff]  ;;  %v782_v57 = vld [vmem:[%s5978_s19 + $0x70] sm:$0xff]  ;;  %v783_v60 = vld [vmem:[%s5978_s19 + $0x78] sm:$0xff] }
  0x21   : > { %5027 = vmatmul.msk.f32.gmra.mxu0 %vm808_vm0, %v769_v11 }
  0x22   : > { %5043 = vmatmul.msk.f32.gmra.mxu1 %vm808_vm0, %v785_v10 }
  0x29   : > { %5028 = vmatmul.msk.f32.gmra.mxu0 %vm808_vm0, %v770_v13 }
  0x2a   : > { %5044 = vmatmul.msk.f32.gmra.mxu1 %vm808_vm0, %v786_v12 }
  0x31   : > { %5029 = vmatmul.msk.f32.gmra.mxu0 %vm808_vm0, %v771_v15 }
  0x32   : > { %5045 = vmatmul.msk.f32.gmra.mxu1 %vm808_vm0, %v787_v14 }
  0x39   : > { %5030 = vmatmul.msk.f32.gmra.mxu0 %vm808_vm0, %v772_v17 }
  0x3a   : > { %5046 = vmatmul.msk.f32.gmra.mxu1 %vm808_vm0, %v788_v16 }
  0x41   : > { %5031 = vmatmul.msk.f32.gmra.mxu0 %vm808_vm0, %v773_v19 }
  0x42   : > { %5047 = vmatmul.msk.f32.gmra.mxu1 %vm808_vm0, %v789_v18 }
  0x49   : > { %5032 = vmatmul.msk.f32.gmra.mxu0 %vm808_vm0, %v774_v21 }
  0x4a   : > { %5048 = vmatmul.msk.f32.gmra.mxu1 %vm808_vm0, %v790_v20 }
  0x51   : > { %5033 = vmatmul.msk.f32.gmra.mxu0 %vm808_vm0, %v775_v23 }
  0x52   : > { %5049 = vmatmul.msk.f32.gmra.mxu1 %vm808_vm0, %v791_v22 }
  0x59   : > { %5034 = vmatmul.msk.f32.gmra.mxu0 %vm808_vm0, %v776_v25 }
  0x5a   : > { %5050 = vmatmul.msk.f32.gmra.mxu1 %vm808_vm0, %v792_v24 }
  0x61   : > { %5035 = vmatmul.msk.f32.gmra.mxu0 %vm808_vm0, %v777_v27 }
  0x62   : > { %5051 = vmatmul.msk.f32.gmra.mxu1 %vm808_vm0, %v793_v26 }
  0x69   : > { %5036 = vmatmul.msk.f32.gmra.mxu0 %vm808_vm0, %v778_v31 }
  0x6a   : > { %5052 = vmatmul.msk.f32.gmra.mxu1 %vm808_vm0, %v794_v28 }
  0x71   : > { %5037 = vmatmul.msk.f32.gmra.mxu0 %vm808_vm0, %v779_v33 }
  0x72   : > { %5053 = vmatmul.msk.f32.gmra.mxu1 %vm808_vm0, %v795_v29 }
  0x79   : > { %5038 = vmatmul.msk.f32.gmra.mxu0 %vm808_vm0, %v780_v41 }
  0x7a   : > { %5054 = vmatmul.msk.f32.gmra.mxu1 %vm808_vm0, %v796_v30 }
  0x81   : > { %5039 = vmatmul.msk.f32.gmra.mxu0 %vm808_vm0, %v781_v45 }
  0x82   : > { %5055 = vmatmul.msk.f32.gmra.mxu1 %vm808_vm0, %v797_v32 }
  0x89   : > { %5040 = vmatmul.msk.f32.gmra.mxu0 %vm808_vm0, %v782_v57 }
  0x8a   : > { %5056 = vmatmul.msk.f32.gmra.mxu1 %vm808_vm0, %v798_v34 }
  0x91   : > { %5041 = vmatmul.msk.f32.gmra.mxu0 %vm808_vm0, %v783_v60 }
  0x92   : > { %5057 = vmatmul.msk.f32.gmra.mxu1 %vm808_vm0, %v799_v56 }
  0x96   : > { %v874_v37 = vpop.f32.mrf.mxu0 }
  0x97   : > { %v995_v38 = vpop.f32.mrf.mxu1  ;;  %v6063_v39 = vadd.f32 %v6053_v35, %v874_v37 }
  0x98   : > { %v6066_v40 = vadd.f32 %v6060_v36, %v995_v38 }
  0x99   : > { %1319 = vrot.lane.b32.xlu2 %v6063_v39, %s5855_s0 }
  0x9a   : > { %1625 = vrot.lane.b32.xlu0 %v6066_v40, %s5854_s29  ;;  %1335 = vrot.lane.b32.xlu1 %v6066_v40, %s5855_s0 }
  0x9e   : > { %v877_v43 = vpop.f32.mrf.mxu0 }
  0x9f   : > { %v998_v42 = vpop.f32.mrf.mxu1  ;;  %v6101_v50 = vadd.f32 %v6053_v35, %v877_v43 }
  0xa0   : > { %v6077_v44 = vadd.f32 %v6060_v36, %v998_v42 }
  0xa1   : > { %1915 = vrot.lane.b32.xlu2 %v6066_v40, %s5856_s17 }
  0xa2   : > { %1609 = vrot.lane.b32.xlu0 %v6063_v39, %s5854_s29  ;;  %v6087_v46 = vpack.i.bf16 %v6066_v40, %v6077_v44 }
  0xa4   : > { %5340 = vrot.lane.b32.xlu1 %v6087_v46, %s5857_s18 }
  0xa6   : > { %v880_v48 = vpop.f32.mrf.mxu0 }
  0xa7   : > { %v1001_v47 = vpop.f32.mrf.mxu1  ;;  %v6092_v49 = vadd.f32 %v6053_v35, %v880_v48 }
  0xa8   : > { %v1002_v51 = vadd.f32 %v6060_v36, %v1001_v47 }
  0xa9   : > { %1899 = vrot.lane.b32.xlu2 %v6063_v39, %s5856_s17 }
  0xaa   : > { %1337 = vrot.lane.b32.xlu0 %v6077_v44, %s5855_s0 }
  0xac   : > { %1323 = vrot.lane.b32.xlu1 %v6092_v49, %s5855_s0 }
  0xae   : > { %v883_v59 = vpop.f32.mrf.mxu0 }
  0xaf   : > { %v1004_v52 = vpop.f32.mrf.mxu1  ;;  %v884_v62 = vadd.f32 %v6053_v35, %v883_v59 }
  0xb0   : > { %v6105_v53 = vadd.f32 %v6060_v36, %v1004_v52 }
  0xb1   : > { %1917 = vrot.lane.b32.xlu2 %v6077_v44, %s5856_s17 }
  0xb2   : > { %1321 = vrot.lane.b32.xlu0 %v6101_v50, %s5855_s0  ;;  %v6112_v54 = vpack.i.bf16 %v1002_v51, %v6105_v53 }
  0xb4   : > { %5350 = vrot.lane.b32.xlu1 %v6112_v54, %s5857_s18 }
  0xb6   : > { %v886_v63 = vpop.f32.mrf.mxu0 }
  0xb7   : > { %v1007_v55 = vpop.f32.mrf.mxu1  ;;  %v6140_v0 = vadd.f32 %v6053_v35, %v886_v63 }
  0xb8   : > { %v1008_v2 = vadd.f32 %v6060_v36, %v1007_v55 }
  0xb9   : > { %1627 = vrot.lane.b32.xlu2 %v6077_v44, %s5854_s29 }
  0xba   : > { %5345 = vrot.lane.b32.xlu0 %v6087_v46, %s5858_s20 }
  0xbc   : > { %5355 = vrot.lane.b32.xlu1 %v6112_v54, %s5858_s20 }
  0xbe   : > { %v889_v7 = vpop.f32.mrf.mxu0 }
  0xbf   : > { %v1010_v58 = vpop.f32.mrf.mxu1  ;;  %v6181_v9 = vadd.f32 %v6053_v35, %v889_v7 }
  0xc0   : > { %v6147_v4 = vadd.f32 %v6060_v36, %v1010_v58 }
  0xc1   : > { %1901 = vrot.lane.b32.xlu2 %v6101_v50, %s5856_s17 }
  0xc2   : > { %1611 = vrot.lane.b32.xlu0 %v6101_v50, %s5854_s29  ;;  %v6161_v6 = vpack.i.bf16 %v1008_v2, %v6147_v4 }
  0xc4   : > { %1631 = vrot.lane.b32.xlu1 %v6105_v53, %s5854_s29 }
  0xc6   : > { %v892_v8 = vpop.f32.mrf.mxu0 }
  0xc7   : > { %v1013_v61 = vpop.f32.mrf.mxu1  ;;  %v893_v20 = vadd.f32 %v6053_v35, %v892_v8 }
  0xc8   : > { %v6150_v5 = vadd.f32 %v6060_v36, %v1013_v61 }
  0xc9   : > { %1339 = vrot.lane.b32.xlu2 %v1002_v51, %s5855_s0 }
  0xca   : > { %1903 = vrot.lane.b32.xlu0 %v6092_v49, %s5856_s17 }
  0xcc   : > { %1905 = vrot.lane.b32.xlu1 %v884_v62, %s5856_s17 }
  0xce   : > { %v895_v11 = vpop.f32.mrf.mxu0 }
  0xcf   : > { %v1016_v1 = vpop.f32.mrf.mxu1  ;;  %v896_v12 = vadd.f32 %v6053_v35, %v895_v11 }
  0xd0   : > { %v6144_v3 = vadd.f32 %v6060_v36, %v1016_v1 }
  0xd1   : > { %1919 = vrot.lane.b32.xlu2 %v1002_v51, %s5856_s17 }
  0xd2   : > { %5058 = vmatpush.xpose.msk.msra.mxu2 %vm1043_vm1, %v6144_v3  ;;  %1327 = vrot.lane.b32.xlu0 %v6140_v0, %s5855_s0  ;;  %v6220_v18 = vpack.i.bf16 %v6150_v5, %v6144_v3 }
  0xd4   : > { %1343 = vrot.lane.b32.xlu1 %v1008_v2, %s5855_s0 }
  0xd6   : > { %5059 = vmatpush.xpose.msk.msra.mxu2 %vm1043_vm1, %v6150_v5  ;;  %v898_v17 = vpop.f32.mrf.mxu0 }
  0xd7   : > { %v6183_v10 = vpop.f32.mrf.mxu1  ;;  %v6260_v31 = vadd.f32 %v6053_v35, %v898_v17 }
  0xd8   : > { %v6377_v8 = vadd.f32 %v6060_v36, %v6183_v10 }
  0xd9   : > { %1629 = vrot.lane.b32.xlu2 %v1002_v51, %s5854_s29 }
  0xda   : > { %5060 = vmatpush.xpose.msk.msra.mxu2 %vm1043_vm1, %v6147_v4  ;;  %5360 = vrot.lane.b32.xlu0 %v6161_v6, %s5857_s18 }
  0xdc   : > { %1907 = vrot.lane.b32.xlu1 %v6140_v0, %s5856_s17 }
  0xde   : > { %5061 = vmatpush.xpose.msk.msra.mxu2 %vm1043_vm1, %v1008_v2  ;;  %v901_v22 = vpop.f32.mrf.mxu0 }
  0xdf   : > { %v6200_v13 = vpop.f32.mrf.mxu1  ;;  %v6291_v43 = vadd.f32 %v6053_v35, %v901_v22 }
  0xe1   : > { %1613 = vrot.lane.b32.xlu2 %v6092_v49, %s5854_s29 }
  0xe2   : > { %5062 = vmatpush.xpose.msk.msra.mxu2 %vm1043_vm1, %v6105_v53  ;;  %1347 = vrot.lane.b32.xlu0 %v6150_v5, %s5855_s0 }
  0xe4   : > { %1345 = vrot.lane.b32.xlu1 %v6147_v4, %s5855_s0 }
  0xe6   : > { %5063 = vmatpush.xpose.msk.msra.mxu2 %vm1043_vm1, %v1002_v51  ;;  %v6249_v27 = vpop.f32.mrf.mxu0 }
  0xe7   : > { %v6216_v16 = vpop.f32.mrf.mxu1  ;;  %v6406_v22 = vadd.f32 %v6053_v35, %v6249_v27 }
  0xe8   : > { %v6327_v56 = vadd.f32 %v6060_v36, %v6216_v16 }
  0xe9   : > { %1341 = vrot.lane.b32.xlu2 %v6105_v53, %s5855_s0 }
  0xea   : > { %5064 = vmatpush.xpose.msk.msra.mxu2 %vm1043_vm1, %v6077_v44  ;;  %1349 = vrot.lane.b32.xlu0 %v6144_v3, %s5855_s0 }
  0xec   : > { %1329 = vrot.lane.b32.xlu1 %v6181_v9, %s5855_s0 }
  0xee   : > { %5065 = vmatpush.xpose.msk.msra.mxu2 %vm1043_vm1, %v6066_v40  ;;  %v907_v37 = vpop.f32.mrf.mxu0 }
  0xef   : > { %v6232_v21 = vpop.f32.mrf.mxu1 }
  0xf0   : > { %v6373_v7 = vadd.f32 %v6060_v36, %v6232_v21 }
  0xf1   : > { %5066 = vmatmul.msk.f32.vlgmr.msra.gmra.mxu2 %vm1043_vm1, %v6063_v39  ;;  %1325 = vrot.lane.b32.xlu2 %v884_v62, %s5855_s0  ;;  %v6278_v39 = vadd.f32 %v6053_v35, %v907_v37 }
  0xf2   : > { %1333 = vrot.lane.b32.xlu0 %v896_v12, %s5855_s0 }
  0xf3   : > { %v6204_v14 = vpop.permute.xlu2 %1319 }
  0xf4   : > { %1925 = vrot.lane.b32.xlu1 %v6147_v4, %s5856_s17 }
  0xf7   : > { %v1031_v26 = vpop.f32.mrf.mxu1 }
  0xf8   : > { %v6357_v1 = vadd.f32 %v6060_v36, %v1031_v26 }
  0xf9   : > { %5067 = vmatmul.msk.f32.gmra.mxu2 %vm1043_vm1, %v6101_v50  ;;  %1921 = vrot.lane.b32.xlu2 %v6105_v53, %s5856_s17  ;;  %v910_v50 = vpop.f32.mrf.mxu0 }
  0xfa   : > { %1929 = vrot.lane.b32.xlu0 %v6144_v3, %s5856_s17  ;;  %v6323_v55 = vadd.f32 %v6053_v35, %v910_v50 }
  0xfb   : > { %v6214_v15 = vpop.permute.xlu2 %1915 }
  0xfc   : > { %1927 = vrot.lane.b32.xlu1 %v6150_v5, %s5856_s17 }
  0xff   : > { %v6267_v32 = vpop.f32.mrf.mxu1 }
 0x100   : > { %v6420_v27 = vadd.f32 %v6060_v36, %v6267_v32 }
 0x101   : > { %5068 = vmatmul.msk.f32.gmra.mxu2 %vm1043_vm1, %v6092_v49  ;;  %1615 = vrot.lane.b32.xlu2 %v884_v62, %s5854_s29  ;;  %v913_v57 = vpop.f32.mrf.mxu0 }
 0x102   : > { %1617 = vrot.lane.b32.xlu0 %v6140_v0, %s5854_s29  ;;  %v6342_v61 = vadd.f32 %v6053_v35, %v913_v57 }
 0x103   : > { %v6229_v19 = vpop.permute.xlu2 %1899 }
 0x104   : > { %5370 = vrot.lane.b32.xlu1 %v6220_v18, %s5857_s18 }
 0x107   : > { %v1037_v42 = vpop.f32.mrf.mxu1 }
 0x108   : > { %v6296_v45 = vadd.f32 %v6060_v36, %v1037_v42 }
 0x109   : > { %5069 = vmatmul.msk.f32.gmra.mxu2 %vm1043_vm1, %v884_v62  ;;  %1923 = vrot.lane.b32.xlu2 %v1008_v2, %s5856_s17  ;;  %v6346_v62 = vadd.f32 %v6060_v36, %v6200_v13  ;;  %v6390_v17 = vpop.f32.mrf.mxu0 }
 0x10a   : > { %1911 = vrot.lane.b32.xlu0 %v893_v20, %s5856_s17 }
 0x10b   : > { %v6241_v24 = vpop.permute.xlu2 %1917 }
 0x10c   : > { %v6237_v23 = vpop.permute.xlu0 %1625  ;;  %1619 = vrot.lane.b32.xlu1 %v6181_v9, %s5854_s29  ;;  %v6243_v25 = vpop.permute.xlu1 %1335 }
 0x111   : > { %5070 = vmatmul.msk.f32.gmra.mxu2 %vm1043_vm1, %v6140_v0  ;;  %1633 = vrot.lane.b32.xlu2 %v1008_v2, %s5854_s29  ;;  %v919_v26 = vpop.f32.mrf.mxu0 }
 0x112   : > { %1621 = vrot.lane.b32.xlu0 %v893_v20, %s5854_s29  ;;  %v6416_v50 = vadd.f32 %v6053_v35, %v919_v26 }
 0x113   : > { %v6255_v29 = vpop.permute.xlu2 %1627 }
 0x114   : > { %1639 = vrot.lane.b32.xlu1 %v6144_v3, %s5854_s29  ;;  %v6253_v28 = vpop.permute.xlu0 %1609 }
 0x116   : > { %v6257_v30 = vpop.permute.xlu1 %5340 }
 0x119   : > { %5071 = vmatmul.msk.f32.gmra.mxu2 %vm1043_vm1, %v6181_v9  ;;  %5365 = vrot.lane.b32.xlu2 %v6161_v6, %s5858_s20 }
 0x11a   : > { %1913 = vrot.lane.b32.xlu0 %v896_v12, %s5856_s17 }
 0x11b   : > { %v6273_v34 = vpop.permute.xlu2 %1901 }
 0x11c   : > { %2585 = vrot.lane.b32.xlu1 %v6260_v31, %s5855_s0  ;;  %v6271_v33 = vpop.permute.xlu0 %1337 }
 0x11e   : > { %v6275_v38 = vpop.permute.xlu1 %1323 }
 0x121   : > { %5072 = vmatmul.msk.f32.gmra.mxu2 %vm1043_vm1, %v893_v20  ;;  %1635 = vrot.lane.b32.xlu2 %v6147_v4, %s5854_s29 }
 0x122   : > { %1623 = vrot.lane.b32.xlu0 %v896_v12, %s5854_s29 }
 0x123   : > { %v6288_v41 = vpop.permute.xlu2 %1339 }
 0x124   : > { %2591 = vrot.lane.b32.xlu1 %v6278_v39, %s5855_s0  ;;  %v6286_v40 = vpop.permute.xlu0 %1321 }
 0x126   : > { %v6293_v44 = vpop.permute.xlu1 %5350 }
 0x129   : > { %5073 = vmatmul.msk.f32.gmra.mxu2 %vm1043_vm1, %v896_v12  ;;  %1331 = vrot.lane.b32.xlu2 %v893_v20, %s5855_s0  ;;  %v1040_v12 = vpop.f32.mrf.mxu1 }
 0x12a   : > { %2587 = vrot.lane.b32.xlu0 %v6291_v43, %s5855_s0  ;;  %v6388_v16 = vadd.f32 %v6060_v36, %v1040_v12 }
 0x12b   : > { %v6306_v48 = vpop.permute.xlu2 %1919 }
 0x12c   : > { %3193 = vrot.lane.b32.xlu1 %v6296_v45, %s5856_s17  ;;  %v6304_v47 = vpop.permute.xlu0 %5345 }
 0x12e   : > { %v6308_v49 = vpop.permute.xlu1 %5355 }
 0x131   : > { %1637 = vrot.lane.b32.xlu2 %v6150_v5, %s5854_s29 }
 0x132   : > { %2613 = vrot.lane.b32.xlu0 %v6296_v45, %s5855_s0 }
 0x133   : > { %v6318_v52 = vpop.permute.xlu2 %1629 }
 0x134   : > { %2903 = vrot.lane.b32.xlu1 %v6296_v45, %s5854_s29  ;;  %v6316_v51 = vpop.permute.xlu0 %1611 }
 0x136   : > { %v6320_v53 = vpop.permute.xlu1 %1631 }
 0x139   : > { %5375 = vrot.lane.b32.xlu2 %v6220_v18, %s5858_s20 }
 0x13a   : > { %2593 = vrot.lane.b32.xlu0 %v6323_v55, %s5855_s0 }
 0x13b   : > { %v6337_v59 = vpop.permute.xlu2 %1613 }
 0x13c   : > { %3185 = vrot.lane.b32.xlu1 %v6327_v56, %s5856_s17  ;;  %v6335_v58 = vpop.permute.xlu0 %1903 }
 0x13e   : > { %v6339_v60 = vpop.permute.xlu1 %1905 }
 0x141   : > { %1909 = vrot.lane.b32.xlu2 %v6181_v9, %s5856_s17 }
 0x142   : > { %2595 = vrot.lane.b32.xlu0 %v6342_v61, %s5855_s0 }
 0x143   : > { %v1342_v0 = vpop.permute.xlu2 %1341 }
 0x144   : > { %3183 = vrot.lane.b32.xlu1 %v6346_v62, %s5856_s17  ;;  %v6354_v63 = vpop.permute.xlu0 %1327 }
 0x146   : > { %v1344_v2 = vpop.permute.xlu1 %1343 }
 0x149   : > { %2603 = vrot.lane.b32.xlu2 %v6346_v62, %s5855_s0 }
 0x14a   : > { %3189 = vrot.lane.b32.xlu0 %v6357_v1, %s5856_s17 }
 0x14b   : > { %v6367_v4 = vpop.permute.xlu2 %1325 }
 0x14c   : > { %2895 = vrot.lane.b32.xlu1 %v6327_v56, %s5854_s29  ;;  %v6365_v3 = vpop.permute.xlu0 %5360 }
 0x14e   : > { %v6369_v5 = vpop.permute.xlu1 %1907 }
 0x151   : > { %2605 = vrot.lane.b32.xlu2 %v6327_v56, %s5855_s0 }
 0x152   : > { %3187 = vrot.lane.b32.xlu0 %v6373_v7, %s5856_s17 }
 0x153   : > { %v6385_v11 = vpop.permute.xlu2 %1921 }
 0x154   : > { %2891 = vrot.lane.b32.xlu1 %v6377_v8, %s5854_s29  ;;  %v1348_v9 = vpop.permute.xlu0 %1347 }
 0x156   : > { %v1346_v13 = vpop.permute.xlu1 %1345 }
 0x159   : > { %2607 = vrot.lane.b32.xlu2 %v6373_v7, %s5855_s0 }
 0x15a   : > { %2897 = vrot.lane.b32.xlu0 %v6373_v7, %s5854_s29 }
 0x15b   : > { %v6398_v20 = vpop.permute.xlu2 %1615 }
 0x15c   : > { %2905 = vrot.lane.b32.xlu1 %v6388_v16, %s5854_s29  ;;  %v1350_v10 = vpop.permute.xlu0 %1349 }
 0x15d   : > { %5082 = vmatpush.xpose.msk.msra.mxu3 %vm1043_vm1, %v1350_v10 }
 0x15e   : > { %v6401_v21 = vpop.permute.xlu1 %1329 }
 0x161   : > { %5083 = vmatpush.xpose.msk.msra.mxu3 %vm1043_vm1, %v1348_v9  ;;  %2609 = vrot.lane.b32.xlu2 %v6357_v1, %s5855_s0 }
 0x162   : > { %3165 = vrot.lane.b32.xlu0 %v6260_v31, %s5856_s17 }
 0x163   : > { %v1924_v37 = vpop.permute.xlu2 %1923 }
 0x164   : > { %3169 = vrot.lane.b32.xlu1 %v6406_v22, %s5856_s17  ;;  %v6432_v12 = vpop.permute.xlu0 %1333 }
 0x165   : > { %5084 = vmatpush.xpose.msk.msra.mxu3 %vm1043_vm1, %v1346_v13 }
 0x166   : > { %v1926_v42 = vpop.permute.xlu1 %1925 }
 0x169   : > { %5085 = vmatpush.xpose.msk.msra.mxu3 %vm1043_vm1, %v1344_v2  ;;  %2611 = vrot.lane.b32.xlu2 %v6420_v27, %s5855_s0 }
 0x16a   : > { %2599 = vrot.lane.b32.xlu0 %v6416_v50, %s5855_s0 }
 0x16b   : > { %v6429_v57 = vpop.permute.xlu2 %1633 }
 0x16c   : > { %2879 = vrot.lane.b32.xlu1 %v6406_v22, %s5854_s29  ;;  %v1930_v13 = vpop.permute.xlu0 %1929 }
 0x16d   : > { %5086 = vmatpush.xpose.msk.msra.mxu3 %vm1043_vm1, %v1342_v0 }
 0x16e   : > { %v1928_v9 = vpop.permute.xlu1 %1927 }
 0x171   : > { %5087 = vmatpush.xpose.msk.msra.mxu3 %vm1043_vm1, %v6288_v41  ;;  %2601 = vrot.lane.b32.xlu2 %v6377_v8, %s5855_s0  ;;  %v5362_v41 = vunpack.i.l.bf16 %v6365_v3 }
 0x172   : > { %3167 = vrot.lane.b32.xlu0 %v6291_v43, %s5856_s17 }
 0x173   : > { %v6440_v36 = vpop.permute.xlu2 %5365 }
 0x174   : > { %v6450_v10 = vpop.f32.mrf.mxu2 }
 0x175   : > { %5088 = vmatpush.xpose.msk.msra.mxu3 %vm1043_vm1, %v6271_v33 }
 0x176   : > { %v5371_v32 = vpop.permute.xlu1 %5370 }
 0x177   : > { %v5372_v2 = vunpack.i.l.bf16 %v5371_v32  ;;  %v5373_v0 = vunpack.i.h.bf16 %v5371_v32  ;;  %v5352_v32 = vunpack.i.l.bf16 %v6293_v44 }
 0x179   : > { %1270 = vmatpush.msrb.mxu2 %v5372_v2  ;;  %5089 = vmatpush.xpose.msk.msra.mxu3 %vm1043_vm1, %v6243_v25  ;;  %v5363_v25 = vunpack.i.h.bf16 %v6365_v3  ;;  %v5353_v2 = vunpack.i.h.bf16 %v6293_v44  ;;  %v5343_v44 = vunpack.i.h.bf16 %v6257_v30 }
 0x17a   : > { %2877 = vrot.lane.b32.xlu0 %v6291_v43, %s5854_s29  ;;  %2615 = vrot.lane.b32.xlu2 %v6388_v16, %s5855_s0 }
 0x17b   : > { %1271 = vmatpush.msrb.mxu2 %v5373_v0  ;;  %v6456_v33 = vpop.permute.xlu2 %1635 }
 0x17c   : > { %5090 = vmatmul.msk.f32.vlgmr.msra.gmra.mxu3 %vm1043_vm1, %v6204_v14  ;;  %v5342_v14 = vunpack.i.l.bf16 %v6257_v30  ;;  %v1112_v3 = vpop.f32.mrf.mxu2 }
 0x17d   : > { %5130 = vmatpush.xpose.msk.msrb.mxu3 %vm1043_vm1, %v1930_v13  ;;  %1272 = vmatpush.msrb.mxu2 %v5362_v41  ;;  %v5367_v41 = vunpack.i.l.bf16 %v6440_v36 }
 0x17e   : > { %v6459_v26 = vpop.permute.xlu1 %1619 }
 0x17f   : > { %1273 = vmatpush.msrb.mxu2 %v5363_v25  ;;  %v1618_v25 = vpop.permute.xlu0 %1617 }
 0x181   : > { %5131 = vmatpush.xpose.msk.msrb.mxu3 %vm1043_vm1, %v1928_v9  ;;  %1274 = vmatpush.msrb.mxu2 %v5352_v32 }
 0x182   : > { %3173 = vrot.lane.b32.xlu0 %v6323_v55, %s5856_s17  ;;  %2589 = vrot.lane.b32.xlu2 %v6406_v22, %s5855_s0 }
 0x183   : > { %1275 = vmatpush.msrb.mxu2 %v5353_v2  ;;  %v6472_v9 = vpop.permute.xlu2 %1331  ;;  %v5358_v2 = vunpack.i.h.bf16 %v6308_v49 }
 0x184   : > { %5091 = vmatmul.msk.f32.gmra.mxu3 %vm1043_vm1, %v6286_v40 }
 0x185   : > { %5132 = vmatpush.xpose.msk.msrb.mxu3 %vm1043_vm1, %v1926_v42  ;;  %1276 = vmatpush.msrb.mxu2 %v5342_v14  ;;  %v5347_v14 = vunpack.i.l.bf16 %v6304_v47 }
 0x186   : > { %v6475_v0 = vpop.permute.xlu1 %1639 }
 0x187   : > { %1277 = vmatpush.msrb.mxu2 %v5343_v44  ;;  %5106 = vmatpush.xpose.msk.msrb.mxu0 %vm1043_vm1, %v6475_v0 }
 0x189   : > { %5133 = vmatpush.xpose.msk.msrb.mxu3 %vm1043_vm1, %v1924_v37  ;;  %v1115_v37 = vpop.f32.mrf.mxu2 }
 0x18a   : > { %3195 = vrot.lane.b32.xlu2 %v6388_v16, %s5856_s17  ;;  %v6494_v42 = vmul.f32 0.35355338, %v1115_v37  ;;  %v6546_v37 = vmul.f32 0.35355338, %v1112_v3 }
 0x18b   : > { %v6486_v40 = vpop.permute.xlu2 %1637 }
 0x18c   : > { %5092 = vmatmul.msk.f32.gmra.mxu3 %vm1043_vm1, %v6275_v38  ;;  %5107 = vmatpush.xpose.msk.msrb.mxu0 %vm1043_vm1, %v6486_v40 }
 0x18d   : > { %5134 = vmatpush.xpose.msk.msrb.mxu3 %vm1043_vm1, %v6385_v11 }
 0x18e   : > { %v6490_v30 = vpop.permute.xlu1 %2585 }
 0x190   : > { %5108 = vmatpush.xpose.msk.msrb.mxu0 %vm1043_vm1, %v6456_v33 }
 0x191   : > { %5135 = vmatpush.xpose.msk.msrb.mxu3 %vm1043_vm1, %v6306_v48 }
 0x192   : > { %3191 = vrot.lane.b32.xlu2 %v6420_v27, %s5856_s17 }
 0x193   : > { %v5376_v38 = vpop.permute.xlu2 %5375 }
 0x194   : > { %5093 = vmatmul.msk.f32.gmra.mxu3 %vm1043_vm1, %v6367_v4  ;;  %v5377_v11 = vunpack.i.l.bf16 %v5376_v38  ;;  %5109 = vmatpush.xpose.msk.msrb.mxu0 %vm1043_vm1, %v6429_v57  ;;  %v5378_v13 = vunpack.i.h.bf16 %v5376_v38  ;;  %v6514_v4 = vadd.f32 %v6053_v35, %v6390_v17  ;;  %v5357_v35 = vunpack.i.l.bf16 %v6308_v49 }
 0x195   : > { %5136 = vmatpush.xpose.msk.msrb.mxu3 %vm1043_vm1, %v6241_v24  ;;  %v1148_v24 = vsel %vm1141_vm2, %v6494_v42, -inf }
 0x196   : > { %v6506_v48 = vpop.permute.xlu1 %2591  ;;  %1149 = vmax.xlane.f32.xlu1 %v1148_v24  ;;  %1560 = vmatpush.msra.mxu2 %v5377_v11  ;;  %v6600_v24 = vpop.f32.mrf.mxu2 }
 0x198   : > { %1561 = vmatpush.msra.mxu2 %v5378_v13  ;;  %5110 = vmatpush.xpose.msk.msrb.mxu0 %vm1043_vm1, %v6320_v53 }
 0x199   : > { %5137 = vmatpush.xpose.msk.msrb.mxu3 %vm1043_vm1, %v6214_v15  ;;  %v5368_v15 = vunpack.i.h.bf16 %v6440_v36  ;;  %v6540_v36 = vpop.permute.xlu0 %1911 }
 0x19a   : > { %2597 = vrot.lane.b32.xlu2 %v6514_v4, %s5855_s0  ;;  %1562 = vmatpush.msra.mxu2 %v5367_v41 }
 0x19b   : > { %v6524_v32 = vpop.permute.xlu2 %1909 }
 0x19c   : > { %5094 = vmatmul.msk.f32.gmra.mxu3 %vm1043_vm1, %v6354_v63  ;;  %1563 = vmatpush.msra.mxu2 %v5368_v15  ;;  %v5348_v63 = vunpack.i.h.bf16 %v6304_v47  ;;  %v1145_v47 = vsel %vm1141_vm2, %v6546_v37, -inf }
 0x19d   : > { %5111 = vmatpush.xpose.msk.msrb.mxu0 %vm1043_vm1, %v6318_v52 }
 0x19e   : > { %v6529_v17 = vpop.permute.xlu1 %3193  ;;  %1564 = vmatpush.msra.mxu2 %v5357_v35  ;;  %v6609_v15 = vpop.f32.mrf.mxu2 }
 0x1a0   : > { %1565 = vmatpush.msra.mxu2 %v5358_v2  ;;  %v6627_v2 = vmul.f32 0.35355338, %v6450_v10 }
 0x1a1   : > { %5112 = vmatpush.xpose.msk.msrb.mxu0 %vm1043_vm1, %v6255_v29  ;;  %v6562_v38 = vpop.permute.xlu0 %1621 }
 0x1a2   : > { %2901 = vrot.lane.b32.xlu2 %v6420_v27, %s5854_s29  ;;  %1566 = vmatpush.msra.mxu2 %v5347_v14 }
 0x1a3   : > { %v6542_v44 = vpop.permute.xlu2 %2603 }
 0x1a4   : > { %5095 = vmatmul.msk.f32.gmra.mxu3 %vm1043_vm1, %v6401_v21  ;;  %1567 = vmatpush.msra.mxu2 %v5348_v63  ;;  %v1142_v63 = vsel %vm1141_vm2, %v6627_v2, -inf }
 0x1a5   : > { %5113 = vmatpush.xpose.msk.msrb.mxu0 %vm1043_vm1, %v6237_v23 }
 0x1a6   : > { %v2904_v49 = vpop.permute.xlu1 %2903 }
 0x1a8   : > { %5114 = vmatmul.msk.f32.vlgmr.msrb.gmra.mxu0 %vm1043_vm1, %v6253_v28 }
 0x1a9   : > { %5154 = vmatpush.xpose.msk.msra.mxu0 %vm1043_vm1, %v6388_v16  ;;  %v1914_v11 = vpop.permute.xlu0 %1913 }
 0x1aa   : > { %2899 = vrot.lane.b32.xlu2 %v6357_v1, %s5854_s29 }
 0x1ab   : > { %v2606_v21 = vpop.permute.xlu2 %2605 }
 0x1ac   : > { %5096 = vmatmul.msk.f32.gmra.mxu3 %vm1043_vm1, %v6472_v9  ;;  %1146 = vmax.xlane.f32.xlu0 %v1145_v47 }
 0x1ad   : > { %5155 = vmatpush.xpose.msk.msra.mxu0 %vm1043_vm1, %v6296_v45 }
 0x1ae   : > { %v6560_v3 = vpop.permute.xlu1 %3185 }
 0x1af   : > { %3175 = vrot.lane.b32.xlu1 %v6342_v61, %s5856_s17 }
 0x1b0   : > { %5115 = vmatmul.msk.f32.gmra.mxu0 %vm1043_vm1, %v6316_v51 }
 0x1b1   : > { %5156 = vmatpush.xpose.msk.msra.mxu0 %vm1043_vm1, %v6420_v27 }
 0x1b2   : > { %3181 = vrot.lane.b32.xlu2 %v6377_v8, %s5856_s17 }
 0x1b3   : > { %v2608_v28 = vpop.permute.xlu2 %2607 }
 0x1b4   : > { %5097 = vmatmul.msk.f32.gmra.mxu3 %vm1043_vm1, %v6432_v12 }
 0x1b5   : > { %5157 = vmatpush.xpose.msk.msra.mxu0 %vm1043_vm1, %v6357_v1 }
 0x1b6   : > { %v6576_v9 = vpop.permute.xlu1 %3183 }
 0x1b8   : > { %5116 = vmatmul.msk.f32.gmra.mxu0 %vm1043_vm1, %v6337_v59  ;;  %v6596_v59 = vpop.permute.xlu0 %1623 }
 0x1b9   : > { %5158 = vmatpush.xpose.msk.msra.mxu0 %vm1043_vm1, %v6373_v7 }
 0x1ba   : > { %2893 = vrot.lane.b32.xlu2 %v6346_v62, %s5854_s29 }
 0x1bb   : > { %v2610_v51 = vpop.permute.xlu2 %2609 }
 0x1bc   : > { %5138 = vmatmul.msk.f32.vlgmr.msrb.gmra.mxu3 %vm1043_vm1, %v6229_v19 }
 0x1bd   : > { %5159 = vmatpush.xpose.msk.msra.mxu0 %vm1043_vm1, %v6327_v56 }
 0x1be   : > { %v6588_v12 = vpop.permute.xlu1 %2895 }
 0x1c0   : > { %5380 = vrot.lane.b32.xlu0 %v6220_v18, %s5859_s26  ;;  %5117 = vmatmul.msk.f32.gmra.mxu0 %vm1043_vm1, %v6398_v20  ;;  %v2588_v41 = vpop.permute.xlu0 %2587 }
 0x1c1   : > { %5160 = vmatpush.xpose.msk.msra.mxu0 %vm1043_vm1, %v6346_v62 }
 0x1c3   : > { %v2612_v19 = vpop.permute.xlu2 %2611 }
 0x1c4   : > { %5139 = vmatmul.msk.f32.gmra.mxu3 %vm1043_vm1, %v6273_v34 }
 0x1c5   : > { %5161 = vmatpush.xpose.msk.msra.mxu0 %vm1043_vm1, %v6377_v8 }
 0x1c6   : > { %v6604_v13 = vpop.permute.xlu1 %2891 }
 0x1c8   : > { %5118 = vmatmul.msk.f32.gmra.mxu0 %vm1043_vm1, %v1618_v25  ;;  %v2614_v25 = vpop.permute.xlu0 %2613 }
 0x1cb   : > { %v2602_v20 = vpop.permute.xlu2 %2601 }
 0x1cc   : > { %5140 = vmatmul.msk.f32.gmra.mxu3 %vm1043_vm1, %v6335_v58  ;;  %v6618_v58 = vpop.f32.mrf.mxu2 }
 0x1ce   : > { %v2906_v35 = vpop.permute.xlu1 %2905 }
 0x1cf   : > { %5202 = vmatpush.xpose.msk.msrb.mxu0 %vm1043_vm1, %v2906_v35 }
 0x1d0   : > { %5119 = vmatmul.msk.f32.gmra.mxu0 %vm1043_vm1, %v6459_v26 }
 0x1d3   : > { %5203 = vmatpush.xpose.msk.msrb.mxu0 %vm1043_vm1, %v2904_v49 }
 0x1d4   : > { %5141 = vmatmul.msk.f32.gmra.mxu3 %vm1043_vm1, %v6339_v60  ;;  %v2616_v34 = vpop.permute.xlu2 %2615  ;;  %v6629_v60 = vpop.permute.xlu0 %2593 }
 0x1d5   : > { %5178 = vmatpush.xpose.msk.msra.mxu3 %vm1043_vm1, %v2616_v34  ;;  %v1127_v14 = vpop.f32.mrf.mxu2 }
 0x1d8   : > { %5162 = vmatmul.msk.f32.vlgmr.msra.gmra.mxu0 %vm1043_vm1, %v6260_v31 }
 0x1d9   : > { %5179 = vmatpush.xpose.msk.msra.mxu3 %vm1043_vm1, %v2614_v25 }
 0x1dc   : > { %5142 = vmatmul.msk.f32.gmra.mxu3 %vm1043_vm1, %v6369_v5  ;;  %v2590_v26 = vpop.permute.xlu2 %2589  ;;  %v6638_v5 = vmul.f32 0.35355338, %v1127_v14  ;;  %v2596_v10 = vpop.permute.xlu0 %2595 }
 0x1dd   : > { %5180 = vmatpush.xpose.msk.msra.mxu3 %vm1043_vm1, %v2612_v19 }
 0x1e0   : > { %5163 = vmatmul.msk.f32.gmra.mxu0 %vm1043_vm1, %v6291_v43  ;;  %v1160_v43 = vsel %vm1141_vm2, %v6638_v5, -inf }
 0x1e1   : > { %5181 = vmatpush.xpose.msk.msra.mxu3 %vm1043_vm1, %v2610_v51 }
 0x1e3   : > { %1143 = vmax.xlane.f32.xlu2 %v1142_v63 }
 0x1e4   : > { %5143 = vmatmul.msk.f32.gmra.mxu3 %vm1043_vm1, %v6524_v32  ;;  %v3196_v49 = vpop.permute.xlu2 %3195 }
 0x1e5   : > { %5182 = vmatpush.xpose.msk.msra.mxu3 %vm1043_vm1, %v2608_v28 }
 0x1e8   : > { %5164 = vmatmul.msk.f32.gmra.mxu0 %vm1043_vm1, %v6406_v22  ;;  %v3190_v22 = vpop.permute.xlu0 %3189 }
 0x1e9   : > { %5183 = vmatpush.xpose.msk.msra.mxu3 %vm1043_vm1, %v2606_v21 }
 0x1ea   : > { %1161 = vmax.xlane.f32.xlu0 %v1160_v43 }
 0x1ec   : > { %5144 = vmatmul.msk.f32.gmra.mxu3 %vm1043_vm1, %v6540_v36  ;;  %v3192_v47 = vpop.permute.xlu2 %3191 }
 0x1ed   : > { %5184 = vmatpush.xpose.msk.msra.mxu3 %vm1043_vm1, %v6542_v44 }
 0x1f0   : > { %5165 = vmatmul.msk.f32.gmra.mxu0 %vm1043_vm1, %v6278_v39  ;;  %v3188_v44 = vpop.permute.xlu0 %3187 }
 0x1f1   : > { %5185 = vmatpush.xpose.msk.msra.mxu3 %vm1043_vm1, %v2602_v20 }
 0x1f4   : > { %5145 = vmatmul.msk.f32.gmra.mxu3 %vm1043_vm1, %v1914_v11  ;;  %v2598_v32 = vpop.permute.xlu2 %2597 }
 0x1f5   : > { %5226 = vmatpush.xpose.msk.msrb.mxu3 %vm1043_vm1, %v3196_v49 }
 0x1f8   : > { %5166 = vmatmul.msk.f32.gmra.mxu0 %vm1043_vm1, %v6323_v55  ;;  %v2898_v28 = vpop.permute.xlu0 %2897 }
 0x1f9   : > { %5227 = vmatpush.xpose.msk.msrb.mxu3 %vm1043_vm1, %v6529_v17 }
 0x1fb   : > { %2875 = vrot.lane.b32.xlu2 %v6260_v31, %s5854_s29 }
 0x1fc   : > { %5186 = vmatmul.msk.f32.vlgmr.msra.gmra.mxu3 %vm1043_vm1, %v6490_v30  ;;  %v2902_v36 = vpop.permute.xlu2 %2901 }
 0x1fd   : > { %5228 = vmatpush.xpose.msk.msrb.mxu3 %vm1043_vm1, %v3192_v47  ;;  %5204 = vmatpush.xpose.msk.msrb.mxu0 %vm1043_vm1, %v2902_v36  ;;  %v3170_v36 = vpop.permute.xlu1 %3169 }
 0x1fe   : > { %5385 = vrot.lane.b32.xlu0 %v6161_v6, %s5859_s26 }
 0x1ff   : > { %v1400_v17 = vpop.f32.mrf.mxu3 }
 0x200   : > { %5167 = vmatmul.msk.f32.gmra.mxu0 %vm1043_vm1, %v6342_v61  ;;  %v3166_v20 = vpop.permute.xlu0 %3165  ;;  %v6711_v34 = vmul.f32 0.35355338, %v1400_v17 }
 0x201   : > { %5229 = vmatpush.xpose.msk.msrb.mxu3 %vm1043_vm1, %v3190_v22 }
 0x202   : > { %v1432_v25 = vsel %vm1141_vm2, %v6711_v34, -inf }
 0x203   : > { %3171 = vrot.lane.b32.xlu2 %v6278_v39, %s5856_s17 }
 0x204   : > { %5187 = vmatmul.msk.f32.gmra.mxu3 %vm1043_vm1, %v2588_v41  ;;  %v2900_v31 = vpop.permute.xlu2 %2899 }
 0x205   : > { %5230 = vmatpush.xpose.msk.msrb.mxu3 %vm1043_vm1, %v3188_v44  ;;  %5205 = vmatpush.xpose.msk.msrb.mxu0 %vm1043_vm1, %v2900_v31 }
 0x206   : > { %3177 = vrot.lane.b32.xlu0 %v6514_v4, %s5856_s17 }
 0x207   : > { %v1403_v30 = vpop.f32.mrf.mxu3 }
 0x208   : > { %v6679_v21 = vmul.f32 0.35355338, %v1403_v30  ;;  %5168 = vmatmul.msk.f32.gmra.mxu0 %vm1043_vm1, %v6514_v4  ;;  %v2880_v30 = vpop.permute.xlu1 %2879 }
 0x209   : > { %5231 = vmatpush.xpose.msk.msrb.mxu3 %vm1043_vm1, %v6560_v3  ;;  %5206 = vmatpush.xpose.msk.msrb.mxu0 %vm1043_vm1, %v2898_v28 }
 0x20a   : > { %v1435_v11 = vsel %vm1141_vm2, %v6679_v21, -inf }
 0x20b   : > { %1436 = vmax.xlane.f32.xlu1 %v1435_v11 }
 0x20c   : > { %5188 = vmatmul.msk.f32.gmra.mxu3 %vm1043_vm1, %v2590_v26  ;;  %v3182_v51 = vpop.permute.xlu2 %3181  ;;  %v6719_v26 = vmul.f32 0.35355338, %v6609_v15  ;;  %v6731_v15 = vmul.f32 0.35355338, %v6618_v58 }
 0x20d   : > { %5232 = vmatpush.xpose.msk.msrb.mxu3 %vm1043_vm1, %v6576_v9  ;;  %5207 = vmatpush.xpose.msk.msrb.mxu0 %vm1043_vm1, %v6588_v12 }
 0x20e   : > { %v1154_v63 = vsel %vm1141_vm2, %v6719_v26, -inf  ;;  %v1157_v43 = vsel %vm1141_vm2, %v6731_v15, -inf }
 0x20f   : > { %v1406_v3 = vpop.f32.mrf.mxu3 }
 0x210   : > { %5169 = vmatmul.msk.f32.gmra.mxu0 %vm1043_vm1, %v6416_v50 }
 0x211   : > { %5233 = vmatpush.xpose.msk.msrb.mxu3 %vm1043_vm1, %v3182_v51 }
 0x214   : > { %5189 = vmatmul.msk.f32.gmra.mxu3 %vm1043_vm1, %v6506_v48  ;;  %v2894_v19 = vpop.permute.xlu2 %2893  ;;  %v6707_v48 = vmul.f32 0.35355338, %v6600_v24  ;;  %v2600_v24 = vpop.permute.xlu0 %2599 }
 0x215   : > { %5208 = vmatpush.xpose.msk.msrb.mxu0 %vm1043_vm1, %v2894_v19 }
 0x217   : > { %v1409_v9 = vpop.f32.mrf.mxu3 }
 0x218   : > { %v6697_v41 = vmul.f32 0.35355338, %v1409_v9 }
 0x219   : > { %5209 = vmatpush.xpose.msk.msrb.mxu0 %vm1043_vm1, %v6604_v13  ;;  %v1151_v13 = vsel %vm1141_vm2, %v6707_v48, -inf }
 0x21a   : > { %v1441_v12 = vsel %vm1141_vm2, %v6697_v41, -inf }
 0x21b   : > { %1442 = vmax.xlane.f32.xlu1 %v1441_v12 }
 0x21c   : > { %5190 = vmatmul.msk.f32.gmra.mxu3 %vm1043_vm1, %v6629_v60  ;;  %v6721_v60 = vmul.f32 0.35355338, %v1406_v3 }
 0x21e   : > { %v1438_v49 = vsel %vm1141_vm2, %v6721_v60, -inf }
 0x21f   : > { %v6709_v35 = vpop.f32.mrf.mxu3 }
 0x224   : > { %5191 = vmatmul.msk.f32.gmra.mxu3 %vm1043_vm1, %v2596_v10  ;;  %v3168_v10 = vpop.permute.xlu0 %3167 }
 0x227   : > { %v1415_v14 = vpop.f32.mrf.mxu3 }
 0x228   : > { %v6747_v11 = vmul.f32 0.35355338, %v1415_v14 }
 0x22c   : > { %5192 = vmatmul.msk.f32.gmra.mxu3 %vm1043_vm1, %v2598_v32  ;;  %1152 = vmax.xlane.f32.xlu2 %v1151_v13  ;;  %v2878_v22 = vpop.permute.xlu0 %2877 }
 0x22f   : > { %v6736_v47 = vpop.f32.mrf.mxu3 }
 0x230   : > { %1433 = vmax.xlane.f32.xlu0 %v1432_v25 }
 0x234   : > { %5193 = vmatmul.msk.f32.gmra.mxu3 %vm1043_vm1, %v2600_v24  ;;  %5410 = vrot.lane.b32.xlu1 %v6112_v54, %s5860_s27  ;;  %v3174_v58 = vpop.permute.xlu0 %3173 }
 0x235   : > { %1155 = vmax.xlane.f32.xlu2 %v1154_v63 }
 0x237   : > { %v1421_v32 = vpop.f32.mrf.mxu3 }
 0x238   : > { %1439 = vmax.xlane.f32.xlu0 %v1438_v49  ;;  %v6755_v9 = vmul.f32 0.35355338, %v1421_v32 }
 0x23c   : > { %5234 = vmatmul.msk.f32.vlgmr.msrb.gmra.mxu3 %vm1043_vm1, %v3166_v20  ;;  %v1147_v28 = vpop.xlane.xlu0 %1146  ;;  %v6759_v20 = vpop.f32.mrf.mxu0 }
 0x23d   : > { %1158 = vmax.xlane.f32.xlu2 %v1157_v43  ;;  %v1167_v3 = vsub.f32 %v6546_v37, %v1147_v28  ;;  %v1453_v37 = vsel %vm1141_vm2, %v6755_v9, -inf }
 0x23f   : > { %v1980_v44 = vpop.f32.mrf.mxu3 }
 0x244   : > { %5235 = vmatmul.msk.f32.gmra.mxu3 %vm1043_vm1, %v3168_v10  ;;  %v6770_v13 = vpop.permute.xlu0 %5380  ;;  %v6784_v63 = vpop.f32.mrf.mxu0 }
 0x247   : > { %v1983_v19 = vpop.f32.mrf.mxu3 }
 0x248   : > { %v6799_v10 = vmul.f32 0.35355338, %v1983_v19 }
 0x24a   : > { %v2015_v32 = vsel %vm1141_vm2, %v6799_v10, -inf }
 0x24c   : > { %5236 = vmatmul.msk.f32.gmra.mxu3 %vm1043_vm1, %v3170_v36  ;;  %5395 = vrot.lane.b32.xlu0 %v6112_v54, %s5859_s26  ;;  %v1447_v54 = vsel %vm1141_vm2, %v6747_v11, -inf  ;;  %v1696_v36 = vpop.f32.mrf.mxu0 }
 0x24f   : > { %v6772_v25 = vpop.f32.mrf.mxu3 }
 0x254   : > { %2885 = vrot.lane.b32.xlu0 %v6342_v61, %s5854_s29  ;;  %v1176_v61 = vmul.f32 1.442695, %v1167_v3 }
 0x255   : > { %2881 = vrot.lane.b32.xlu2 %v6278_v39, %s5854_s29 }
 0x256   : > { %v1144_v17 = vpop.xlane.xlu2 %1143 }
 0x257   : > { %v1166_v31 = vsub.f32 %v6627_v2, %v1144_v17  ;;  %v1150_v2 = vpop.xlane.xlu1 %1149  ;;  %v6794_v43 = vpop.f32.mrf.mxu3  ;;  %v6816_v17 = vmul.f32 0.35355338, %v1696_v36 }
 0x259   : > { %v1174_v51 = vmul.f32 1.442695, %v1166_v31 }
 0x25b   : > { %5508 = vpow2.f32 %v1174_v51 }
 0x25c   : > { %5400 = vrot.lane.b32.xlu0 %v6161_v6, %s5860_s27  ;;  %v1168_v6 = vsub.f32 %v6494_v42, %v1150_v2  ;;  %5510 = vpow2.f32 %v1176_v61  ;;  %v6777_v42 = vmul.f32 0.35355338, %v1980_v44 }
 0x25d   : > { %v6792_v49 = vpop.xlane.xlu0 %1161 }
 0x25e   : > { %1448 = vmax.xlane.f32.xlu1 %v1447_v54  ;;  %v2876_v39 = vpop.permute.xlu2 %2875  ;;  %v1178_v14 = vmul.f32 1.442695, %v1168_v6 }
 0x25f   : > { %5210 = vmatmul.msk.f32.vlgmr.msrb.gmra.mxu0 %vm1043_vm1, %v2876_v39  ;;  %v3176_v44 = vpop.permute.xlu1 %3175  ;;  %v1992_v31 = vpop.f32.mrf.mxu3 }
 0x260   : > { %5512 = vpow2.f32 %v1178_v14 }
 0x261   : > { %v6757_v12 = vpop.eup %5508 }
 0x262   : > { %5074 = vmatmul.msk.f32.vlgmr.msrb.gmra.mxu2 %vm1141_vm2, %v6757_v12 }
 0x263   : > { %5308 = vmatpush.xpose.msk.msrb.mxu2 %vm1043_vm1, %v6475_v0  ;;  %v6780_v0 = vpop.eup %5510 }
 0x264   : > { %5405 = vrot.lane.b32.xlu0 %v6087_v46, %s5859_s26 }
 0x266   : > { %1454 = vmax.xlane.f32.xlu1 %v1453_v37  ;;  %v3172_v24 = vpop.permute.xlu2 %3171 }
 0x267   : > { %5309 = vmatpush.xpose.msk.msrb.mxu2 %vm1043_vm1, %v6486_v40  ;;  %5211 = vmatmul.msk.f32.gmra.mxu0 %vm1043_vm1, %v2878_v22  ;;  %v2012_v40 = vsel %vm1141_vm2, %v6777_v42, -inf  ;;  %v1130_v22 = vpop.f32.mrf.mxu2  ;;  %v1995_v51 = vpop.f32.mrf.mxu3 }
 0x268   : > { %5237 = vmatmul.msk.f32.gmra.mxu3 %vm1043_vm1, %v3172_v24  ;;  %v6832_v3 = vmul.f32 0.35355338, %v1995_v51 }
 0x26a   : > { %5075 = vmatmul.msk.f32.gmra.mxu2 %vm1141_vm2, %v6780_v0  ;;  %v2027_v19 = vsel %vm1141_vm2, %v6832_v3, -inf }
 0x26b   : > { %5310 = vmatpush.xpose.msk.msrb.mxu2 %vm1043_vm1, %v6456_v33  ;;  %v6802_v33 = vpop.eup %5512 }
 0x26c   : > { %3179 = vrot.lane.b32.xlu0 %v6416_v50, %s5856_s17  ;;  %8787 = vst [vmem:[#allocation2_spill] sm:$0xff] %v6802_v33  ;;  %s731_s17 = scalar_lea.vmem %s8757_s6, %s5961_s23 }
 0x26e   : > { %2013 = vmax.xlane.f32.xlu1 %v2012_v40 }
 0x26f   : > { %5311 = vmatpush.xpose.msk.msrb.mxu2 %vm1043_vm1, %v6429_v57  ;;  %5212 = vmatmul.msk.f32.gmra.mxu0 %vm1043_vm1, %v2880_v30  ;;  %v1728_v30 = vsel %vm1141_vm2, %v6816_v17, -inf  ;;  %v1998_v54 = vpop.f32.mrf.mxu3 }
 0x270   : > { %5238 = vmatmul.msk.f32.gmra.mxu3 %vm1043_vm1, %v3174_v58  ;;  %v6810_v57 = vpop.permute.xlu0 %5385  ;;  %v6814_v58 = vmul.f32 0.35355338, %v1130_v22  ;;  %v6836_v39 = vmul.f32 0.35355338, %v1998_v54 }
 0x272   : > { %5076 = vmatmul.msk.f32.gmra.mxu2 %vm1141_vm2, %v6802_v33  ;;  %v2030_v61 = vsel %vm1141_vm2, %v6836_v39, -inf }
 0x273   : > { %5312 = vmatpush.xpose.msk.msrb.mxu2 %vm1043_vm1, %v6320_v53  ;;  %v1163_v53 = vsel %vm1141_vm2, %v6814_v58, -inf }
 0x276   : > { %2016 = vmax.xlane.f32.xlu1 %v2015_v32 }
 0x277   : > { %5313 = vmatpush.xpose.msk.msrb.mxu2 %vm1043_vm1, %v6318_v52  ;;  %v6827_v52 = vmul.f32 0.35355338, %v1992_v31 }
 0x278   : > { %5239 = vmatmul.msk.f32.gmra.mxu3 %vm1043_vm1, %v3176_v44  ;;  %v3178_v28 = vpop.permute.xlu0 %3177  ;;  %v1172_v44 = vsub.f32 %v6638_v5, %v6792_v49 }
 0x27b   : > { %5314 = vmatpush.xpose.msk.msrb.mxu2 %vm1043_vm1, %v6255_v29  ;;  %v2024_v29 = vsel %vm1141_vm2, %v6827_v52, -inf }
 0x27e   : > { %1164 = vmax.xlane.f32.xlu2 %v1163_v53  ;;  %1729 = vmax.xlane.f32.xlu1 %v1728_v30  ;;  %v1186_v53 = vmul.f32 1.442695, %v1172_v44 }
 0x27f   : > { %5315 = vmatpush.xpose.msk.msrb.mxu2 %vm1043_vm1, %v6237_v23  ;;  %v6839_v23 = vmul.f32 0.35355338, %v6736_v47 }
 0x280   : > { %5240 = vmatmul.msk.f32.gmra.mxu3 %vm1043_vm1, %v3178_v28 }
 0x281   : > { %v1450_v2 = vsel %vm1141_vm2, %v6839_v23, -inf }
 0x286   : > { %2025 = vmax.xlane.f32.xlu1 %v2024_v29 }
 0x28e   : > { %2028 = vmax.xlane.f32.xlu1 %v2027_v19  ;;  %v6901_v19 = vmul.f32 0.35355338, %v6759_v20 }
 0x296   : > { %2883 = vrot.lane.b32.xlu2 %v6323_v55, %s5854_s29  ;;  %2031 = vmax.xlane.f32.xlu1 %v2030_v61 }
 0x297   : > { %1451 = vmax.xlane.f32.xlu0 %v1450_v2  ;;  %v1722_v2 = vsel %vm1141_vm2, %v6901_v19, -inf }
 0x29e   : > { %5390 = vrot.lane.b32.xlu2 %v6220_v18, %s5860_s27  ;;  %v6861_v18 = vpack.i.bf16 %v6357_v1, %v6420_v27  ;;  %v6874_v1 = vpack.i.bf16 %v6327_v56, %v6373_v7  ;;  %v6887_v56 = vpop.f32.mrf.mxu3  ;;  %v6890_v7 = vmul.f32 0.35355338, %v6709_v35 }
 0x29f   : > { %v1153_v6 = vpop.xlane.xlu2 %1152 }
 0x2a0   : > { %v1169_v37 = vsub.f32 %v6707_v48, %v1153_v6  ;;  %v1699_v48 = vpop.f32.mrf.mxu0  ;;  %v1444_v29 = vsel %vm1141_vm2, %v6890_v7, -inf  ;;  %v6912_v6 = vmul.f32 0.35355338, %v6772_v25 }
 0x2a2   : > { %v1180_v24 = vmul.f32 1.442695, %v1169_v37  ;;  %v6915_v37 = vmul.f32 0.35355338, %v6784_v63  ;;  %v2018_v20 = vsel %vm1141_vm2, %v6912_v6, -inf }
 0x2a3   : > { %v6855_v55 = vpop.xlane.xlu0 %1433 }
 0x2a4   : > { %5514 = vpow2.f32 %v1180_v24 }
 0x2a6   : > { %v6903_v54 = vpop.f32.mrf.mxu3 }
 0x2a8   : > { %v1156_v47 = vpop.xlane.xlu2 %1155  ;;  %v1702_v31 = vpop.f32.mrf.mxu0 }
 0x2a9   : > { %v1170_v14 = vsub.f32 %v6719_v26, %v1156_v47  ;;  %v6934_v44 = vmul.f32 0.35355338, %v1702_v31 }
 0x2aa   : > { %v6851_v40 = vpop.eup %5514 }
 0x2ab   : > { %8788 = vst [vmem:[#allocation3_spill] sm:$0xff] %v6851_v40  ;;  %v1182_v22 = vmul.f32 1.442695, %v1170_v14  ;;  %2887 = vrot.lane.b32.xlu0 %v6514_v4, %s5854_s29  ;;  %5077 = vmatmul.msk.f32.gmra.mxu2 %vm1141_vm2, %v6851_v40  ;;  %v6876_v27 = vpop.xlane.xlu0 %1439  ;;  %v1725_v14 = vsel %vm1141_vm2, %v6915_v37, -inf }
 0x2ad   : > { %5516 = vpow2.f32 %v1182_v22 }
 0x2ae   : > { %v2669_v24 = vpop.f32.mrf.mxu3 }
 0x2af   : > { %5425 = vrot.lane.b32.xlu1 %v6861_v18, %s5858_s20  ;;  %v6927_v25 = vmul.f32 0.35355338, %v2669_v24 }
 0x2b0   : > { %v1159_v26 = vpop.xlane.xlu2 %1158  ;;  %v1705_v28 = vpop.f32.mrf.mxu0 }
 0x2b1   : > { %v1171_v32 = vsub.f32 %v6731_v15, %v1159_v26  ;;  %v6925_v26 = vmul.f32 0.35355338, %v1699_v48 }
 0x2b3   : > { %v6866_v36 = vpop.eup %5516  ;;  %v1184_v4 = vmul.f32 1.442695, %v1171_v32  ;;  %v1731_v63 = vsel %vm1141_vm2, %v6925_v26, -inf }
 0x2b4   : > { %8789 = vst [vmem:[#allocation4_spill] sm:$0xff] %v6866_v36  ;;  %5078 = vmatmul.msk.f32.gmra.mxu2 %vm1141_vm2, %v6866_v36 }
 0x2b5   : > { %5518 = vpow2.f32 %v1184_v4 }
 0x2b6   : > { %5520 = vpow2.f32 %v1186_v53  ;;  %v6931_v4 = vpop.f32.mrf.mxu3 }
 0x2b7   : > { %5435 = vrot.lane.b32.xlu1 %v6874_v1, %s5858_s20 }
 0x2b8   : > { %v2882_v15 = vpop.permute.xlu2 %2881  ;;  %v6905_v61 = vpop.f32.mrf.mxu0 }
 0x2b9   : > { %5213 = vmatmul.msk.f32.gmra.mxu0 %vm1043_vm1, %v2882_v15  ;;  %v2701_v15 = vsel %vm1141_vm2, %v6927_v25, -inf }
 0x2bb   : > { %v6881_v30 = vpop.eup %5518 }
 0x2bc   : > { %8790 = vst [vmem:[#allocation5_spill] sm:$0xff] %v6881_v30  ;;  %5079 = vmatmul.msk.f32.gmra.mxu2 %vm1141_vm2, %v6881_v30  ;;  %v6892_v49 = vpop.eup %5520 }
 0x2bd   : > { %8791 = vst [vmem:[#allocation6_spill] sm:$0xff] %v6892_v49 }
 0x2be   : > { %v6885_v5 = vpop.permute.xlu0 %5395  ;;  %v2675_v24 = vpop.f32.mrf.mxu3 }
 0x2c0   : > { %v6923_v22 = vpop.f32.mrf.mxu0 }
 0x2c4   : > { %5080 = vmatmul.msk.f32.gmra.mxu2 %vm1141_vm2, %v6892_v49  ;;  %v1437_v49 = vpop.xlane.xlu1 %1436 }
 0x2c6   : > { %v6896_v51 = vpop.permute.xlu0 %2885 }
 0x2c7   : > { %1445 = vmax.xlane.f32.xlu2 %v1444_v29  ;;  %v1734_v29 = vsel %vm1141_vm2, %v6934_v44, -inf }
 0x2c8   : > { %v2382_v53 = vpop.f32.mrf.mxu0 }
 0x2c9   : > { %v6938_v48 = vmul.f32 0.35355338, %v2382_v53 }
 0x2ce   : > { %v6907_v35 = vpop.permute.xlu0 %5400 }
 0x2cf   : > { %1723 = vmax.xlane.f32.xlu2 %v1722_v2  ;;  %v6942_v2 = vmul.f32 0.35355338, %v1705_v28 }
 0x2d0   : > { %v2385_v31 = vpop.f32.mrf.mxu0 }
 0x2d1   : > { %v6955_v53 = vmul.f32 0.35355338, %v2385_v31 }
 0x2d5   : > { %2019 = vmax.xlane.f32.xlu0 %v2018_v20  ;;  %v2414_v20 = vsel %vm1141_vm2, %v6938_v48, -inf }
 0x2d6   : > { %v6919_v47 = vpop.permute.xlu0 %5405 }
 0x2d7   : > { %1726 = vmax.xlane.f32.xlu2 %v1725_v14  ;;  %v6946_v14 = vmul.f32 0.35355338, %v2675_v24  ;;  %v1456_v24 = vsub.f32 %v6711_v34, %v6855_v55  ;;  %v1457_v34 = vsub.f32 %v6679_v21, %v1437_v49 }
 0x2dd   : > { %1732 = vmax.xlane.f32.xlu0 %v1731_v63  ;;  %v1737_v63 = vsel %vm1141_vm2, %v6942_v2, -inf }
 0x2de   : > { %v3180_v32 = vpop.permute.xlu0 %3179 }
 0x2df   : > { %5241 = vmatmul.msk.f32.gmra.mxu3 %vm1043_vm1, %v3180_v32  ;;  %v2707_v32 = vsel %vm1141_vm2, %v6946_v14, -inf }
 0x2e1   : > { %2702 = vmax.xlane.f32.xlu1 %v2701_v15 }
 0x2e5   : > { %1735 = vmax.xlane.f32.xlu0 %v1734_v29 }
 0x2e9   : > { %2415 = vmax.xlane.f32.xlu1 %v2414_v20  ;;  %v2388_v20 = vpop.f32.mrf.mxu0 }
 0x2ea   : > { %v6966_v31 = vmul.f32 0.35355338, %v2388_v20  ;;  %v1466_v20 = vmul.f32 1.442695, %v1457_v34  ;;  %v5387_v34 = vunpack.i.l.bf16 %v6810_v57 }
 0x2ed   : > { %1738 = vmax.xlane.f32.xlu0 %v1737_v63 }
 0x2ef   : > { %5415 = vrot.lane.b32.xlu2 %v6087_v46, %s5860_s27  ;;  %v2417_v46 = vsel %vm1141_vm2, %v6955_v53, -inf }
 0x2f1   : > { %v1165_v28 = vpop.xlane.xlu2 %1164  ;;  %2708 = vmax.xlane.f32.xlu1 %v2707_v32  ;;  %v1464_v32 = vmul.f32 1.442695, %v1456_v24  ;;  %v2391_v55 = vpop.f32.mrf.mxu0  ;;  %v5382_v24 = vunpack.i.l.bf16 %v6770_v13 }
 0x2f2   : > { %v1173_v15 = vsub.f32 %v6814_v58, %v1165_v28  ;;  %v6973_v28 = vpack.i.bf16 %v6296_v45, %v6388_v16  ;;  %v5383_v16 = vunpack.i.h.bf16 %v6770_v13  ;;  %v5388_v13 = vunpack.i.h.bf16 %v6810_v57 }
 0x2f3   : > { %v5398_v57 = vunpack.i.h.bf16 %v6885_v5 }
 0x2f4   : > { %v1188_v29 = vmul.f32 1.442695, %v1173_v15  ;;  %v2420_v15 = vsel %vm1141_vm2, %v6966_v31, -inf }
 0x2f6   : > { %5522 = vpow2.f32 %v1188_v29 }
 0x2f7   : > { %2889 = vrot.lane.b32.xlu2 %v6416_v50, %s5854_s29  ;;  %5524 = vpow2.f32 %v1464_v32  ;;  %v1443_v50 = vpop.xlane.xlu1 %1442  ;;  %s737_s29 = scalar_lea.vmem %s8759_s8, %s8856_s22 }
 0x2f8   : > { %5526 = vpow2.f32 %v1466_v20 }
 0x2f9   : > { %v2884_v63 = vpop.permute.xlu2 %2883  ;;  %2418 = vmax.xlane.f32.xlu1 %v2417_v46  ;;  %v6984_v46 = vmul.f32 0.35355338, %v2391_v55 }
 0x2fa   : > { %5214 = vmatmul.msk.f32.gmra.mxu0 %vm1043_vm1, %v2884_v63  ;;  %v1458_v63 = vsub.f32 %v6721_v60, %v6876_v27 }
 0x2fb   : > { %v2423_v55 = vsel %vm1141_vm2, %v6984_v46, -inf }
 0x2fc   : > { %v6964_v58 = vpop.eup %5522  ;;  %v1468_v20 = vmul.f32 1.442695, %v1458_v63 }
 0x2fd   : > { %8792 = vst [vmem:[#allocation7_spill] sm:$0xff] %v6964_v58  ;;  %5081 = vmatmul.msk.f32.gmra.mxu2 %vm1141_vm2, %v6964_v58  ;;  %v6981_v49 = vpop.eup %5524 }
 0x2fe   : > { %v6997_v27 = vpop.eup %5526  ;;  %5528 = vpow2.f32 %v1468_v20  ;;  %v7028_v20 = vmul.f32 0.35355338, %v6905_v61 }
 0x2ff   : > { %v5411_v32 = vpop.permute.xlu1 %5410 }
 0x300   : > { %v5412_v60 = vunpack.i.l.bf16 %v5411_v32 }
 0x301   : > { %5420 = vrot.lane.b32.xlu0 %v6973_v28, %s5858_s20  ;;  %v5391_v29 = vpop.permute.xlu2 %5390  ;;  %2421 = vmax.xlane.f32.xlu1 %v2420_v15  ;;  %v5403_v15 = vunpack.i.h.bf16 %v6907_v35 }
 0x302   : > { %5215 = vmatmul.msk.f32.gmra.mxu0 %vm1043_vm1, %v6896_v51  ;;  %v5392_v21 = vunpack.i.l.bf16 %v5391_v29  ;;  %v5393_v45 = vunpack.i.h.bf16 %v5391_v29  ;;  %v5402_v51 = vunpack.i.l.bf16 %v6907_v35  ;;  %v2394_v29 = vpop.f32.mrf.mxu0  ;;  %v1459_v35 = vsub.f32 %v6697_v41, %v1443_v50 }
 0x303   : > { %v7015_v50 = vmul.f32 0.35355338, %v6794_v43 }
 0x304   : > { %1850 = vmatpush.msrb.mxu1 %v5392_v21  ;;  %v6999_v21 = vmul.f32 0.35355338, %v2394_v29 }
 0x305   : > { %5098 = vmatmul.msk.f32.vlgmr.msra.gmra.mxu2 %vm1141_vm2, %v6981_v49 }
 0x306   : > { %2140 = vmatpush.msra.mxu2 %v5382_v24  ;;  %1851 = vmatpush.msrb.mxu1 %v5393_v45  ;;  %v5397_v24 = vunpack.i.l.bf16 %v6885_v5  ;;  %v5413_v45 = vunpack.i.h.bf16 %v5411_v32  ;;  %v2426_v63 = vsel %vm1141_vm2, %v6999_v21, -inf  ;;  %v5408_v32 = vunpack.i.h.bf16 %v6919_v47 }
 0x307   : > { %v1449_v5 = vpop.xlane.xlu1 %1448 }
 0x308   : > { %2141 = vmatpush.msra.mxu2 %v5383_v16  ;;  %1852 = vmatpush.msrb.mxu1 %v5402_v51  ;;  %v5407_v16 = vunpack.i.l.bf16 %v6919_v47  ;;  %v1470_v51 = vmul.f32 1.442695, %v1459_v35  ;;  %v2021_v47 = vsel %vm1141_vm2, %v7015_v50, -inf }
 0x309   : > { %2424 = vmax.xlane.f32.xlu1 %v2423_v55 }
 0x30a   : > { %2142 = vmatpush.msra.mxu2 %v5387_v34  ;;  %1853 = vmatpush.msrb.mxu1 %v5403_v15  ;;  %v7010_v34 = vpop.eup %5528  ;;  %v1452_v41 = vpop.xlane.xlu0 %1451  ;;  %5530 = vpow2.f32 %v1470_v51 }
 0x30c   : > { %2143 = vmatpush.msra.mxu2 %v5388_v13  ;;  %1854 = vmatpush.msrb.mxu1 %v5412_v60  ;;  %v7025_v13 = vmul.f32 0.35355338, %v6887_v56  ;;  %v2408_v60 = vsel %vm1141_vm2, %v7028_v20, -inf }
 0x30d   : > { %5099 = vmatmul.msk.f32.gmra.mxu2 %vm1141_vm2, %v6997_v27 }
 0x30e   : > { %2144 = vmatpush.msra.mxu2 %v5397_v24  ;;  %1855 = vmatpush.msrb.mxu1 %v5413_v45  ;;  %v2033_v43 = vsel %vm1141_vm2, %v7025_v13, -inf  ;;  %v7037_v24 = vmul.f32 0.35355338, %v6903_v54 }
 0x30f   : > { %v1455_v29 = vpop.xlane.xlu1 %1454 }
 0x310   : > { %2145 = vmatpush.msra.mxu2 %v5398_v57  ;;  %v7017_v55 = vpop.eup %5530  ;;  %v2698_v56 = vsel %vm1141_vm2, %v7037_v24, -inf }
 0x311   : > { %2427 = vmax.xlane.f32.xlu1 %v2426_v63  ;;  %v1461_v63 = vsub.f32 %v6747_v11, %v1449_v5 }
 0x312   : > { %2146 = vmatpush.msra.mxu2 %v5407_v16  ;;  %v7052_v16 = vpack.i.bf16 %v6377_v8, %v6346_v62  ;;  %v1462_v62 = vsub.f32 %v6839_v23, %v1452_v41  ;;  %v1463_v23 = vsub.f32 %v6755_v9, %v1455_v29  ;;  %v7089_v29 = vpop.f32.mrf.mxu2 }
 0x313   : > { %8793 = vst [vmem:[#allocation8_spill] sm:$0xff] %v7089_v29 }
 0x314   : > { %2147 = vmatpush.msra.mxu2 %v5408_v32  ;;  %v1476_v5 = vmul.f32 1.442695, %v1462_v62 }
 0x315   : > { %5100 = vmatmul.msk.f32.gmra.mxu2 %vm1141_vm2, %v7010_v34 }
 0x317   : > { %v7039_v45 = vpop.xlane.xlu1 %2013 }
 0x31d   : > { %v2888_v15 = vpop.permute.xlu0 %2887  ;;  %5101 = vmatmul.msk.f32.gmra.mxu2 %vm1141_vm2, %v7017_v55 }
 0x31e   : > { %5216 = vmatmul.msk.f32.gmra.mxu0 %vm1043_vm1, %v2888_v15  ;;  %v1474_v15 = vmul.f32 1.442695, %v1461_v63 }
 0x31f   : > { %v7045_v61 = vpop.xlane.xlu1 %2016 }
 0x320   : > { %2022 = vmax.xlane.f32.xlu2 %v2021_v47 }
 0x327   : > { %v1730_v51 = vpop.xlane.xlu1 %1729 }
 0x328   : > { %2034 = vmax.xlane.f32.xlu2 %v2033_v43 }
 0x32a   : > { %5460 = vrot.lane.b32.xlu1 %v6973_v28, %s5859_s26 }
 0x32b   : > { %2409 = vmax.xlane.f32.xlu0 %v2408_v60 }
 0x32f   : > { %v7067_v11 = vpop.xlane.xlu1 %2025 }
 0x330   : > { %2699 = vmax.xlane.f32.xlu2 %v2698_v56 }
 0x332   : > { %5475 = vrot.lane.b32.xlu1 %v6874_v1, %s5859_s26 }
 0x33a   : > { %v1446_v35 = vpop.xlane.xlu2 %1445  ;;  %5480 = vrot.lane.b32.xlu1 %v6861_v18, %s5860_s27 }
 0x33b   : > { %v1460_v57 = vsub.f32 %v6890_v7, %v1446_v35  ;;  %v1478_v35 = vmul.f32 1.442695, %v1463_v23 }
 0x33d   : > { %v1472_v54 = vmul.f32 1.442695, %v1460_v57 }
 0x33f   : > { %5532 = vpow2.f32 %v1472_v54  ;;  %5455 = vrot.lane.b32.xlu0 %v7052_v16, %s5857_s18  ;;  %v7081_v54 = vpop.xlane.xlu1 %2028 }
 0x340   : > { %5534 = vpow2.f32 %v1474_v15 }
 0x341   : > { %5536 = vpow2.f32 %v1476_v5 }
 0x342   : > { %v1724_v32 = vpop.xlane.xlu2 %1723  ;;  %5485 = vrot.lane.b32.xlu1 %v7052_v16, %s5859_s26 }
 0x343   : > { %v1746_v8 = vsub.f32 %v6901_v19, %v1724_v32 }
 0x345   : > { %v7059_v47 = vpop.eup %5532  ;;  %v1754_v60 = vmul.f32 1.442695, %v1746_v8 }
 0x346   : > { %5102 = vmatmul.msk.f32.gmra.mxu2 %vm1141_vm2, %v7059_v47  ;;  %v7071_v43 = vpop.eup %5534 }
 0x347   : > { %5538 = vpow2.f32 %v1754_v60  ;;  %v7083_v63 = vpop.eup %5536  ;;  %v7099_v60 = vpop.xlane.xlu1 %2031 }
 0x348   : > { %5430 = vrot.lane.b32.xlu2 %v6973_v28, %s5857_s18  ;;  %v7073_v56 = vpop.xlane.xlu0 %2019  ;;  %5540 = vpow2.f32 %v1478_v35 }
 0x34a   : > { %v1727_v7 = vpop.xlane.xlu2 %1726  ;;  %5490 = vrot.lane.b32.xlu1 %v6874_v1, %s5860_s27 }
 0x34b   : > { %v1747_v19 = vsub.f32 %v6915_v37, %v1727_v7  ;;  %v1748_v37 = vsub.f32 %v6816_v17, %v1730_v51  ;;  %v7109_v17 = vpop.f32.mrf.mxu2 }
 0x34c   : > { %8795 = vst [vmem:[#allocation10_spill] sm:$0xff] %v7109_v17 }
 0x34d   : > { %v1756_v32 = vmul.f32 1.442695, %v1747_v19  ;;  %v7087_v9 = vpop.eup %5538  ;;  %v1758_v5 = vmul.f32 1.442695, %v1748_v37 }
 0x34e   : > { %5103 = vmatmul.msk.f32.gmra.mxu2 %vm1141_vm2, %v7071_v43  ;;  %v7097_v7 = vpop.eup %5540 }
 0x34f   : > { %5542 = vpow2.f32 %v1756_v32  ;;  %8794 = vst [vmem:[#allocation9_spill] sm:$0xff] %v7097_v7 }
 0x350   : > { %5440 = vrot.lane.b32.xlu2 %v6861_v18, %s5857_s18  ;;  %v1733_v62 = vpop.xlane.xlu0 %1732  ;;  %5544 = vpow2.f32 %v1758_v5 }
 0x351   : > { %v1749_v51 = vsub.f32 %v6925_v26, %v1733_v62 }
 0x352   : > { %v5416_v41 = vpop.permute.xlu2 %5415 }
 0x353   : > { %v5417_v57 = vunpack.i.l.bf16 %v5416_v41  ;;  %v5418_v15 = vunpack.i.h.bf16 %v5416_v41  ;;  %v7113_v41 = vmul.f32 0.35355338, %v6931_v4  ;;  %v1760_v35 = vmul.f32 1.442695, %v1749_v51  ;;  %v7126_v37 = vpop.f32.mrf.mxu2 }
 0x354   : > { %8796 = vst [vmem:[#allocation11_spill] sm:$0xff] %v7126_v37 }
 0x355   : > { %1856 = vmatpush.msrb.mxu1 %v5417_v57  ;;  %v7103_v23 = vpop.eup %5542  ;;  %v5426_v57 = vpop.permute.xlu1 %5425  ;;  %v2704_v26 = vsel %vm1141_vm2, %v7113_v41, -inf  ;;  %5546 = vpow2.f32 %v1760_v35 }
 0x356   : > { %5104 = vmatmul.msk.f32.gmra.mxu2 %vm1141_vm2, %v7083_v63  ;;  %v7117_v32 = vpop.eup %5544 }
 0x357   : > { %1857 = vmatpush.msrb.mxu1 %v5418_v15  ;;  %v2397_v15 = vpop.f32.mrf.mxu0 }
 0x358   : > { %5445 = vrot.lane.b32.xlu2 %v7052_v16, %s5858_s20  ;;  %5122 = vmatmul.msk.f32.vlgmr.msrb.gmra.mxu1 %vm1141_vm2, %v7087_v9  ;;  %v1736_v19 = vpop.xlane.xlu0 %1735 }
 0x359   : > { %v1750_v4 = vsub.f32 %v6934_v44, %v1736_v19 }
 0x35a   : > { %v2890_v8 = vpop.permute.xlu2 %2889 }
 0x35b   : > { %5217 = vmatmul.msk.f32.gmra.mxu0 %vm1043_vm1, %v2890_v8  ;;  %v7128_v8 = vmul.f32 0.35355338, %v2397_v15  ;;  %v1762_v5 = vmul.f32 1.442695, %v1750_v4 }
 0x35d   : > { %8797 = vst [vmem:[#allocation12_spill] sm:$0xff] %v7128_v8  ;;  %v5436_v51 = vpop.permute.xlu1 %5435  ;;  %v2429_v44 = vsel %vm1141_vm2, %v7128_v8, -inf }
 0x35e   : > { %5105 = vmatmul.msk.f32.gmra.mxu2 %vm1141_vm2, %v7097_v7 }
 0x360   : > { %5450 = vrot.lane.b32.xlu2 %v6874_v1, %s5857_s18  ;;  %5123 = vmatmul.msk.f32.gmra.mxu1 %vm1141_vm2, %v7103_v23  ;;  %v2036_v1 = vsub.f32 %v6777_v42, %v7039_v45  ;;  %v7132_v42 = vpop.eup %5546  ;;  %v2037_v45 = vsub.f32 %v6799_v10, %v7045_v61  ;;  %v2038_v61 = vsub.f32 %v6912_v6, %v7073_v56  ;;  %v5438_v56 = vunpack.i.h.bf16 %v5436_v51  ;;  %s740_s18 = scalar_lea.vmem %s8760_s9, %s8856_s22 }
 0x362   : > { %v2044_v62 = vmul.f32 1.442695, %v2036_v1  ;;  %v2046_v35 = vmul.f32 1.442695, %v2037_v45  ;;  %v7141_v1 = vpop.f32.mrf.mxu2  ;;  %v2048_v45 = vmul.f32 1.442695, %v2038_v61 }
 0x363   : > { %8798 = vst [vmem:[#allocation13_spill] sm:$0xff] %v7141_v1 }
 0x364   : > { %5548 = vpow2.f32 %v2044_v62 }
 0x365   : > { %5550 = vpow2.f32 %v1762_v5  ;;  %v5428_v5 = vunpack.i.h.bf16 %v5426_v57 }
 0x366   : > { %5120 = vmatmul.msk.f32.vlgmr.msrb.gmra.mxu2 %vm1043_vm1, %v6562_v38  ;;  %v1739_v38 = vpop.xlane.xlu0 %1738  ;;  %5552 = vpow2.f32 %v2046_v35 }
 0x367   : > { %v1751_v19 = vsub.f32 %v6942_v2, %v1739_v38  ;;  %v7151_v2 = vpop.xlane.xlu1 %2702  ;;  %v5427_v38 = vunpack.i.l.bf16 %v5426_v57  ;;  %v2678_v57 = vpop.f32.mrf.mxu3 }
 0x368   : > { %5124 = vmatmul.msk.f32.gmra.mxu1 %vm1141_vm2, %v7117_v32 }
 0x369   : > { %2705 = vmax.xlane.f32.xlu0 %v2704_v26  ;;  %v1764_v4 = vmul.f32 1.442695, %v1751_v19  ;;  %v5437_v19 = vunpack.i.l.bf16 %v5436_v51 }
 0x36a   : > { %v7143_v15 = vpop.eup %5548  ;;  %v7157_v35 = vpop.f32.mrf.mxu2 }
 0x36b   : > { %v7147_v10 = vpop.eup %5550  ;;  %5554 = vpow2.f32 %v1764_v4  ;;  %8799 = vst [vmem:[#allocation14_spill] sm:$0xff] %v7157_v35 }
 0x36c   : > { %5556 = vpow2.f32 %v2048_v45 }
 0x36e   : > { %5121 = vmatmul.msk.f32.gmra.mxu2 %vm1043_vm1, %v6596_v59 }
 0x370   : > { %5125 = vmatmul.msk.f32.gmra.mxu1 %vm1141_vm2, %v7132_v42 }
 0x371   : > { %2430 = vmax.xlane.f32.xlu0 %v2429_v44  ;;  %v7155_v44 = vpop.eup %5552 }
 0x372   : > { %v7161_v6 = vpop.eup %5554  ;;  %v7176_v51 = vpop.f32.mrf.mxu2 }
 0x373   : > { %v5421_v59 = vpop.permute.xlu0 %5420  ;;  %v7170_v4 = vpop.eup %5556  ;;  %8800 = vst [vmem:[#allocation15_spill] sm:$0xff] %v7176_v51 }
 0x374   : > { %v5422_v26 = vunpack.i.l.bf16 %v5421_v59  ;;  %v5423_v62 = vunpack.i.h.bf16 %v5421_v59  ;;  %v7165_v59 = vpop.xlane.xlu1 %2415 }
 0x376   : > { %5146 = vmatmul.msk.f32.vlgmr.msra.gmra.mxu2 %vm1141_vm2, %v7143_v15 }
 0x377   : > { %2826 = vmatpush.msrb.mxu2 %v5422_v26  ;;  %v7168_v26 = vmul.f32 0.35355338, %v6923_v22 }
 0x378   : > { %5126 = vmatmul.msk.f32.gmra.mxu1 %vm1141_vm2, %v7147_v10 }
 0x379   : > { %2827 = vmatpush.msrb.mxu2 %v5423_v62  ;;  %v2411_v61 = vsel %vm1141_vm2, %v7168_v26, -inf  ;;  %v2681_v62 = vpop.f32.mrf.mxu3 }
 0x37a   : > { %v7186_v45 = vpop.f32.mrf.mxu2 }
 0x37b   : > { %2828 = vmatpush.msrb.mxu2 %v5427_v38  ;;  %v7180_v38 = vmul.f32 0.35355338, %v2678_v57  ;;  %8801 = vst [vmem:[#allocation16_spill] sm:$0xff] %v7186_v45  ;;  %v2040_v57 = vsub.f32 %v6827_v52, %v7067_v11  ;;  %v2041_v52 = vsub.f32 %v6832_v3, %v7081_v54  ;;  %v2042_v3 = vsub.f32 %v6836_v39, %v7099_v60 }
 0x37d   : > { %2829 = vmatpush.msrb.mxu2 %v5428_v5  ;;  %v7182_v5 = vpop.xlane.xlu1 %2708  ;;  %v2710_v22 = vsel %vm1141_vm2, %v7180_v38, -inf  ;;  %v2056_v17 = vmul.f32 1.442695, %v2042_v3 }
 0x37e   : > { %5147 = vmatmul.msk.f32.gmra.mxu2 %vm1141_vm2, %v7155_v44 }
 0x37f   : > { %2830 = vmatpush.msrb.mxu2 %v5437_v19  ;;  %v7188_v19 = vmul.f32 0.35355338, %v2681_v62  ;;  %v2052_v62 = vmul.f32 1.442695, %v2040_v57 }
 0x380   : > { %5127 = vmatmul.msk.f32.gmra.mxu1 %vm1141_vm2, %v7161_v6 }
 0x381   : > { %2831 = vmatpush.msrb.mxu2 %v5438_v56  ;;  %v2684_v51 = vpop.f32.mrf.mxu3  ;;  %v2713_v58 = vsel %vm1141_vm2, %v7188_v19, -inf }
 0x382   : > { %v7197_v1 = vpop.f32.mrf.mxu2  ;;  %v7199_v45 = vmul.f32 0.35355338, %v2684_v51 }
 0x383   : > { %8802 = vst [vmem:[#allocation17_spill] sm:$0xff] %v7197_v1  ;;  %v2956_v1 = vpop.f32.mrf.mxu0 }
 0x385   : > { %5465 = vrot.lane.b32.xlu0 %v6861_v18, %s5859_s26  ;;  %v7191_v35 = vpop.xlane.xlu1 %2418  ;;  %s734_s26 = scalar_lea.vmem %s8758_s7, %s8856_s22 }
 0x386   : > { %5148 = vmatmul.msk.f32.gmra.mxu2 %vm1141_vm2, %v7170_v4 }
 0x389   : > { %2412 = vmax.xlane.f32.xlu2 %v2411_v61 }
 0x38d   : > { %v7207_v11 = vpop.xlane.xlu1 %2421 }
 0x391   : > { %2711 = vmax.xlane.f32.xlu2 %v2710_v22 }
 0x393   : > { %v2023_v18 = vpop.xlane.xlu2 %2022 }
 0x394   : > { %v2039_v56 = vsub.f32 %v7015_v50, %v2023_v18  ;;  %v2687_v50 = vpop.f32.mrf.mxu3  ;;  %v2716_v18 = vsel %vm1141_vm2, %v7199_v45, -inf }
 0x396   : > { %v2050_v61 = vmul.f32 1.442695, %v2039_v56  ;;  %v7213_v56 = vmul.f32 0.35355338, %v2687_v50  ;;  %v7225_v50 = vpop.xlane.xlu1 %2424 }
 0x398   : > { %5558 = vpow2.f32 %v2050_v61  ;;  %v2054_v61 = vmul.f32 1.442695, %v2041_v52  ;;  %v2719_v54 = vsel %vm1141_vm2, %v7213_v56, -inf }
 0x399   : > { %2714 = vmax.xlane.f32.xlu2 %v2713_v58  ;;  %5560 = vpow2.f32 %v2052_v62  ;;  %v7211_v58 = vpop.f32.mrf.mxu2 }
 0x39a   : > { %8803 = vst [vmem:[#allocation18_spill] sm:$0xff] %v7211_v58  ;;  %5562 = vpow2.f32 %v2054_v61 }
 0x39b   : > { %v2035_v22 = vpop.xlane.xlu2 %2034  ;;  %5564 = vpow2.f32 %v2056_v17 }
 0x39c   : > { %v3246_v62 = vpop.f32.mrf.mxu3  ;;  %v2043_v60 = vsub.f32 %v7025_v13, %v2035_v22 }
 0x39d   : > { %v7227_v30 = vmul.f32 0.35355338, %v3246_v62 }
 0x39e   : > { %v7201_v37 = vpop.eup %5558  ;;  %v2058_v62 = vmul.f32 1.442695, %v2043_v60  ;;  %v7249_v33 = vpop.xlane.xlu0 %2409 }
 0x39f   : > { %5149 = vmatmul.msk.f32.gmra.mxu2 %vm1141_vm2, %v7201_v37  ;;  %v7215_v57 = vpop.eup %5560 }
 0x3a0   : > { %v7231_v61 = vpop.eup %5562  ;;  %5566 = vpow2.f32 %v2058_v62  ;;  %v2723_v62 = vsub.f32 %v6927_v25, %v7151_v2 }
 0x3a1   : > { %2717 = vmax.xlane.f32.xlu2 %v2716_v18  ;;  %v7223_v18 = vmul.f32 0.35355338, %v2956_v1  ;;  %v7229_v36 = vpop.f32.mrf.mxu2  ;;  %v3278_v1 = vsel %vm1141_vm2, %v7227_v30, -inf }
 0x3a2   : > { %8805 = vst [vmem:[#allocation20_spill] sm:$0xff] %v7229_v36 }
 0x3a3   : > { %v2700_v51 = vpop.xlane.xlu2 %2699  ;;  %8804 = vst [vmem:[#allocation19_spill] sm:$0xff] %v7223_v18  ;;  %v2988_v39 = vsel %vm1141_vm2, %v7223_v18, -inf }
 0x3a7   : > { %5150 = vmatmul.msk.f32.gmra.mxu2 %vm1141_vm2, %v7215_v57 }
 0x3a9   : > { %2720 = vmax.xlane.f32.xlu2 %v2719_v54  ;;  %v7240_v54 = vpop.xlane.xlu1 %2427 }
 0x3ab   : > { %v5431_v52 = vpop.permute.xlu2 %5430 }
 0x3ac   : > { %v5432_v29 = vunpack.i.l.bf16 %v5431_v52  ;;  %v5433_v40 = vunpack.i.h.bf16 %v5431_v52  ;;  %v7242_v52 = vpop.eup %5564 }
 0x3ad   : > { %v7251_v60 = vpop.eup %5566 }
 0x3ae   : > { %2536 = vmatpush.msra.mxu1 %v5432_v29  ;;  %8807 = vst [vmem:[#allocation22_spill] sm:$0xff] %v7251_v60 }
 0x3af   : > { %2989 = vmax.xlane.f32.xlu0 %v2988_v39  ;;  %5151 = vmatmul.msk.f32.gmra.mxu2 %vm1141_vm2, %v7231_v61  ;;  %v7244_v39 = vpop.f32.mrf.mxu2 }
 0x3b0   : > { %2537 = vmatpush.msra.mxu1 %v5433_v40  ;;  %8806 = vst [vmem:[#allocation21_spill] sm:$0xff] %v7244_v39  ;;  %v2722_v40 = vsub.f32 %v7037_v24, %v2700_v51 }
 0x3b1   : > { %3279 = vmax.xlane.f32.xlu2 %v3278_v1  ;;  %v5461_v17 = vpop.permute.xlu1 %5460  ;;  %v5456_v39 = vpop.permute.xlu0 %5455 }
 0x3b2   : > { %v2730_v22 = vmul.f32 1.442695, %v2722_v40  ;;  %v5457_v25 = vunpack.i.l.bf16 %v5456_v39  ;;  %v5458_v2 = vunpack.i.h.bf16 %v5456_v39 }
 0x3b3   : > { %v5441_v3 = vpop.permute.xlu2 %5440 }
 0x3b4   : > { %v5442_v29 = vunpack.i.l.bf16 %v5441_v3  ;;  %v5443_v36 = vunpack.i.h.bf16 %v5441_v3  ;;  %v5462_v3 = vunpack.i.l.bf16 %v5461_v17  ;;  %5568 = vpow2.f32 %v2730_v22 }
 0x3b6   : > { %2538 = vmatpush.msra.mxu1 %v5442_v29  ;;  %v2732_v29 = vmul.f32 1.442695, %v2723_v62 }
 0x3b7   : > { %5152 = vmatmul.msk.f32.gmra.mxu2 %vm1141_vm2, %v7242_v52  ;;  %v7257_v24 = vpop.f32.mrf.mxu2 }
 0x3b8   : > { %2539 = vmatpush.msra.mxu1 %v5443_v36  ;;  %v5463_v36 = vunpack.i.h.bf16 %v5461_v17  ;;  %8808 = vst [vmem:[#allocation23_spill] sm:$0xff] %v7257_v24  ;;  %5570 = vpow2.f32 %v2732_v29  ;;  %v2959_v29 = vpop.f32.mrf.mxu0 }
 0x3bb   : > { %v5446_v13 = vpop.permute.xlu2 %5445 }
 0x3bc   : > { %v5447_v1 = vunpack.i.l.bf16 %v5446_v13  ;;  %v5448_v7 = vunpack.i.h.bf16 %v5446_v13  ;;  %v7259_v13 = vpop.eup %5568 }
 0x3bd   : > { %8809 = vst [vmem:[#allocation24_spill] sm:$0xff] %v7259_v13 }
 0x3be   : > { %2832 = vmatpush.msrb.mxu2 %v5447_v1  ;;  %v7267_v17 = vpop.eup %5570 }
 0x3bf   : > { %5153 = vmatmul.msk.f32.gmra.mxu2 %vm1141_vm2, %v7251_v60  ;;  %8811 = vst [vmem:[#allocation26_spill] sm:$0xff] %v7267_v17 }
 0x3c0   : > { %2833 = vmatpush.msrb.mxu2 %v5448_v7 }
 0x3c2   : > { %3406 = vmatpush.msra.mxu2 %v5462_v3 }
 0x3c3   : > { %v5451_v51 = vpop.permute.xlu2 %5450 }
 0x3c4   : > { %3407 = vmatpush.msra.mxu2 %v5463_v36  ;;  %v5452_v40 = vunpack.i.l.bf16 %v5451_v51  ;;  %v5453_v1 = vunpack.i.h.bf16 %v5451_v51 }
 0x3c6   : > { %2540 = vmatpush.msra.mxu1 %v5452_v40 }
 0x3c7   : > { %5194 = vmatmul.msk.f32.vlgmr.msrb.gmra.mxu2 %vm1141_vm2, %v7259_v13 }
 0x3c8   : > { %2541 = vmatpush.msra.mxu1 %v5453_v1 }
 0x3c9   : > { %5470 = vrot.lane.b32.xlu2 %v6973_v28, %s5860_s27  ;;  %v7265_v7 = vpop.f32.mrf.mxu2  ;;  %v2725_v28 = vsub.f32 %v6946_v14, %v7182_v5 }
 0x3ca   : > { %8810 = vst [vmem:[#allocation25_spill] sm:$0xff] %v7265_v7  ;;  %2542 = vmatpush.msra.mxu1 %v5457_v25  ;;  %v3249_v25 = vpop.f32.mrf.mxu3 }
 0x3cb   : > { %v2736_v40 = vmul.f32 1.442695, %v2725_v28  ;;  %v7288_v14 = vmul.f32 0.35355338, %v3249_v25 }
 0x3cc   : > { %2543 = vmatpush.msra.mxu1 %v5458_v2  ;;  %v5476_v2 = vpop.permute.xlu1 %5475 }
 0x3cd   : > { %v3281_v28 = vsel %vm1141_vm2, %v7288_v14, -inf  ;;  %v5477_v60 = vunpack.i.l.bf16 %v5476_v2  ;;  %v5478_v18 = vunpack.i.h.bf16 %v5476_v2 }
 0x3cf   : > { %5195 = vmatmul.msk.f32.gmra.mxu2 %vm1141_vm2, %v7267_v17  ;;  %v7306_v17 = vmul.f32 0.35355338, %v2959_v29 }
 0x3d1   : > { %v7271_v22 = vpop.f32.mrf.mxu2 }
 0x3d2   : > { %8812 = vst [vmem:[#allocation27_spill] sm:$0xff] %v7271_v22 }
 0x3d4   : > { %v7300_v7 = vpop.permute.xlu1 %5480 }
 0x3d9   : > { %v7273_v3 = vpop.f32.mrf.mxu2 }
 0x3da   : > { %8813 = vst [vmem:[#allocation28_spill] sm:$0xff] %v7273_v3 }
 0x3dc   : > { %v2706_v62 = vpop.xlane.xlu0 %2705  ;;  %v5486_v29 = vpop.permute.xlu1 %5485 }
 0x3dd   : > { %v2724_v36 = vsub.f32 %v7113_v41, %v2706_v62  ;;  %v2962_v41 = vpop.f32.mrf.mxu0 }
 0x3df   : > { %v2734_v51 = vmul.f32 1.442695, %v2724_v36 }
 0x3e1   : > { %5572 = vpow2.f32 %v2734_v51  ;;  %v7278_v39 = vpop.f32.mrf.mxu2 }
 0x3e2   : > { %8814 = vst [vmem:[#allocation29_spill] sm:$0xff] %v7278_v39  ;;  %5574 = vpow2.f32 %v2736_v40 }
 0x3e4   : > { %v7292_v36 = vpop.xlane.xlu0 %2430 }
 0x3e5   : > { %v2965_v39 = vpop.f32.mrf.mxu0 }
 0x3e6   : > { %v7326_v2 = vmul.f32 0.35355338, %v2965_v39 }
 0x3e7   : > { %v7280_v1 = vpop.eup %5572 }
 0x3e8   : > { %8815 = vst [vmem:[#allocation30_spill] sm:$0xff] %v7280_v1  ;;  %5196 = vmatmul.msk.f32.gmra.mxu2 %vm1141_vm2, %v7280_v1  ;;  %v7290_v5 = vpop.eup %5574 }
 0x3e9   : > { %v1708_v3 = vpop.f32.mrf.mxu2  ;;  %8816 = vst [vmem:[#allocation31_spill] sm:$0xff] %v7290_v5 }
 0x3ea   : > { %v7284_v22 = vmul.f32 0.35355338, %v1708_v3  ;;  %v3252_v3 = vpop.f32.mrf.mxu3 }
 0x3ec   : > { %v1740_v62 = vsel %vm1141_vm2, %v7284_v22, -inf }
 0x3ed   : > { %1741 = vmax.xlane.f32.xlu0 %v1740_v62  ;;  %v7304_v62 = vmul.f32 0.35355338, %v3252_v3  ;;  %v2991_v3 = vsel %vm1141_vm2, %v7306_v17, -inf }
 0x3ef   : > { %v3284_v24 = vsel %vm1141_vm2, %v7304_v62, -inf }
 0x3f0   : > { %5197 = vmatmul.msk.f32.gmra.mxu2 %vm1141_vm2, %v7290_v5 }
 0x3f1   : > { %v1711_v51 = vpop.f32.mrf.mxu2 }
 0x3f2   : > { %v7298_v40 = vmul.f32 0.35355338, %v1711_v51  ;;  %3282 = vmax.xlane.f32.xlu2 %v3281_v28  ;;  %v2968_v51 = vpop.f32.mrf.mxu0  ;;  %v7310_v28 = vpop.f32.mrf.mxu3 }
 0x3f3   : > { %v7318_v8 = vmul.f32 0.35355338, %v2968_v51 }
 0x3f4   : > { %v1743_v25 = vsel %vm1141_vm2, %v7298_v40, -inf }
 0x3f5   : > { %1744 = vmax.xlane.f32.xlu1 %v1743_v25  ;;  %v7316_v25 = vmul.f32 0.35355338, %v2962_v41  ;;  %8817 = vst [vmem:[#allocation32_spill] sm:$0xff] %v7318_v8  ;;  %v3000_v41 = vsel %vm1141_vm2, %v7318_v8, -inf }
 0x3f7   : > { %v5466_v1 = vpop.permute.xlu0 %5465 }
 0x3f8   : > { %v5467_v5 = vunpack.i.l.bf16 %v5466_v1  ;;  %v5468_v13 = vunpack.i.h.bf16 %v5466_v1  ;;  %v2994_v1 = vsel %vm1141_vm2, %v7316_v25, -inf }
 0x3fa   : > { %3285 = vmax.xlane.f32.xlu2 %v3284_v24  ;;  %3408 = vmatpush.msra.mxu2 %v5467_v5  ;;  %v5487_v24 = vunpack.i.l.bf16 %v5486_v29 }
 0x3fc   : > { %v7312_v58 = vpop.xlane.xlu2 %2412  ;;  %3409 = vmatpush.msra.mxu2 %v5468_v13  ;;  %v5488_v13 = vunpack.i.h.bf16 %v5486_v29  ;;  %v2997_v29 = vsel %vm1141_vm2, %v7326_v2, -inf }
 0x3fd   : > { %2992 = vmax.xlane.f32.xlu1 %v2991_v3 }
 0x3fe   : > { %3410 = vmatpush.msra.mxu2 %v5477_v60  ;;  %v2971_v60 = vpop.f32.mrf.mxu0 }
 0x400   : > { %3411 = vmatpush.msra.mxu2 %v5478_v18  ;;  %v3258_v18 = vpop.f32.mrf.mxu3 }
 0x401   : > { %5495 = vrot.lane.b32.xlu0 %v7052_v16, %s5860_s27  ;;  %v7329_v16 = vmul.f32 0.35355338, %v2971_v60  ;;  %s745_s27 = scalar_lea.vmem %s8761_s10, %s5961_s23 }
 0x402   : > { %2995 = vmax.xlane.f32.xlu2 %v2994_v1  ;;  %3412 = vmatpush.msra.mxu2 %v5487_v24 }
 0x403   : > { %v3003_v1 = vsel %vm1141_vm2, %v7329_v16, -inf }
 0x404   : > { %v2712_v5 = vpop.xlane.xlu2 %2711  ;;  %3413 = vmatpush.msra.mxu2 %v5488_v13  ;;  %v7335_v13 = vmul.f32 0.35355338, %v3258_v18 }
 0x405   : > { %v2726_v51 = vsub.f32 %v7180_v38, %v2712_v5  ;;  %3001 = vmax.xlane.f32.xlu1 %v3000_v41 }
 0x406   : > { %v2974_v39 = vpop.f32.mrf.mxu0 }
 0x407   : > { %v2738_v3 = vmul.f32 1.442695, %v2726_v51  ;;  %v7340_v60 = vmul.f32 0.35355338, %v2974_v39  ;;  %v3290_v51 = vsel %vm1141_vm2, %v7335_v13, -inf }
 0x408   : > { %v3261_v41 = vpop.f32.mrf.mxu3 }
 0x409   : > { %5576 = vpow2.f32 %v2738_v3  ;;  %v3006_v3 = vsel %vm1141_vm2, %v7340_v60, -inf }
 0x40a   : > { %2998 = vmax.xlane.f32.xlu2 %v2997_v29 }
 0x40c   : > { %v2715_v24 = vpop.xlane.xlu2 %2714 }
 0x40d   : > { %v2727_v8 = vsub.f32 %v7188_v19, %v2715_v24  ;;  %3004 = vmax.xlane.f32.xlu1 %v3003_v1  ;;  %v7348_v19 = vmul.f32 0.35355338, %v3261_v41 }
 0x40e   : > { %v2977_v29 = vpop.f32.mrf.mxu0 }
 0x40f   : > { %v7338_v38 = vpop.eup %5576  ;;  %v2740_v5 = vmul.f32 1.442695, %v2727_v8  ;;  %v7353_v39 = vmul.f32 0.35355338, %v2977_v29 }
 0x410   : > { %8818 = vst [vmem:[#allocation33_spill] sm:$0xff] %v7338_v38  ;;  %5198 = vmatmul.msk.f32.gmra.mxu2 %vm1141_vm2, %v7338_v38 }
 0x411   : > { %5578 = vpow2.f32 %v2740_v5  ;;  %v3293_v5 = vsel %vm1141_vm2, %v7348_v19, -inf  ;;  %v3009_v38 = vsel %vm1141_vm2, %v7353_v39, -inf }
 0x412   : > { %3291 = vmax.xlane.f32.xlu2 %v3290_v51  ;;  %v3264_v51 = vpop.f32.mrf.mxu3 }
 0x414   : > { %v2718_v18 = vpop.xlane.xlu2 %2717 }
 0x415   : > { %v2728_v8 = vsub.f32 %v7199_v45, %v2718_v18  ;;  %3007 = vmax.xlane.f32.xlu1 %v3006_v3  ;;  %v7361_v45 = vmul.f32 0.35355338, %v3264_v51  ;;  %v2060_v51 = vsel %vm1141_vm2, %v7143_v15, 0.0 }
 0x417   : > { %v7351_v24 = vpop.eup %5578  ;;  %v2742_v1 = vmul.f32 1.442695, %v2728_v8  ;;  %v3296_v8 = vsel %vm1141_vm2, %v7361_v45, -inf }
 0x418   : > { %8819 = vst [vmem:[#allocation34_spill] sm:$0xff] %v7351_v24  ;;  %5199 = vmatmul.msk.f32.gmra.mxu2 %vm1141_vm2, %v7351_v24 }
 0x419   : > { %5580 = vpow2.f32 %v2742_v1 }
 0x41a   : > { %3294 = vmax.xlane.f32.xlu2 %v3293_v5  ;;  %v3267_v1 = vpop.f32.mrf.mxu3 }
 0x41b   : > { %v7372_v24 = vmul.f32 0.35355338, %v3267_v1 }
 0x41c   : > { %v2721_v41 = vpop.xlane.xlu2 %2720 }
 0x41d   : > { %v2729_v18 = vsub.f32 %v7213_v56, %v2721_v41  ;;  %3010 = vmax.xlane.f32.xlu1 %v3009_v38  ;;  %v7376_v38 = vmul.f32 0.35355338, %v7310_v28  ;;  %v2063_v28 = vsel %vm1141_vm2, %v7155_v44, 0.0  ;;  %v1480_v44 = vsel %vm1141_vm2, %v6981_v49, 0.0 }
 0x41e   : > { %v1483_v49 = vsel %vm1141_vm2, %v6997_v27, 0.0  ;;  %v1779_v27 = vsel %vm1141_vm2, %v7132_v42, 0.0  ;;  %v1498_v42 = vsel %vm1141_vm2, %v7083_v63, 0.0  ;;  %v1193_v63 = vsel %vm1141_vm2, %v6780_v0, 0.0 }
 0x41f   : > { %v7364_v3 = vpop.eup %5580  ;;  %v2744_v29 = vmul.f32 1.442695, %v2729_v18  ;;  %v3287_v15 = vsel %vm1141_vm2, %v7376_v38, -inf }
 0x420   : > { %5200 = vmatmul.msk.f32.gmra.mxu2 %vm1141_vm2, %v7364_v3 }
 0x421   : > { %5582 = vpow2.f32 %v2744_v29  ;;  %v3299_v29 = vsel %vm1141_vm2, %v7372_v24, -inf }
 0x422   : > { %3297 = vmax.xlane.f32.xlu2 %v3296_v8 }
 0x424   : > { %v3280_v5 = vpop.xlane.xlu2 %3279 }
 0x425   : > { %v3302_v56 = vsub.f32 %v7227_v30, %v3280_v5  ;;  %2061 = vadd.xlane.f32.xlu1 %v2060_v51  ;;  %v5482_v51 = vunpack.i.l.bf16 %v7300_v7 }
 0x427   : > { %v7378_v41 = vpop.eup %5582  ;;  %v3310_v18 = vmul.f32 1.442695, %v3302_v56  ;;  %v1770_v56 = vsel %vm1141_vm2, %v7087_v9, 0.0  ;;  %v1773_v9 = vsel %vm1141_vm2, %v7103_v23, 0.0  ;;  %v2072_v23 = vsel %vm1141_vm2, %v7215_v57, 0.0 }
 0x428   : > { %5201 = vmatmul.msk.f32.gmra.mxu2 %vm1141_vm2, %v7378_v41  ;;  %v1492_v57 = vsel %vm1141_vm2, %v7059_v47, 0.0 }
 0x429   : > { %5584 = vpow2.f32 %v3310_v18  ;;  %v5491_v18 = vpop.permute.xlu1 %5490 }
 0x42a   : > { %3300 = vmax.xlane.f32.xlu2 %v3299_v29  ;;  %v5483_v29 = vunpack.i.h.bf16 %v7300_v7  ;;  %v2069_v7 = vsel %vm1141_vm2, %v7201_v37, 0.0  ;;  %v1489_v37 = vsel %vm1141_vm2, %v7017_v55, 0.0  ;;  %v1495_v55 = vsel %vm1141_vm2, %v7071_v43, 0.0 }
 0x42b   : > { %3288 = vmax.xlane.f32.xlu0 %v3287_v15  ;;  %v2066_v15 = vsel %vm1141_vm2, %v7170_v4, 0.0  ;;  %v1776_v4 = vsel %vm1141_vm2, %v7117_v32, 0.0  ;;  %v1785_v32 = vsel %vm1141_vm2, %v7161_v6, 0.0  ;;  %v1190_v6 = vsel %vm1141_vm2, %v6757_v12, 0.0 }
 0x42c   : > { %v5471_v30 = vpop.permute.xlu2 %5470 }
 0x42d   : > { %v5472_v8 = vunpack.i.l.bf16 %v5471_v30  ;;  %2064 = vadd.xlane.f32.xlu1 %v2063_v28  ;;  %v5473_v5 = vunpack.i.h.bf16 %v5471_v30  ;;  %v5492_v30 = vunpack.i.l.bf16 %v5491_v18  ;;  %v5493_v28 = vunpack.i.h.bf16 %v5491_v18 }
 0x42f   : > { %v7388_v1 = vpop.eup %5584  ;;  %3116 = vmatpush.msrb.mxu1 %v5472_v8  ;;  %v1486_v8 = vsel %vm1141_vm2, %v7010_v34, 0.0  ;;  %v1782_v34 = vsel %vm1141_vm2, %v7147_v10, 0.0  ;;  %v2078_v10 = vsel %vm1141_vm2, %v7242_v52, 0.0 }
 0x430   : > { %5242 = vmatmul.msk.f32.vlgmr.msra.gmra.mxu2 %vm1141_vm2, %v7388_v1 }
 0x431   : > { %3117 = vmatpush.msrb.mxu1 %v5473_v5  ;;  %v7424_v5 = vpop.xlane.xlu0 %2989 }
 0x432   : > { %1771 = vadd.xlane.f32.xlu2 %v1770_v56  ;;  %v2075_v56 = vsel %vm1141_vm2, %v7231_v61, 0.0  ;;  %v2432_v61 = vsub.f32 %v7028_v20, %v7249_v33  ;;  %v2433_v33 = vsub.f32 %v7168_v26, %v7312_v58  ;;  %v2434_v26 = vsub.f32 %v6938_v48, %v7165_v59 }
 0x433   : > { %1481 = vadd.xlane.f32.xlu0 %v1480_v44  ;;  %3118 = vmatpush.msrb.mxu1 %v5482_v51  ;;  %v2436_v59 = vsub.f32 %v6966_v31, %v7207_v11  ;;  %v2438_v31 = vsub.f32 %v6999_v21, %v7240_v54  ;;  %v8820_v21 = vld [vmem:[#allocation12_spill] sm:$0xff] }
 0x434   : > { %v2439_v54 = vsub.f32 %v8820_v21, %v7292_v36 }
 0x435   : > { %2067 = vadd.xlane.f32.xlu1 %v2066_v15  ;;  %3119 = vmatpush.msrb.mxu1 %v5483_v29 }
 0x437   : > { %3120 = vmatpush.msrb.mxu1 %v5492_v30 }
 0x439   : > { %3121 = vmatpush.msrb.mxu1 %v5493_v28 }
 0x43a   : > { %1774 = vadd.xlane.f32.xlu2 %v1773_v9 }
 0x43b   : > { %1484 = vadd.xlane.f32.xlu0 %v1483_v49 }
 0x43d   : > { %2070 = vadd.xlane.f32.xlu1 %v2069_v7 }
 0x442   : > { %1777 = vadd.xlane.f32.xlu2 %v1776_v4 }
 0x443   : > { %1487 = vadd.xlane.f32.xlu0 %v1486_v8 }
 0x445   : > { %2073 = vadd.xlane.f32.xlu1 %v2072_v23 }
 0x44a   : > { %1780 = vadd.xlane.f32.xlu2 %v1779_v27 }
 0x44b   : > { %1490 = vadd.xlane.f32.xlu0 %v1489_v37  ;;  %v2442_v37 = vmul.f32 1.442695, %v2433_v33 }
 0x44d   : > { %1786 = vadd.xlane.f32.xlu1 %v1785_v32 }
 0x452   : > { %1783 = vadd.xlane.f32.xlu2 %v1782_v34 }
 0x453   : > { %1493 = vadd.xlane.f32.xlu0 %v1492_v57  ;;  %v2444_v57 = vmul.f32 1.442695, %v2434_v26 }
 0x455   : > { %1499 = vadd.xlane.f32.xlu1 %v1498_v42 }
 0x45a   : > { %1496 = vadd.xlane.f32.xlu2 %v1495_v55  ;;  %v2435_v55 = vsub.f32 %v6955_v53, %v7191_v35  ;;  %v2437_v53 = vsub.f32 %v6984_v46, %v7225_v50  ;;  %v2452_v50 = vmul.f32 1.442695, %v2438_v31 }
 0x45b   : > { %1191 = vadd.xlane.f32.xlu0 %v1190_v6 }
 0x45d   : > { %2079 = vadd.xlane.f32.xlu1 %v2078_v10 }
 0x460   : > { %v1742_v47 = vpop.xlane.xlu0 %1741 }
 0x461   : > { %v1752_v51 = vsub.f32 %v7284_v22, %v1742_v47  ;;  %v2446_v47 = vmul.f32 1.442695, %v2435_v55  ;;  %v8822_v55 = vld [vmem:[#allocation18_spill] sm:$0xff] }
 0x462   : > { %1194 = vadd.xlane.f32.xlu2 %v1193_v63 }
 0x463   : > { %v1766_v43 = vmul.f32 1.442695, %v1752_v51  ;;  %2076 = vadd.xlane.f32.xlu0 %v2075_v56  ;;  %v2448_v56 = vmul.f32 1.442695, %v2436_v59 }
 0x465   : > { %5586 = vpow2.f32 %v1766_v43  ;;  %v3283_v18 = vpop.xlane.xlu2 %3282 }
 0x466   : > { %v3303_v12 = vsub.f32 %v7288_v14, %v3283_v18 }
 0x468   : > { %v3312_v44 = vmul.f32 1.442695, %v3303_v12  ;;  %v1745_v29 = vpop.xlane.xlu1 %1744  ;;  %v2450_v12 = vmul.f32 1.442695, %v2437_v53 }
 0x469   : > { %v1753_v52 = vsub.f32 %v7298_v40, %v1745_v29  ;;  %v2440_v40 = vmul.f32 1.442695, %v2432_v61 }
 0x46a   : > { %5588 = vpow2.f32 %v3312_v44 }
 0x46b   : > { %v5587_v15 = vpop.eup %5586  ;;  %v1768_v22 = vmul.f32 1.442695, %v1753_v52 }
 0x46c   : > { %5128 = vmatmul.msk.f32.gmra.mxu1 %vm1141_vm2, %v5587_v15  ;;  %v1788_v0 = vsel %vm1141_vm2, %v5587_v15, 0.0  ;;  %v2149_v15 = vpop.f32.mrf.mxu2 }
 0x46d   : > { %5590 = vpow2.f32 %v1768_v22  ;;  %1789 = vadd.xlane.f32.xlu0 %v1788_v0  ;;  %v3286_v30 = vpop.xlane.xlu2 %3285 }
 0x46e   : > { %v3304_v28 = vsub.f32 %v7304_v62, %v3286_v30 }
 0x470   : > { %v7444_v14 = vpop.eup %5588  ;;  %v3314_v9 = vmul.f32 1.442695, %v3304_v28  ;;  %v7446_v49 = vpop.xlane.xlu1 %2992 }
 0x471   : > { %5243 = vmatmul.msk.f32.gmra.mxu2 %vm1141_vm2, %v7444_v14 }
 0x472   : > { %5592 = vpow2.f32 %v3314_v9 }
 0x473   : > { %v7450_v7 = vpop.eup %5590  ;;  %v5496_v4 = vpop.permute.xlu0 %5495  ;;  %5594 = vpow2.f32 %v2440_v40 }
 0x474   : > { %v5497_v8 = vunpack.i.l.bf16 %v5496_v4  ;;  %5129 = vmatmul.msk.f32.gmra.mxu1 %vm1141_vm2, %v7450_v7  ;;  %v5498_v62 = vunpack.i.h.bf16 %v5496_v4  ;;  %5596 = vpow2.f32 %v2442_v37  ;;  %v2454_v4 = vmul.f32 1.442695, %v2439_v54  ;;  %v8821_v37 = vld [vmem:[#allocation19_spill] sm:$0xff]  ;;  %v8825_v54 = vld [vmem:[#allocation2_spill] sm:$0xff] }
 0x475   : > { %v7456_v20 = vpop.xlane.xlu2 %2995  ;;  %5598 = vpow2.f32 %v2444_v57  ;;  %v3012_v26 = vsub.f32 %v8821_v37, %v7424_v5 }
 0x476   : > { %3122 = vmatpush.msrb.mxu1 %v5497_v8  ;;  %5600 = vpow2.f32 %v2446_v47 }
 0x477   : > { %5602 = vpow2.f32 %v2448_v56  ;;  %v3020_v59 = vmul.f32 1.442695, %v3012_v26  ;;  %v3013_v56 = vsub.f32 %v7306_v17, %v7446_v49 }
 0x478   : > { %v7458_v23 = vpop.eup %5592  ;;  %v7460_v27 = vpop.xlane.xlu1 %3001  ;;  %3123 = vmatpush.msrb.mxu1 %v5498_v62 }
 0x479   : > { %5244 = vmatmul.msk.f32.gmra.mxu2 %vm1141_vm2, %v7458_v23  ;;  %v7464_v32 = vpop.eup %5594  ;;  %v1859_v62 = vpop.f32.mrf.mxu1 }
 0x47a   : > { %v7474_v42 = vpop.eup %5596 }
 0x47b   : > { %v7482_v48 = vpop.eup %5598 }
 0x47c   : > { %5170 = vmatmul.msk.f32.vlgmr.msra.gmra.mxu1 %vm1141_vm2, %v7464_v32  ;;  %v7490_v43 = vpop.eup %5600 }
 0x47d   : > { %v7470_v58 = vpop.xlane.xlu2 %2998  ;;  %v7496_v44 = vpop.eup %5602 }
 0x480   : > { %v7472_v34 = vpop.xlane.xlu1 %3004 }
 0x484   : > { %5171 = vmatmul.msk.f32.gmra.mxu1 %vm1141_vm2, %v7474_v42 }
 0x485   : > { %v3292_v6 = vpop.xlane.xlu2 %3291 }
 0x486   : > { %v3306_v30 = vsub.f32 %v7335_v13, %v3292_v6 }
 0x488   : > { %v7480_v10 = vpop.xlane.xlu1 %3007  ;;  %v3318_v9 = vmul.f32 1.442695, %v3306_v30  ;;  %v8824_v30 = vld [vmem:[#allocation9_spill] sm:$0xff] }
 0x489   : > { %v1501_v21 = vsel %vm1141_vm2, %v8824_v30, 0.0 }
 0x48c   : > { %5172 = vmatmul.msk.f32.gmra.mxu1 %vm1141_vm2, %v7482_v48 }
 0x48d   : > { %v3295_v51 = vpop.xlane.xlu2 %3294 }
 0x48e   : > { %v3307_v8 = vsub.f32 %v7348_v19, %v3295_v51 }
 0x490   : > { %v7488_v63 = vpop.xlane.xlu1 %3010  ;;  %v3320_v47 = vmul.f32 1.442695, %v3307_v8 }
 0x494   : > { %5173 = vmatmul.msk.f32.gmra.mxu1 %vm1141_vm2, %v7490_v43 }
 0x495   : > { %v3298_v35 = vpop.xlane.xlu2 %3297 }
 0x496   : > { %v3308_v5 = vsub.f32 %v7361_v45, %v3298_v35  ;;  %v3014_v45 = vsub.f32 %v7316_v25, %v7456_v20 }
 0x498   : > { %v2062_v18 = vpop.xlane.xlu1 %2061  ;;  %v3322_v53 = vmul.f32 1.442695, %v3308_v5  ;;  %v3024_v35 = vmul.f32 1.442695, %v3014_v45 }
 0x499   : > { %5604 = vrcp.f32 %v2062_v18 }
 0x49a   : > { %5606 = vpow2.f32 %v2450_v12  ;;  %v3022_v12 = vmul.f32 1.442695, %v3013_v56 }
 0x49c   : > { %5174 = vmatmul.msk.f32.gmra.mxu1 %vm1141_vm2, %v7496_v44 }
 0x49d   : > { %v3301_v11 = vpop.xlane.xlu2 %3300 }
 0x49e   : > { %v3289_v29 = vpop.xlane.xlu0 %3288 }
 0x49f   : > { %v5605_v52 = vpop.eup %5604  ;;  %v3305_v22 = vsub.f32 %v7376_v38, %v3289_v29  ;;  %v3309_v29 = vsub.f32 %v7372_v24, %v3301_v11  ;;  %v3015_v24 = vsub.f32 %v7326_v2, %v7470_v58 }
 0x4a0   : > { %v2181_v46 = vmul.f32 %v5605_v52, %v2149_v15  ;;  %v7504_v61 = vpop.eup %5606  ;;  %v1791_v15 = vsel %vm1141_vm2, %v7450_v7, 0.0  ;;  %v2065_v7 = vpop.xlane.xlu1 %2064 }
 0x4a1   : > { %v3316_v0 = vmul.f32 1.442695, %v3305_v22  ;;  %v3324_v17 = vmul.f32 1.442695, %v3309_v29  ;;  %v3026_v25 = vmul.f32 1.442695, %v3015_v24 }
 0x4a2   : > { %2261 = vrot.lane.b32.xlu1 %v2181_v46, %s5861_s30  ;;  %v8823_v22 = vld [vmem:[#allocation32_spill] sm:$0xff] }
 0x4a3   : > { %5608 = vpow2.f32 %v3316_v0  ;;  %v3016_v46 = vsub.f32 %v8823_v22, %v7460_v27 }
 0x4a4   : > { %5175 = vmatmul.msk.f32.gmra.mxu1 %vm1141_vm2, %v7504_v61  ;;  %5610 = vpow2.f32 %v2452_v50  ;;  %v3017_v50 = vsub.f32 %v7329_v16, %v7472_v34  ;;  %v3018_v16 = vsub.f32 %v7340_v60, %v7480_v10  ;;  %v3019_v60 = vsub.f32 %v7353_v39, %v7488_v63  ;;  %v8828_v63 = vld [vmem:[#allocation20_spill] sm:$0xff] }
 0x4a5   : > { %v1772_v28 = vpop.xlane.xlu2 %1771  ;;  %v3028_v2 = vmul.f32 1.442695, %v3016_v46 }
 0x4a6   : > { %5612 = vrcp.f32 %v1772_v28  ;;  %v1482_v38 = vpop.xlane.xlu0 %1481  ;;  %v1196_v28 = vsel %vm1141_vm2, %v8825_v54, 0.0  ;;  %v3030_v27 = vmul.f32 1.442695, %v3017_v50 }
 0x4a7   : > { %5614 = vrcp.f32 %v1482_v38 }
 0x4a8   : > { %5616 = vpow2.f32 %v3318_v9 }
 0x4a9   : > { %v7511_v40 = vpop.eup %5608  ;;  %5618 = vpow2.f32 %v2454_v4  ;;  %v8826_v4 = vld [vmem:[#allocation22_spill] sm:$0xff] }
 0x4aa   : > { %5245 = vmatmul.msk.f32.gmra.mxu2 %vm1141_vm2, %v7511_v40  ;;  %v7515_v13 = vpop.eup %5610  ;;  %5620 = vpow2.f32 %v3320_v47  ;;  %v2081_v8 = vsel %vm1141_vm2, %v8826_v4, 0.0  ;;  %v8827_v47 = vld [vmem:[#allocation21_spill] sm:$0xff] }
 0x4ab   : > { %5622 = vpow2.f32 %v3020_v59 }
 0x4ac   : > { %v5613_v33 = vpop.eup %5612  ;;  %5176 = vmatmul.msk.f32.gmra.mxu1 %vm1141_vm2, %v7515_v13  ;;  %5624 = vpow2.f32 %v3322_v53 }
 0x4ad   : > { %v5615_v36 = vpop.eup %5614  ;;  %v1891_v57 = vmul.f32 %v5613_v33, %v1859_v62  ;;  %5626 = vpow2.f32 %v3022_v12  ;;  %v3032_v33 = vmul.f32 1.442695, %v3018_v16  ;;  %v2152_v62 = vpop.f32.mrf.mxu2 }
 0x4ae   : > { %v1601_v6 = vmul.f32 %v5615_v36, %v8822_v55  ;;  %v7525_v19 = vpop.eup %5616  ;;  %5628 = vpow2.f32 %v3324_v17  ;;  %v1485_v0 = vpop.xlane.xlu0 %1484  ;;  %v3034_v55 = vmul.f32 1.442695, %v3019_v60  ;;  %v8831_v60 = vld [vmem:[#allocation24_spill] sm:$0xff] }
 0x4af   : > { %2229 = vrot.lane.b32.xlu0 %v1891_v57, %s5862_s25  ;;  %v7529_v51 = vpop.eup %5618  ;;  %5630 = vpow2.f32 %v3024_v35  ;;  %v1775_v26 = vpop.xlane.xlu2 %1774 }
 0x4b0   : > { %2197 = vrot.lane.b32.xlu2 %v1601_v6, %s5863_s28  ;;  %v7536_v18 = vpop.eup %5620  ;;  %5632 = vpow2.f32 %v3026_v25  ;;  %v7594_v57 = vpop.xlane.xlu1 %2067  ;;  %v3578_v25 = vld [vmem:[%s731_s17 + $0x18] sm:$0xff] }
 0x4b1   : > { %v7540_v31 = vpop.eup %5622  ;;  %5634 = vpow2.f32 %v3028_v2  ;;  %v1862_v12 = vpop.f32.mrf.mxu1  ;;  %3643 = vmatpush.msra.mxu0 %v3578_v25  ;;  %v3576_v2 = vld [vmem:[%s731_s17 + $0x8] sm:$0xff] }
 0x4b2   : > { %5246 = vmatmul.msk.f32.gmra.mxu2 %vm1141_vm2, %v7525_v19  ;;  %v7547_v49 = vpop.eup %5624  ;;  %5636 = vrcp.f32 %v2065_v7  ;;  %v3036_v16 = vsel %vm1141_vm2, %v7540_v31, 0.0 }
 0x4b3   : > { %v7551_v52 = vpop.eup %5626  ;;  %5638 = vpow2.f32 %v3030_v27 }
 0x4b4   : > { %5177 = vmatmul.msk.f32.gmra.mxu1 %vm1141_vm2, %v7529_v51  ;;  %v7557_v11 = vpop.eup %5628 }
 0x4b5   : > { %v7561_v20 = vpop.eup %5630 }
 0x4b6   : > { %v7569_v58 = vpop.eup %5632  ;;  %v1488_v34 = vpop.xlane.xlu0 %1487 }
 0x4b7   : > { %v7579_v38 = vpop.eup %5634  ;;  %5640 = vrcp.f32 %v1488_v34  ;;  %v1778_v39 = vpop.xlane.xlu2 %1777 }
 0x4b8   : > { %v5637_v9 = vpop.eup %5636  ;;  %5642 = vpow2.f32 %v3032_v33  ;;  %v7604_v29 = vpop.xlane.xlu1 %2070 }
 0x4b9   : > { %v7587_v36 = vpop.eup %5638  ;;  %v2182_v37 = vmul.f32 %v5637_v9, %v2152_v62  ;;  %5644 = vrcp.f32 %v1485_v0  ;;  %v3575_v0 = vld [vmem:[%s731_s17] sm:$0xff]  ;;  %v8829_v9 = vld [vmem:[#allocation3_spill] sm:$0xff] }
 0x4ba   : > { %5247 = vmatmul.msk.f32.gmra.mxu2 %vm1141_vm2, %v7536_v18  ;;  %5646 = vrcp.f32 %v1775_v26  ;;  %v1199_v4 = vsel %vm1141_vm2, %v8829_v9, 0.0 }
 0x4bb   : > { %5648 = vpow2.f32 %v3034_v55 }
 0x4bc   : > { %5218 = vmatmul.msk.f32.vlgmr.msrb.gmra.mxu1 %vm1141_vm2, %v7540_v31  ;;  %v2746_v31 = vsel %vm1141_vm2, %v8831_v60, 0.0 }
 0x4bd   : > { %v5641_v10 = vpop.eup %5640 }
 0x4be   : > { %v7596_v6 = vpop.eup %5642  ;;  %v1603_v59 = vmul.f32 %v5641_v10, %v8827_v47  ;;  %v1491_v17 = vpop.xlane.xlu0 %1490  ;;  %v8832_v10 = vld [vmem:[#allocation8_spill] sm:$0xff] }
 0x4bf   : > { %v5645_v5 = vpop.eup %5644  ;;  %v1781_v24 = vpop.xlane.xlu2 %1780 }
 0x4c0   : > { %v1602_v56 = vmul.f32 %v5645_v5, %v8828_v63  ;;  %v5647_v53 = vpop.eup %5646  ;;  %v7615_v22 = vpop.xlane.xlu1 %2073 }
 0x4c1   : > { %v7606_v45 = vpop.eup %5648  ;;  %v1892_v35 = vmul.f32 %v5647_v53, %v1862_v12  ;;  %v3326_v53 = vsel %vm1141_vm2, %v7388_v1, 0.0 }
 0x4c2   : > { %5248 = vmatmul.msk.f32.gmra.mxu2 %vm1141_vm2, %v7547_v49 }
 0x4c4   : > { %5219 = vmatmul.msk.f32.gmra.mxu1 %vm1141_vm2, %v7551_v52 }
 0x4c6   : > { %v7617_v46 = vpop.xlane.xlu0 %1493 }
 0x4c7   : > { %v7619_v50 = vpop.xlane.xlu2 %1783 }
 0x4c8   : > { %v7621_v7 = vpop.xlane.xlu1 %1786 }
 0x4ca   : > { %5249 = vmatmul.msk.f32.gmra.mxu2 %vm1141_vm2, %v7557_v11 }
 0x4cc   : > { %1792 = vadd.xlane.f32.xlu1 %v1791_v15  ;;  %5220 = vmatmul.msk.f32.gmra.mxu1 %vm1141_vm2, %v7561_v20  ;;  %v3577_v15 = vld [vmem:[%s731_s17 + $0x10] sm:$0xff]  ;;  %s748_s17 = scalar_lea.vmem %s8762_s11, %s8856_s22 }
 0x4cd   : > { %3644 = vmatpush.msra.mxu0 %v3577_v15 }
 0x4ce   : > { %v1192_v30 = vpop.xlane.xlu0 %1191 }
 0x4cf   : > { %3645 = vmatpush.msra.mxu0 %v3576_v2  ;;  %5650 = vrcp.f32 %v1192_v30 }
 0x4d0   : > { %v7625_v54 = vpop.xlane.xlu1 %1499  ;;  %5652 = vrcp.f32 %v1778_v39 }
 0x4d1   : > { %3646 = vmatpush.msra.mxu0 %v3575_v0  ;;  %5654 = vrcp.f32 %v1491_v17  ;;  %v8833_v0 = vld [vmem:[#allocation23_spill] sm:$0xff] }
 0x4d2   : > { %5656 = vrcp.f32 %v7594_v57 }
 0x4d3   : > { %5658 = vrcp.f32 %v1781_v24 }
 0x4d4   : > { %5221 = vmatmul.msk.f32.gmra.mxu1 %vm1141_vm2, %v7569_v58 }
 0x4d5   : > { %v5651_v33 = vpop.eup %5650 }
 0x4d6   : > { %v1311_v55 = vmul.f32 %v5651_v33, %v8832_v10  ;;  %v5653_v12 = vpop.eup %5652  ;;  %v8834_v33 = vld [vmem:[#allocation26_spill] sm:$0xff] }
 0x4d7   : > { %v5655_v15 = vpop.eup %5654  ;;  %v2749_v24 = vsel %vm1141_vm2, %v8834_v33, 0.0  ;;  %v8835_v10 = vld [vmem:[#allocation10_spill] sm:$0xff] }
 0x4d8   : > { %v5657_v2 = vpop.eup %5656  ;;  %v1604_v30 = vmul.f32 %v5655_v15, %v8833_v0 }
 0x4d9   : > { %1502 = vadd.xlane.f32.xlu2 %v1501_v21  ;;  %1197 = vadd.xlane.f32.xlu0 %v1196_v28  ;;  %v7623_v21 = vpop.xlane.xlu2 %1496  ;;  %v7627_v28 = vpop.xlane.xlu0 %2076 }
 0x4da   : > { %v5659_v1 = vpop.eup %5658 }
 0x4dc   : > { %5222 = vmatmul.msk.f32.gmra.mxu1 %vm1141_vm2, %v7579_v38 }
 0x4e1   : > { %2082 = vadd.xlane.f32.xlu0 %v2081_v8  ;;  %v1195_v27 = vpop.xlane.xlu2 %1194  ;;  %v7631_v34 = vpop.xlane.xlu0 %1789 }
 0x4e2   : > { %v7635_v8 = vpop.xlane.xlu1 %2079  ;;  %5660 = vrcp.f32 %v1195_v27 }
 0x4e3   : > { %5662 = vrcp.f32 %v7604_v29 }
 0x4e4   : > { %5223 = vmatmul.msk.f32.gmra.mxu1 %vm1141_vm2, %v7587_v36  ;;  %5664 = vrcp.f32 %v7617_v46 }
 0x4e5   : > { %2263 = vrot.lane.b32.xlu1 %v2182_v37, %s5861_s30  ;;  %v8830_v37 = vld [vmem:[#allocation4_spill] sm:$0xff]  ;;  %5666 = vrcp.f32 %v7615_v22  ;;  %v3332_v22 = vsel %vm1141_vm2, %v7458_v23, 0.0 }
 0x4e6   : > { %v1202_v26 = vsel %vm1141_vm2, %v8830_v37, 0.0  ;;  %5668 = vrcp.f32 %v7619_v50  ;;  %v8839_v50 = vld [vmem:[#allocation31_spill] sm:$0xff] }
 0x4e7   : > { %v2755_v33 = vsel %vm1141_vm2, %v8839_v50, 0.0  ;;  %5670 = vrcp.f32 %v7623_v21  ;;  %v8841_v21 = vld [vmem:[#allocation11_spill] sm:$0xff] }
 0x4e8   : > { %5672 = vrcp.f32 %v7621_v7 }
 0x4ec   : > { %5224 = vmatmul.msk.f32.gmra.mxu1 %vm1141_vm2, %v7596_v6 }
 0x4ed   : > { %2201 = vrot.lane.b32.xlu1 %v1603_v59, %s5863_s28 }
 0x4f1   : > { %2199 = vrot.lane.b32.xlu2 %v1602_v56, %s5863_s28 }
 0x4f4   : > { %5225 = vmatmul.msk.f32.gmra.mxu1 %vm1141_vm2, %v7606_v45 }
 0x4f5   : > { %2231 = vrot.lane.b32.xlu0 %v1892_v35, %s5862_s25  ;;  %v1865_v35 = vpop.f32.mrf.mxu1 }
 0x4f6   : > { %v1893_v25 = vmul.f32 %v5653_v12, %v1865_v35 }
 0x4fd   : > { %v1868_v39 = vpop.f32.mrf.mxu1 }
 0x4fe   : > { %v1894_v17 = vmul.f32 %v5659_v1, %v1868_v39 }
 0x50a   : > { %v2198_v62 = vpop.permute.xlu2 %2197 }
 0x50b   : > { %v2285_v47 = vsel %vm1043_vm1, %v1311_v55, %v2198_v62 }
 0x514   : > { %v2262_v5 = vpop.permute.xlu1 %2261 }
 0x517   : > { %3037 = vadd.xlane.f32.xlu1 %v3036_v16  ;;  %v2155_v16 = vpop.f32.mrf.mxu2 }
 0x518   : > { %v2183_v9 = vmul.f32 %v5657_v2, %v2155_v16 }
 0x51a   : > { %1200 = vadd.xlane.f32.xlu2 %v1199_v4 }
 0x51f   : > { %1203 = vadd.xlane.f32.xlu1 %v1202_v26  ;;  %2747 = vadd.xlane.f32.xlu0 %v2746_v31  ;;  %v5661_v26 = vpop.eup %5660  ;;  %v3039_v31 = vsel %vm1141_vm2, %v7551_v52, 0.0  ;;  %v8836_v52 = vld [vmem:[#allocation5_spill] sm:$0xff]  ;;  %v2158_v35 = vpop.f32.mrf.mxu2 }
 0x520   : > { %v1312_v55 = vmul.f32 %v5661_v26, %v8835_v10  ;;  %v5663_v12 = vpop.eup %5662  ;;  %v8840_v26 = vld [vmem:[#allocation27_spill] sm:$0xff] }
 0x521   : > { %v2230_v59 = vpop.permute.xlu0 %2229  ;;  %v2184_v29 = vmul.f32 %v5663_v12, %v2158_v35  ;;  %v5665_v2 = vpop.eup %5664 }
 0x522   : > { %v2294_v63 = vsel %vm2293_vm3, %v2285_v47, %v2230_v59  ;;  %v5667_v46 = vpop.eup %5666 }
 0x523   : > { %v2303_v56 = vsel %vm2302_vm4, %v2294_v63, %v2262_v5  ;;  %v5669_v16 = vpop.eup %5668 }
 0x524   : > { %5250 = vmatmul.msk.f32.vlgmr.msra.gmra.mxu0 %vm808_vm0, %v2303_v56  ;;  %v3329_v56 = vsel %vm1141_vm2, %v7444_v14, 0.0  ;;  %v8838_v14 = vld [vmem:[#allocation25_spill] sm:$0xff] }
 0x525   : > { %v1605_v0 = vmul.f32 %v5665_v2, %v8838_v14 }
 0x527   : > { %3327 = vadd.xlane.f32.xlu0 %v3326_v53  ;;  %v1205_v53 = vsel %vm1141_vm2, %v8836_v52, 0.0  ;;  %v2161_v1 = vpop.f32.mrf.mxu2 }
 0x528   : > { %v2185_v39 = vmul.f32 %v5667_v46, %v2161_v1 }
 0x52f   : > { %v2164_v14 = vpop.f32.mrf.mxu2 }
 0x532   : > { %2233 = vrot.lane.b32.xlu2 %v1893_v25, %s5862_s25  ;;  %v8837_v25 = vld [vmem:[#allocation30_spill] sm:$0xff] }
 0x533   : > { %v2752_v15 = vsel %vm1141_vm2, %v8837_v25, 0.0 }
 0x538   : > { %2203 = vrot.lane.b32.xlu1 %v1604_v30, %s5863_s28  ;;  %v3042_v30 = vsel %vm1141_vm2, %v7561_v20, 0.0 }
 0x53b   : > { %2265 = vrot.lane.b32.xlu0 %v2183_v9, %s5861_s30  ;;  %v1871_v9 = vpop.f32.mrf.mxu1 }
 0x53f   : > { %v7664_v37 = vpop.xlane.xlu1 %1792 }
 0x540   : > { %2235 = vrot.lane.b32.xlu1 %v1894_v17, %s5862_s25  ;;  %v1895_v17 = vmul.f32 %v5669_v16, %v1871_v9  ;;  %v8844_v16 = vld [vmem:[#allocation28_spill] sm:$0xff] }
 0x54c   : > { %v1198_v57 = vpop.xlane.xlu0 %1197  ;;  %v7658_v4 = vpop.xlane.xlu2 %1502 }
 0x54d   : > { %5674 = vrcp.f32 %v1198_v57  ;;  %v3045_v57 = vsel %vm1141_vm2, %v7569_v58, 0.0 }
 0x54e   : > { %5676 = vrcp.f32 %v7627_v28  ;;  %v3335_v28 = vsel %vm1141_vm2, %v7511_v40, 0.0 }
 0x54f   : > { %5678 = vrcp.f32 %v7625_v54 }
 0x554   : > { %v7662_v62 = vpop.xlane.xlu0 %2082  ;;  %v2200_v60 = vpop.permute.xlu2 %2199 }
 0x555   : > { %v2286_v47 = vsel %vm1043_vm1, %v1312_v55, %v2200_v60  ;;  %v1874_v55 = vpop.f32.mrf.mxu1 }
 0x557   : > { %v2264_v5 = vpop.permute.xlu1 %2263 }
 0x55b   : > { %2750 = vadd.xlane.f32.xlu2 %v2749_v24  ;;  %v5671_v24 = vpop.eup %5670 }
 0x55c   : > { %v1606_v60 = vmul.f32 %v5671_v24, %v8840_v26  ;;  %v5673_v10 = vpop.eup %5672 }
 0x565   : > { %3040 = vadd.xlane.f32.xlu0 %v3039_v31 }
 0x567   : > { %v2232_v59 = vpop.permute.xlu0 %2231 }
 0x568   : > { %v2295_v27 = vsel %vm2293_vm3, %v2286_v47, %v2232_v59  ;;  %v5675_v47 = vpop.eup %5674  ;;  %v1896_v59 = vmul.f32 %v5673_v10, %v1874_v55  ;;  %v1877_v10 = vpop.f32.mrf.mxu1 }
 0x569   : > { %v2304_v63 = vsel %vm2302_vm4, %v2295_v27, %v2264_v5  ;;  %v2202_v5 = vpop.permute.xlu1 %2201  ;;  %v1313_v27 = vmul.f32 %v5675_v47, %v8841_v21  ;;  %v5677_v2 = vpop.eup %5676 }
 0x56a   : > { %5251 = vmatmul.msk.f32.gmra.mxu0 %vm808_vm0, %v2304_v63  ;;  %3330 = vadd.xlane.f32.xlu1 %v3329_v56  ;;  %v8842_v56 = vld [vmem:[#allocation6_spill] sm:$0xff]  ;;  %v2186_v58 = vmul.f32 %v5677_v2, %v2164_v14  ;;  %v2167_v2 = vpop.f32.mrf.mxu2 }
 0x56b   : > { %v1208_v7 = vsel %vm1141_vm2, %v8842_v56, 0.0  ;;  %v2287_v52 = vsel %vm1043_vm1, %v1313_v27, %v2202_v5 }
 0x56d   : > { %1206 = vadd.xlane.f32.xlu0 %v1205_v53 }
 0x573   : > { %2267 = vrot.lane.b32.xlu2 %v2184_v29, %s5861_s30  ;;  %v8843_v29 = vld [vmem:[#allocation33_spill] sm:$0xff] }
 0x574   : > { %v2758_v25 = vsel %vm1141_vm2, %v8843_v29, 0.0 }
 0x575   : > { %2753 = vadd.xlane.f32.xlu0 %v2752_v15 }
 0x57b   : > { %2205 = vrot.lane.b32.xlu2 %v1605_v0, %s5863_s28 }
 0x57d   : > { %3043 = vadd.xlane.f32.xlu0 %v3042_v30  ;;  %v5679_v30 = vpop.eup %5678 }
 0x57e   : > { %v1607_v9 = vmul.f32 %v5679_v30, %v8844_v16  ;;  %v8848_v30 = vld [vmem:[#allocation29_spill] sm:$0xff] }
 0x583   : > { %2269 = vrot.lane.b32.xlu1 %v2185_v39, %s5861_s30  ;;  %2237 = vrot.lane.b32.xlu2 %v1895_v17, %s5862_s25  ;;  %v8845_v17 = vld [vmem:[#allocation13_spill] sm:$0xff] }
 0x585   : > { %3333 = vadd.xlane.f32.xlu0 %v3332_v22 }
 0x58a   : > { %v7714_v15 = vpop.xlane.xlu1 %3037 }
 0x58d   : > { %2756 = vadd.xlane.f32.xlu0 %v2755_v33  ;;  %v1201_v31 = vpop.xlane.xlu2 %1200 }
 0x58e   : > { %5680 = vrcp.f32 %v1201_v31 }
 0x58f   : > { %5682 = vrcp.f32 %v7631_v34 }
 0x592   : > { %v7695_v20 = vpop.xlane.xlu0 %2747  ;;  %v1204_v0 = vpop.xlane.xlu1 %1203 }
 0x593   : > { %5684 = vrcp.f32 %v1204_v0 }
 0x594   : > { %v5681_v39 = vpop.eup %5680  ;;  %5686 = vrcp.f32 %v7635_v8  ;;  %v2456_v8 = vsel %vm1141_vm2, %v7464_v32, 0.0 }
 0x595   : > { %v2234_v63 = vpop.permute.xlu2 %2233  ;;  %v1314_v22 = vmul.f32 %v5681_v39, %v8845_v17  ;;  %v5683_v47 = vpop.eup %5682  ;;  %5688 = vrcp.f32 %v7658_v4  ;;  %v3051_v4 = vsel %vm1141_vm2, %v7587_v36, 0.0  ;;  %v8849_v17 = vld [vmem:[#allocation15_spill] sm:$0xff] }
 0x596   : > { %v2296_v53 = vsel %vm2293_vm3, %v2287_v52, %v2234_v63  ;;  %v1897_v21 = vmul.f32 %v5683_v47, %v1877_v10 }
 0x599   : > { %v5685_v63 = vpop.eup %5684 }
 0x59a   : > { %v7700_v23 = vpop.xlane.xlu0 %3327 }
 0x5a1   : > { %2207 = vrot.lane.b32.xlu0 %v1606_v60, %s5863_s28  ;;  %v3048_v60 = vsel %vm1141_vm2, %v7579_v38, 0.0  ;;  %v8847_v38 = vld [vmem:[#allocation14_spill] sm:$0xff] }
 0x5a2   : > { %v1315_v56 = vmul.f32 %v5685_v63, %v8847_v38  ;;  %v3054_v38 = vsel %vm1141_vm2, %v7596_v6, 0.0 }
 0x5a9   : > { %2239 = vrot.lane.b32.xlu0 %v1896_v59, %s5862_s25  ;;  %v8846_v59 = vld [vmem:[#allocation7_spill] sm:$0xff] }
 0x5aa   : > { %v2204_v46 = vpop.permute.xlu1 %2203  ;;  %v1211_v5 = vsel %vm1141_vm2, %v8846_v59, 0.0 }
 0x5ab   : > { %v2288_v54 = vsel %vm1043_vm1, %v1314_v22, %v2204_v46 }
 0x5ac   : > { %1209 = vadd.xlane.f32.xlu2 %v1208_v7 }
 0x5ad   : > { %v2266_v12 = vpop.permute.xlu0 %2265  ;;  %3046 = vadd.xlane.f32.xlu1 %v3045_v57 }
 0x5ae   : > { %v2305_v35 = vsel %vm2302_vm4, %v2296_v53, %v2266_v12 }
 0x5af   : > { %5252 = vmatmul.msk.f32.gmra.mxu0 %vm808_vm0, %v2305_v35  ;;  %v3338_v35 = vsel %vm1141_vm2, %v7525_v19, 0.0 }
 0x5b2   : > { %v2236_v50 = vpop.permute.xlu1 %2235 }
 0x5b3   : > { %v2297_v33 = vsel %vm2293_vm3, %v2288_v54, %v2236_v50 }
 0x5b5   : > { %2759 = vadd.xlane.f32.xlu1 %v2758_v25  ;;  %v5687_v25 = vpop.eup %5686 }
 0x5b6   : > { %v2187_v14 = vmul.f32 %v5687_v25, %v2167_v2 }
 0x5c4   : > { %2271 = vrot.lane.b32.xlu2 %v2186_v58, %s5861_s30  ;;  %v5689_v58 = vpop.eup %5688 }
 0x5c5   : > { %v1608_v46 = vmul.f32 %v5689_v58, %v8848_v30 }
 0x5ce   : > { %v7720_v1 = vpop.xlane.xlu2 %2750  ;;  %2209 = vrot.lane.b32.xlu1 %v1607_v9, %s5863_s28  ;;  %v1880_v9 = vpop.f32.mrf.mxu1 }
 0x5d3   : > { %3336 = vadd.xlane.f32.xlu0 %v3335_v28 }
 0x5d6   : > { %v2268_v24 = vpop.permute.xlu2 %2267 }
 0x5d7   : > { %v2306_v26 = vsel %vm2302_vm4, %v2297_v33, %v2268_v24 }
 0x5d8   : > { %5253 = vmatmul.msk.f32.gmra.mxu0 %vm808_vm0, %v2306_v26  ;;  %v7732_v31 = vpop.xlane.xlu0 %3040  ;;  %v7767_v26 = vpop.f32.mrf.mxu1 }
 0x5db   : > { %3049 = vadd.xlane.f32.xlu0 %v3048_v60  ;;  %v8850_v60 = vld [vmem:[#allocation34_spill] sm:$0xff] }
 0x5dc   : > { %v2761_v36 = vsel %vm1141_vm2, %v8850_v60, 0.0 }
 0x5dd   : > { %v7737_v27 = vpop.xlane.xlu1 %3330 }
 0x5de   : > { %v2206_v40 = vpop.permute.xlu2 %2205 }
 0x5df   : > { %v2289_v34 = vsel %vm1043_vm1, %v1315_v56, %v2206_v40  ;;  %v2170_v40 = vpop.f32.mrf.mxu2 }
 0x5e0   : > { %v1207_v55 = vpop.xlane.xlu0 %1206 }
 0x5e1   : > { %5690 = vrcp.f32 %v1207_v55  ;;  %v7774_v55 = vpop.f32.mrf.mxu1 }
 0x5e2   : > { %5692 = vrcp.f32 %v7664_v37 }
 0x5e3   : > { %5694 = vrcp.f32 %v7662_v62 }
 0x5e4   : > { %5696 = vrcp.f32 %v7695_v20  ;;  %v2459_v20 = vsel %vm1141_vm2, %v7474_v42, 0.0 }
 0x5e6   : > { %v2238_v7 = vpop.permute.xlu2 %2237 }
 0x5e7   : > { %v2298_v57 = vsel %vm2293_vm3, %v2289_v34, %v2238_v7  ;;  %v5691_v28 = vpop.eup %5690  ;;  %v2835_v59 = vpop.f32.mrf.mxu2 }
 0x5e8   : > { %v7742_v52 = vpop.xlane.xlu0 %2753  ;;  %v1316_v22 = vmul.f32 %v5691_v28, %v8849_v17  ;;  %v5693_v10 = vpop.eup %5692 }
 0x5e9   : > { %v1898_v47 = vmul.f32 %v5693_v10, %v1880_v9  ;;  %v5695_v37 = vpop.eup %5694 }
 0x5ea   : > { %v2188_v56 = vmul.f32 %v5695_v37, %v2170_v40 }
 0x5ed   : > { %1212 = vadd.xlane.f32.xlu2 %v1211_v5  ;;  %v3341_v5 = vsel %vm1141_vm2, %v7536_v18, 0.0 }
 0x5ef   : > { %2241 = vrot.lane.b32.xlu0 %v1897_v21, %s5862_s25  ;;  %v7780_v21 = vpop.f32.mrf.mxu1  ;;  %v2838_v63 = vpop.f32.mrf.mxu2 }
 0x5f0   : > { %v7750_v29 = vpop.xlane.xlu0 %3043 }
 0x5f5   : > { %v2270_v53 = vpop.permute.xlu1 %2269 }
 0x5f6   : > { %v2307_v12 = vsel %vm2302_vm4, %v2298_v57, %v2270_v53 }
 0x5f7   : > { %5254 = vmatmul.msk.f32.gmra.mxu0 %vm808_vm0, %v2307_v12  ;;  %v7784_v7 = vpop.f32.mrf.mxu1  ;;  %v7787_v34 = vpop.f32.mrf.mxu2 }
 0x5f8   : > { %3339 = vadd.xlane.f32.xlu1 %v3338_v35  ;;  %v7754_v0 = vpop.xlane.xlu0 %3333  ;;  %v5697_v12 = vpop.eup %5696 }
 0x5f9   : > { %v2867_v35 = vmul.f32 %v5697_v12, %v2835_v59  ;;  %v2767_v12 = vsel %vm1141_vm2, %v7378_v41, 0.0  ;;  %v3057_v41 = vsel %vm1141_vm2, %v7606_v45, 0.0 }
 0x5ff   : > { %v7789_v57 = vpop.f32.mrf.mxu1  ;;  %v7796_v53 = vpop.f32.mrf.mxu2 }
 0x600   : > { %v7758_v19 = vpop.xlane.xlu0 %2756 }
 0x605   : > { %2273 = vrot.lane.b32.xlu2 %v2187_v14, %s5861_s30 }
 0x607   : > { %v7798_v6 = vpop.f32.mrf.mxu1  ;;  %v7800_v25 = vpop.f32.mrf.mxu2 }
 0x60f   : > { %v7812_v28 = vpop.f32.mrf.mxu2 }
 0x611   : > { %2211 = vrot.lane.b32.xlu1 %v1608_v46, %s5863_s28  ;;  %v7809_v46 = vpop.f32.mrf.mxu1 }
 0x613   : > { %v2208_v16 = vpop.permute.xlu0 %2207 }
 0x614   : > { %v2290_v54 = vsel %vm1043_vm1, %v1316_v22, %v2208_v16  ;;  %v8851_v16 = vld [vmem:[#allocation16_spill] sm:$0xff] }
 0x619   : > { %2457 = vadd.xlane.f32.xlu0 %v2456_v8 }
 0x61b   : > { %v2240_v50 = vpop.permute.xlu0 %2239 }
 0x61c   : > { %v2299_v33 = vsel %vm2293_vm3, %v2290_v54, %v2240_v50  ;;  %v7820_v54 = vpop.f32.mrf.mxu1 }
 0x61f   : > { %v1210_v39 = vpop.xlane.xlu2 %1209 }
 0x620   : > { %v7792_v18 = vpop.xlane.xlu1 %3046  ;;  %5698 = vrcp.f32 %v1210_v39  ;;  %v3344_v39 = vsel %vm1141_vm2, %v7547_v49, 0.0 }
 0x621   : > { %3052 = vadd.xlane.f32.xlu0 %v3051_v4  ;;  %5700 = vrcp.f32 %v7714_v15 }
 0x622   : > { %5702 = vrcp.f32 %v7700_v23 }
 0x623   : > { %5704 = vrcp.f32 %v7720_v1 }
 0x626   : > { %v5699_v30 = vpop.eup %5698 }
 0x627   : > { %v2272_v24 = vpop.permute.xlu2 %2271  ;;  %v1317_v9 = vmul.f32 %v5699_v30, %v8851_v16  ;;  %v5701_v49 = vpop.eup %5700  ;;  %v3347_v16 = vsel %vm1141_vm2, %v7557_v11, 0.0 }
 0x628   : > { %v2308_v32 = vsel %vm2302_vm4, %v2299_v33, %v2272_v24  ;;  %v7802_v2 = vpop.xlane.xlu1 %2759  ;;  %v2764_v33 = vsel %vm1141_vm2, %v7364_v3, 0.0  ;;  %v7824_v24 = vpop.f32.mrf.mxu2 }
 0x629   : > { %5255 = vmatmul.msk.f32.gmra.mxu0 %vm808_vm0, %v2308_v32  ;;  %v3125_v32 = vpop.f32.mrf.mxu1  ;;  %v5703_v40 = vpop.eup %5702 }
 0x62a   : > { %v3157_v60 = vmul.f32 %v5701_v49, %v3125_v32  ;;  %v5705_v59 = vpop.eup %5704 }
 0x62b   : > { %v2868_v37 = vmul.f32 %v5705_v59, %v2838_v63 }
 0x62e   : > { %2762 = vadd.xlane.f32.xlu2 %v2761_v36 }
 0x630   : > { %v7827_v36 = vpop.f32.mrf.mxu2 }
 0x635   : > { %2243 = vrot.lane.b32.xlu0 %v1898_v47, %s5862_s25  ;;  %v2462_v47 = vsel %vm1141_vm2, %v7482_v48, 0.0 }
 0x638   : > { %v3415_v10 = vpop.f32.mrf.mxu2 }
 0x639   : > { %v3447_v3 = vmul.f32 %v5703_v40, %v3415_v10 }
 0x63b   : > { %3342 = vadd.xlane.f32.xlu1 %v3341_v5 }
 0x640   : > { %v2210_v8 = vpop.permute.xlu1 %2209 }
 0x641   : > { %v2291_v17 = vsel %vm1043_vm1, %v1317_v9, %v2210_v8 }
 0x643   : > { %3055 = vadd.xlane.f32.xlu1 %v3054_v38 }
 0x646   : > { %2275 = vrot.lane.b32.xlu2 %v2188_v56, %s5861_s30  ;;  %v7794_v62 = vpop.xlane.xlu0 %3336 }
 0x64e   : > { %v7805_v14 = vpop.xlane.xlu0 %3049 }
 0x65c   : > { %3463 = vrot.lane.b32.xlu1 %v2867_v35, %s5863_s28  ;;  %v8852_v35 = vld [vmem:[#allocation17_spill] sm:$0xff] }
 0x65f   : > { %2460 = vadd.xlane.f32.xlu0 %v2459_v20 }
 0x660   : > { %v1213_v58 = vpop.xlane.xlu2 %1212 }
 0x661   : > { %v2242_v4 = vpop.permute.xlu0 %2241  ;;  %5706 = vrcp.f32 %v1213_v58 }
 0x662   : > { %v2300_v22 = vsel %vm2293_vm3, %v2291_v17, %v2242_v4  ;;  %5708 = vrcp.f32 %v7732_v31  ;;  %v3128_v4 = vpop.f32.mrf.mxu1  ;;  %v2465_v31 = vsel %vm1141_vm2, %v7490_v43, 0.0 }
 0x663   : > { %5710 = vrcp.f32 %v7737_v27 }
 0x664   : > { %5712 = vrcp.f32 %v7742_v52 }
 0x665   : > { %5714 = vrcp.f32 %v7750_v29 }
 0x666   : > { %5716 = vrcp.f32 %v7754_v0 }
 0x667   : > { %3345 = vadd.xlane.f32.xlu0 %v3344_v39  ;;  %v5707_v48 = vpop.eup %5706  ;;  %5718 = vrcp.f32 %v7758_v19 }
 0x668   : > { %v2274_v42 = vpop.permute.xlu2 %2273  ;;  %v1318_v1 = vmul.f32 %v5707_v48, %v8852_v35  ;;  %v5709_v9 = vpop.eup %5708  ;;  %5720 = vrcp.f32 %v7792_v18 }
 0x669   : > { %v2309_v50 = vsel %vm2302_vm4, %v2300_v22, %v2274_v42  ;;  %v3158_v39 = vmul.f32 %v5709_v9, %v3128_v4  ;;  %v5711_v17 = vpop.eup %5710  ;;  %v3418_v42 = vpop.f32.mrf.mxu2  ;;  %5722 = vrcp.f32 %v7794_v62 }
 0x66a   : > { %5256 = vmatmul.msk.f32.gmra.mxu0 %vm808_vm0, %v2309_v50  ;;  %v5713_v22 = vpop.eup %5712  ;;  %v3448_v11 = vmul.f32 %v5711_v17, %v3418_v42  ;;  %v3131_v50 = vpop.f32.mrf.mxu1  ;;  %5724 = vrcp.f32 %v7805_v14 }
 0x66b   : > { %v7837_v5 = vpop.xlane.xlu1 %3339  ;;  %v2869_v45 = vmul.f32 %v5713_v22, %v7787_v34  ;;  %v5715_v27 = vpop.eup %5714 }
 0x66c   : > { %v5717_v52 = vpop.eup %5716  ;;  %v3159_v29 = vmul.f32 %v5715_v27, %v3131_v50 }
 0x66d   : > { %v5719_v0 = vpop.eup %5718 }
 0x66e   : > { %v2870_v43 = vmul.f32 %v5719_v0, %v7796_v53 }
 0x66f   : > { %2765 = vadd.xlane.f32.xlu2 %v2764_v33 }
 0x671   : > { %v3421_v33 = vpop.f32.mrf.mxu2 }
 0x672   : > { %v3449_v49 = vmul.f32 %v5717_v52, %v3421_v33  ;;  %v3134_v19 = vpop.f32.mrf.mxu1 }
 0x679   : > { %v3424_v10 = vpop.f32.mrf.mxu2 }
 0x67b   : > { %3495 = vrot.lane.b32.xlu0 %v3157_v60, %s5862_s25  ;;  %v5721_v60 = vpop.eup %5720 }
 0x67c   : > { %v5723_v40 = vpop.eup %5722 }
 0x67d   : > { %v5725_v53 = vpop.eup %5724 }
 0x683   : > { %v2212_v56 = vpop.permute.xlu1 %2211 }
 0x684   : > { %v2292_v20 = vsel %vm1043_vm1, %v1318_v1, %v2212_v56 }
 0x686   : > { %2463 = vadd.xlane.f32.xlu1 %v2462_v47  ;;  %v3160_v47 = vmul.f32 %v5721_v60, %v3134_v19 }
 0x687   : > { %3527 = vrot.lane.b32.xlu2 %v3447_v3, %s5861_s30  ;;  %v3450_v3 = vmul.f32 %v5723_v40, %v3424_v10 }
 0x68c   : > { %v7835_v15 = vpop.xlane.xlu0 %2457 }
 0x68d   : > { %5726 = vrcp.f32 %v7835_v15 }
 0x68e   : > { %5728 = vrcp.f32 %v7837_v5 }
 0x68f   : > { %5730 = vrcp.f32 %v7802_v2 }
 0x693   : > { %v5727_v48 = vpop.eup %5726 }
 0x694   : > { %v7839_v38 = vpop.xlane.xlu0 %3052  ;;  %v2577_v14 = vmul.f32 %v5727_v48, %v7767_v26  ;;  %v5729_v35 = vpop.eup %5728  ;;  %v2471_v26 = vsel %vm1141_vm2, %v7504_v61, 0.0  ;;  %v2474_v61 = vsel %vm1141_vm2, %v7515_v13, 0.0 }
 0x695   : > { %5732 = vrcp.f32 %v7839_v38 }
 0x69f   : > { %3465 = vrot.lane.b32.xlu1 %v2868_v37, %s5863_s28  ;;  %v3137_v37 = vpop.f32.mrf.mxu1 }
 0x6a0   : > { %v3161_v56 = vmul.f32 %v5725_v53, %v3137_v37 }
 0x6a1   : > { %v7842_v23 = vpop.xlane.xlu2 %2762 }
 0x6a2   : > { %5734 = vrcp.f32 %v7842_v23  ;;  %v7900_v23 = vpop.f32.mrf.mxu0 }
 0x6a5   : > { %2768 = vadd.xlane.f32.xlu0 %v2767_v12 }
 0x6a7   : > { %v2244_v58 = vpop.permute.xlu0 %2243  ;;  %v3140_v4 = vpop.f32.mrf.mxu1 }
 0x6a8   : > { %v2301_v30 = vsel %vm2293_vm3, %v2292_v20, %v2244_v58 }
 0x6a9   : > { %v2276_v63 = vpop.permute.xlu2 %2275 }
 0x6aa   : > { %v2310_v8 = vsel %vm2302_vm4, %v2301_v30, %v2276_v63  ;;  %v3427_v30 = vpop.f32.mrf.mxu2 }
 0x6ab   : > { %5257 = vmatmul.msk.f32.gmra.mxu0 %vm808_vm0, %v2310_v8  ;;  %v3451_v5 = vmul.f32 %v5729_v35, %v3427_v30  ;;  %v2468_v8 = vsel %vm1141_vm2, %v7496_v44, 0.0 }
 0x6ad   : > { %3348 = vadd.xlane.f32.xlu0 %v3347_v16  ;;  %v5731_v16 = vpop.eup %5730 }
 0x6ae   : > { %v3343_v34 = vpop.xlane.xlu1 %3342  ;;  %v5733_v9 = vpop.eup %5732 }
 0x6af   : > { %5736 = vrcp.f32 %v3343_v34  ;;  %v3162_v44 = vmul.f32 %v5733_v9, %v3140_v4  ;;  %v5735_v2 = vpop.eup %5734  ;;  %v3143_v50 = vpop.f32.mrf.mxu1 }
 0x6b0   : > { %3058 = vadd.xlane.f32.xlu2 %v3057_v41  ;;  %v2871_v41 = vmul.f32 %v5731_v16, %v7800_v25  ;;  %v2872_v38 = vmul.f32 %v5735_v2, %v7812_v28  ;;  %v5830_v16 = vld [vmem:[%s5978_s19 + $0x8] sm:$0xff] }
 0x6b2   : > { %v3430_v17 = vpop.f32.mrf.mxu2 }
 0x6b6   : > { %v3056_v18 = vpop.xlane.xlu1 %3055 }
 0x6b7   : > { %v3146_v53 = vpop.f32.mrf.mxu1 }
 0x6c1   : > { %3497 = vrot.lane.b32.xlu0 %v3158_v39, %s5862_s25  ;;  %v5737_v39 = vpop.eup %5736 }
 0x6c2   : > { %v3452_v25 = vmul.f32 %v5737_v39, %v3430_v17 }
 0x6c8   : > { %3529 = vrot.lane.b32.xlu2 %v3448_v11, %s5861_s30 }
 0x6c9   : > { %2466 = vadd.xlane.f32.xlu1 %v2465_v31  ;;  %3467 = vrot.lane.b32.xlu0 %v2869_v45, %s5863_s28  ;;  %v3651_v45 = vpop.f32.mrf.mxu0 }
 0x6ce   : > { %v3464_v12 = vpop.permute.xlu1 %3463 }
 0x6cf   : > { %v3551_v1 = vsel %vm1043_vm1, %v2577_v14, %v3464_v12 }
 0x6d0   : > { %3499 = vrot.lane.b32.xlu2 %v3159_v29, %s5862_s25 }
 0x6d1   : > { %3531 = vrot.lane.b32.xlu0 %v3449_v49, %s5861_s30 }
 0x6d2   : > { %v2461_v32 = vpop.xlane.xlu0 %2460 }
 0x6d9   : > { %3469 = vrot.lane.b32.xlu0 %v2870_v43, %s5863_s28 }
 0x6da   : > { %v3346_v59 = vpop.xlane.xlu0 %3345 }
 0x6e1   : > { %3501 = vrot.lane.b32.xlu0 %v3160_v47, %s5862_s25  ;;  %v3433_v47 = vpop.f32.mrf.mxu2 }
 0x6e2   : > { %3533 = vrot.lane.b32.xlu1 %v3450_v3, %s5861_s30  ;;  %v2766_v62 = vpop.xlane.xlu2 %2765 }
 0x6e3   : > { %5738 = vrcp.f32 %v2766_v62 }
 0x6e4   : > { %5740 = vrcp.f32 %v3056_v18 }
 0x6e5   : > { %5742 = vrcp.f32 %v2461_v32 }
 0x6e9   : > { %v5739_v42 = vpop.eup %5738 }
 0x6ea   : > { %3503 = vrot.lane.b32.xlu1 %v3161_v56, %s5862_s25  ;;  %v3528_v20 = vpop.permute.xlu2 %3527  ;;  %v2873_v11 = vmul.f32 %v5739_v42, %v7824_v24  ;;  %v5741_v27 = vpop.eup %5740 }
 0x6eb   : > { %v5743_v52 = vpop.eup %5742  ;;  %v3163_v33 = vmul.f32 %v5741_v27, %v3143_v50  ;;  %v3654_v24 = vpop.f32.mrf.mxu0  ;;  %v5833_v27 = vld [vmem:[%s5978_s19 + $0x20] sm:$0xff] }
 0x6ec   : > { %v2578_v0 = vmul.f32 %v5743_v52, %v7774_v55 }
 0x6ed   : > { %v3496_v15 = vpop.permute.xlu0 %3495 }
 0x6ee   : > { %v3559_v58 = vsel %vm2293_vm3, %v3551_v1, %v3496_v15 }
 0x6ef   : > { %v3567_v63 = vsel %vm2302_vm4, %v3559_v58, %v3528_v20  ;;  %v3436_v58 = vpop.f32.mrf.mxu2 }
 0x6f0   : > { %5258 = vmatmul.msk.f32.gmra.mxu0 %vm808_vm0, %v3567_v63 }
 0x6f2   : > { %3535 = vrot.lane.b32.xlu1 %v3451_v5, %s5861_s30  ;;  %v2477_v5 = vsel %vm1141_vm2, %v7529_v51, 0.0 }
 0x6f3   : > { %v3657_v18 = vpop.f32.mrf.mxu0 }
 0x6f9   : > { %2469 = vadd.xlane.f32.xlu2 %v2468_v8  ;;  %v2464_v13 = vpop.xlane.xlu1 %2463 }
 0x6fb   : > { %v3660_v12 = vpop.f32.mrf.mxu0 }
 0x703   : > { %v3663_v8 = vpop.f32.mrf.mxu0 }
 0x70b   : > { %2472 = vadd.xlane.f32.xlu0 %v2471_v26 }
 0x711   : > { %3471 = vrot.lane.b32.xlu2 %v2871_v41, %s5863_s28  ;;  %v3466_v49 = vpop.permute.xlu1 %3465 }
 0x712   : > { %v3552_v43 = vsel %vm1043_vm1, %v2578_v0, %v3466_v49  ;;  %v5834_v0 = vld [vmem:[%s5978_s19 + $0x38] sm:$0xff] }
 0x718   : > { %v2769_v22 = vpop.xlane.xlu0 %2768 }
 0x719   : > { %3505 = vrot.lane.b32.xlu2 %v3162_v44, %s5862_s25  ;;  %5744 = vrcp.f32 %v2769_v22 }
 0x71a   : > { %5746 = vrcp.f32 %v3346_v59 }
 0x71b   : > { %5748 = vrcp.f32 %v2464_v13 }
 0x71c   : > { %2475 = vadd.xlane.f32.xlu1 %v2474_v61  ;;  %v7937_v61 = vpop.f32.mrf.mxu0 }
 0x71f   : > { %3473 = vrot.lane.b32.xlu0 %v2872_v38, %s5863_s28  ;;  %v5745_v29 = vpop.eup %5744  ;;  %v5831_v38 = vld [vmem:[%s5978_s19 + $0x18] sm:$0xff] }
 0x720   : > { %v3349_v31 = vpop.xlane.xlu0 %3348  ;;  %v2874_v32 = vmul.f32 %v5745_v29, %v7827_v36  ;;  %v5747_v60 = vpop.eup %5746 }
 0x721   : > { %3537 = vrot.lane.b32.xlu2 %v3452_v25, %s5861_s30  ;;  %v3453_v55 = vmul.f32 %v5747_v60, %v3433_v47  ;;  %v5749_v3 = vpop.eup %5748 }
 0x722   : > { %v2579_v59 = vmul.f32 %v5749_v3, %v7780_v21  ;;  %v7924_v21 = vld [vmem:[%s734_s26] ss:$0 sm:$0xff] }
 0x723   : > { %v3059_v28 = vpop.xlane.xlu2 %3058  ;;  %v3652_v63 = vadd.f32 %v7924_v21, %v3651_v45  ;;  %v3658_v4 = vadd.f32 %v7924_v21, %v3657_v18  ;;  %v3664_v29 = vadd.f32 %v7924_v21, %v3663_v8 }
 0x724   : > { %5750 = vrcp.f32 %v3059_v28  ;;  %v5832_v28 = vld [vmem:[%s5978_s19 + $0x10] sm:$0xff] }
 0x725   : > { %5752 = vrcp.f32 %v3349_v31  ;;  %v7931_v41 = vadd.f32 %v5830_v16, %v3652_v63  ;;  %v7941_v17 = vadd.f32 %v5831_v38, %v3658_v4  ;;  %v5864_v4 = vmov 32.0  }
 0x727   : > { %v3715_v44 = vsel %vm808_vm0, %v7931_v41, 0.0  ;;  %v3721_v13 = vsel %vm808_vm0, %v7941_v17, 0.0 }
 0x728   : > { %v3669_v31 = vpop.f32.mrf.mxu0 }
 0x729   : > { %3475 = vrot.lane.b32.xlu2 %v2873_v11, %s5863_s28  ;;  %v3655_v11 = vadd.f32 %v7924_v21, %v3654_v24  ;;  %v3670_v50 = vadd.f32 %v7924_v21, %v3669_v31 }
 0x72a   : > { %v5751_v36 = vpop.eup %5750 }
 0x72b   : > { %v3530_v40 = vpop.permute.xlu2 %3529  ;;  %v3164_v37 = vmul.f32 %v5751_v36, %v3146_v53  ;;  %v5753_v1 = vpop.eup %5752  ;;  %v7951_v45 = vadd.f32 %v5832_v28, %v3655_v11  ;;  %v7963_v24 = vadd.f32 %v5834_v0, %v3670_v50 }
 0x72c   : > { %v3454_v30 = vmul.f32 %v5753_v1, %v3436_v58 }
 0x731   : > { %3507 = vrot.lane.b32.xlu2 %v3163_v33, %s5862_s25  ;;  %v3718_v33 = vsel %vm808_vm0, %v7951_v45, 0.0 }
 0x733   : > { %v3498_v34 = vpop.permute.xlu0 %3497  ;;  %v3500_v56 = vpop.permute.xlu2 %3499 }
 0x734   : > { %v3560_v19 = vsel %vm2293_vm3, %v3552_v43, %v3498_v34  ;;  %v5835_v43 = vld [vmem:[%s5978_s19 + $0x28] sm:$0xff] }
 0x735   : > { %3477 = vrot.lane.b32.xlu1 %v2874_v32, %s5863_s28  ;;  %v3568_v10 = vsel %vm2302_vm4, %v3560_v19, %v3530_v40  ;;  %v7966_v34 = vadd.f32 %v5835_v43, %v3664_v29  ;;  %v3733_v32 = vsel %vm808_vm0, %v7963_v24, 0.0  ;;  %v3649_v40 = vadd.f32 %v7924_v21, %v7900_v23 }
 0x736   : > { %5259 = vmatmul.msk.f32.gmra.mxu0 %vm808_vm0, %v3568_v10  ;;  %v5836_v10 = vld [vmem:[%s5978_s19] sm:$0xff] }
 0x737   : > { %v3727_v60 = vsel %vm808_vm0, %v7966_v34, 0.0  ;;  %v7975_v47 = vadd.f32 %v5836_v10, %v3649_v40  ;;  %v5837_v40 = vld [vmem:[%s5978_s19 + $0x40] sm:$0xff] }
 0x739   : > { %3539 = vrot.lane.b32.xlu2 %v3453_v55, %s5861_s30  ;;  %v3712_v3 = vsel %vm808_vm0, %v7975_v47, 0.0 }
 0x73b   : > { %v3468_v62 = vpop.permute.xlu0 %3467 }
 0x73c   : > { %v3553_v48 = vsel %vm1043_vm1, %v2579_v59, %v3468_v62  ;;  %v2467_v20 = vpop.xlane.xlu1 %2466 }
 0x73d   : > { %v3561_v14 = vsel %vm2293_vm3, %v3553_v48, %v3500_v56  ;;  %5754 = vrcp.f32 %v2467_v20 }
 0x741   : > { %3509 = vrot.lane.b32.xlu2 %v3164_v37, %s5862_s25  ;;  %s756_s25 = scalar_lea.vmem %s8764_s13, %s8856_s22 }
 0x743   : > { %v3532_v35 = vpop.permute.xlu0 %3531  ;;  %v5755_v9 = vpop.eup %5754 }
 0x744   : > { %v3569_v15 = vsel %vm2302_vm4, %v3561_v14, %v3532_v35  ;;  %v2580_v2 = vmul.f32 %v5755_v9, %v7784_v7  ;;  %v3661_v7 = vadd.f32 %v7924_v21, %v3660_v12 }
 0x745   : > { %5260 = vmatmul.msk.f32.gmra.mxu0 %vm808_vm0, %v3569_v15 }
 0x746   : > { %v7954_v52 = vadd.f32 %v5833_v27, %v3661_v7 }
 0x748   : > { %v3724_v49 = vsel %vm808_vm0, %v7954_v52, 0.0 }
 0x749   : > { %2478 = vadd.xlane.f32.xlu0 %v2477_v5  ;;  %3541 = vrot.lane.b32.xlu2 %v3454_v30, %s5861_s30 }
 0x74b   : > { %v3470_v26 = vpop.permute.xlu0 %3469 }
 0x74c   : > { %v3554_v51 = vsel %vm1043_vm1, %v2580_v2, %v3470_v26 }
 0x751   : > { %3716 = vadd.xlane.f32.xlu0 %v3715_v44 }
 0x753   : > { %v3502_v39 = vpop.permute.xlu0 %3501 }
 0x754   : > { %v3562_v25 = vsel %vm2293_vm3, %v3554_v51, %v3502_v39  ;;  %v3534_v22 = vpop.permute.xlu1 %3533 }
 0x755   : > { %v3570_v42 = vsel %vm2302_vm4, %v3562_v25, %v3534_v22 }
 0x756   : > { %5261 = vmatmul.msk.f32.gmra.mxu0 %vm808_vm0, %v3570_v42 }
 0x759   : > { %3722 = vadd.xlane.f32.xlu0 %v3721_v13 }
 0x75c   : > { %v3504_v55 = vpop.permute.xlu1 %3503 }
 0x75f   : > { %3719 = vadd.xlane.f32.xlu1 %v3718_v33 }
 0x761   : > { %3725 = vadd.xlane.f32.xlu0 %v3724_v49 }
 0x764   : > { %v3536_v59 = vpop.permute.xlu1 %3535 }
 0x767   : > { %3734 = vadd.xlane.f32.xlu1 %v3733_v32 }
 0x769   : > { %3728 = vadd.xlane.f32.xlu0 %v3727_v60 }
 0x76c   : > { %v2470_v19 = vpop.xlane.xlu2 %2469 }
 0x76d   : > { %5756 = vrcp.f32 %v2470_v19 }
 0x772   : > { %3713 = vadd.xlane.f32.xlu2 %v3712_v3 }
 0x773   : > { %v5757_v18 = vpop.eup %5756 }
 0x774   : > { %v2581_v62 = vmul.f32 %v5757_v18, %v7789_v57  ;;  %v3472_v36 = vpop.permute.xlu2 %3471 }
 0x776   : > { %v3555_v53 = vsel %vm1043_vm1, %v2581_v62, %v3472_v36 }
 0x777   : > { %v3563_v23 = vsel %vm2293_vm3, %v3555_v53, %v3504_v55 }
 0x778   : > { %v3571_v37 = vsel %vm2302_vm4, %v3563_v23, %v3536_v59  ;;  %v5838_v23 = vld [vmem:[%s5978_s19 + $0x50] sm:$0xff] }
 0x779   : > { %5262 = vmatmul.msk.f32.gmra.mxu0 %vm808_vm0, %v3571_v37 }
 0x77c   : > { %v3506_v48 = vpop.permute.xlu2 %3505 }
 0x77e   : > { %v2473_v56 = vpop.xlane.xlu0 %2472 }
 0x77f   : > { %5758 = vrcp.f32 %v2473_v56 }
 0x784   : > { %v3538_v12 = vpop.permute.xlu2 %3537 }
 0x785   : > { %v5759_v35 = vpop.eup %5758 }
 0x786   : > { %v2582_v57 = vmul.f32 %v5759_v35, %v7798_v6 }
 0x78c   : > { %v3476_v14 = vpop.permute.xlu2 %3475 }
 0x78f   : > { %v2476_v1 = vpop.xlane.xlu1 %2475 }
 0x790   : > { %5760 = vrcp.f32 %v2476_v1 }
 0x791   : > { %v3474_v15 = vpop.permute.xlu0 %3473  ;;  %5762 = vrcp.f32 %v5864_v4  ;;  %v5840_v4 = vld [vmem:[%s5978_s19 + $0x30] sm:$0xff] }
 0x792   : > { %v3556_v20 = vsel %vm1043_vm1, %v2582_v57, %v3474_v15 }
 0x793   : > { %v3564_v58 = vsel %vm2293_vm3, %v3556_v20, %v3506_v48 }
 0x794   : > { %v3508_v30 = vpop.permute.xlu2 %3507  ;;  %v3572_v63 = vsel %vm2302_vm4, %v3564_v58, %v3538_v12 }
 0x795   : > { %5263 = vmatmul.msk.f32.gmra.mxu0 %vm808_vm0, %v3572_v63 }
 0x796   : > { %v5761_v5 = vpop.eup %5760 }
 0x797   : > { %v2583_v8 = vmul.f32 %v5761_v5, %v7809_v46  ;;  %v5763_v44 = vpop.eup %5762  ;;  %v3672_v46 = vpop.f32.mrf.mxu0 }
 0x798   : > { %v3761_v2 = vmul.f32 32.0, %v5763_v44  ;;  %vm3765_vm5 = vweird.f32 %v5763_v44  ;;  %v3673_v43 = vadd.f32 %v7924_v21, %v3672_v46 }
 0x799   : > { %v3557_v26 = vsel %vm1043_vm1, %v2583_v8, %v3476_v14 }
 0x79a   : > { %v3565_v16 = vsel %vm2293_vm3, %v3557_v26, %v3508_v30  ;;  %v3762_v51 = vsub.f32 1.0, %v3761_v2  ;;  %v8011_v19 = vadd.f32 %v5837_v40, %v3673_v43  ;;  %v5843_v43 = vld [vmem:[%s5978_s19 + $0x70] sm:$0xff] }
 0x79c   : > { %v3540_v9 = vpop.permute.xlu2 %3539  ;;  %v3763_v39 = vmul.f32 %v5763_v44, %v3762_v51  ;;  %v3736_v36 = vsel %vm808_vm0, %v8011_v19, 0.0 }
 0x79d   : > { %v3573_v6 = vsel %vm2302_vm4, %v3565_v16, %v3540_v9 }
 0x79e   : > { %5264 = vmatmul.msk.f32.gmra.mxu0 %vm808_vm0, %v3573_v6  ;;  %v3764_v22 = vadd.f32 %v5763_v44, %v3763_v39 }
 0x7a0   : > { %v7994_v42 = vsel %vm3765_vm5, %v5763_v44, %v3764_v22  ;;  %v5841_v22 = vld [vmem:[%s5978_s19 + $0x48] sm:$0xff] }
 0x7a4   : > { %v3510_v25 = vpop.permute.xlu2 %3509 }
 0x7a7   : > { %v3478_v28 = vpop.permute.xlu1 %3477 }
 0x7ac   : > { %v3542_v50 = vpop.permute.xlu2 %3541 }
 0x7b3   : > { %v3675_v49 = vpop.f32.mrf.mxu0 }
 0x7bc   : > { %v2479_v38 = vpop.xlane.xlu0 %2478 }
 0x7bd   : > { %5764 = vrcp.f32 %v2479_v38 }
 0x7c2   : > { %v3678_v55 = vpop.f32.mrf.mxu0 }
 0x7c3   : > { %v5765_v11 = vpop.eup %5764  ;;  %v3679_v62 = vadd.f32 %v7924_v21, %v3678_v55 }
 0x7c4   : > { %v2584_v7 = vmul.f32 %v5765_v11, %v7820_v54  ;;  %v3717_v13 = vpop.xlane.xlu0 %3716 }
 0x7c5   : > { %v3768_v31 = vmul.f32 %v7994_v42, %v3717_v13  ;;  %v8028_v37 = vadd.f32 %v5838_v23, %v3679_v62 }
 0x7c6   : > { %v3558_v27 = vsel %vm1043_vm1, %v2584_v7, %v3478_v28 }
 0x7c7   : > { %v8000_v33 = vsub.f32 %v7931_v41, %v3768_v31  ;;  %v3566_v29 = vsel %vm2293_vm3, %v3558_v27, %v3510_v25  ;;  %v3742_v35 = vsel %vm808_vm0, %v8028_v37, 0.0 }
 0x7c8   : > { %v3574_v0 = vsel %vm2302_vm4, %v3566_v29, %v3542_v50  ;;  %v5842_v50 = vld [vmem:[%s5978_s19 + $0x60] sm:$0xff] }
 0x7c9   : > { %5265 = vmatmul.msk.f32.gmra.mxu0 %vm808_vm0, %v3574_v0  ;;  %v3800_v54 = vmul.f32 %v8000_v33, %v8000_v33 }
 0x7cb   : > { %v3818_v32 = vsel %vm808_vm0, %v3800_v54, 0.0 }
 0x7cc   : > { %3819 = vadd.xlane.f32.xlu2 %v3818_v32  ;;  %v3723_v60 = vpop.xlane.xlu0 %3722 }
 0x7cd   : > { %v3770_v41 = vmul.f32 %v7994_v42, %v3723_v60 }
 0x7cf   : > { %v8014_v10 = vsub.f32 %v7941_v17, %v3770_v41 }
 0x7d1   : > { %v3802_v3 = vmul.f32 %v8014_v10, %v8014_v10 }
 0x7d2   : > { %v3720_v18 = vpop.xlane.xlu1 %3719 }
 0x7d3   : > { %v3824_v53 = vsel %vm808_vm0, %v3802_v3, 0.0  ;;  %v3681_v56 = vpop.f32.mrf.mxu0  ;;  %v3769_v2 = vmul.f32 %v7994_v42, %v3720_v18 }
 0x7d4   : > { %3737 = vadd.xlane.f32.xlu2 %v3736_v36  ;;  %3825 = vadd.xlane.f32.xlu1 %v3824_v53  ;;  %v3726_v59 = vpop.xlane.xlu0 %3725  ;;  %v3682_v14 = vadd.f32 %v7924_v21, %v3681_v56 }
 0x7d5   : > { %v3771_v17 = vmul.f32 %v7994_v42, %v3726_v59 }
 0x7d7   : > { %v8031_v48 = vsub.f32 %v7954_v52, %v3771_v17  ;;  %v5839_v52 = vld [vmem:[%s5978_s19 + $0x58] sm:$0xff] }
 0x7d8   : > { %v8044_v15 = vadd.f32 %v5839_v52, %v3682_v14 }
 0x7d9   : > { %v3803_v12 = vmul.f32 %v8031_v48, %v8031_v48 }
 0x7da   : > { %v3735_v57 = vpop.xlane.xlu1 %3734  ;;  %v3745_v30 = vsel %vm808_vm0, %v8044_v15, 0.0 }
 0x7db   : > { %v3827_v1 = vsel %vm808_vm0, %v3803_v12, 0.0  ;;  %v3774_v20 = vmul.f32 %v7994_v42, %v3735_v57  ;;  %v4114_v12 = vld [vmem:[%s745_s27 + $0x18] sm:$0xff] }
 0x7dc   : > { %3743 = vadd.xlane.f32.xlu1 %v3742_v35  ;;  %3828 = vadd.xlane.f32.xlu2 %v3827_v1  ;;  %v3729_v25 = vpop.xlane.xlu0 %3728  ;;  %v4113_v35 = vld [vmem:[%s745_s27 + $0x10] sm:$0xff]  ;;  %v4111_v1 = vld [vmem:[%s745_s27] sm:$0xff] }
 0x7dd   : > { %v8048_v58 = vsub.f32 %v7963_v24, %v3774_v20  ;;  %v3667_v24 = vadd.f32 %v7924_v21, %v7937_v61  ;;  %v3676_v61 = vadd.f32 %v7924_v21, %v3675_v49  ;;  %4179 = vmatpush.msra.mxu1 %v4114_v12  ;;  %5316 = vmatpush.msra.mxu3 %v4114_v12  ;;  %v8177_v12 = vld [vmem:[%s740_s18] ss:$0 sm:$0xff]  ;;  %s759_s18 = scalar_lea.vmem %s8765_s14, %s8856_s22 }
 0x7df   : > { %v3806_v8 = vmul.f32 %v8048_v58, %v8048_v58  ;;  %v8065_v44 = vadd.f32 %v5840_v4, %v3667_v24  ;;  %v8078_v46 = vadd.f32 %v5841_v22, %v3676_v61  ;;  %4180 = vmatpush.msra.mxu1 %v4113_v35  ;;  %5317 = vmatpush.msra.mxu3 %v4113_v35  ;;  %v5845_v35 = vld [vmem:[%s5978_s19 + $0x78] sm:$0xff] }
 0x7e1   : > { %v3836_v9 = vsel %vm808_vm0, %v3806_v8, 0.0  ;;  %v3730_v51 = vsel %vm808_vm0, %v8065_v44, 0.0  ;;  %v3739_v7 = vsel %vm808_vm0, %v8078_v46, 0.0 }
 0x7e4   : > { %3746 = vadd.xlane.f32.xlu2 %v3745_v30 }
 0x7e5   : > { %v3714_v63 = vpop.xlane.xlu2 %3713 }
 0x7e6   : > { %v3767_v5 = vmul.f32 %v7994_v42, %v3714_v63 }
 0x7e8   : > { %v8056_v26 = vsub.f32 %v7975_v47, %v3767_v5  ;;  %v8069_v47 = vsub.f32 %v7951_v45, %v3769_v2  ;;  %v3772_v45 = vmul.f32 %v7994_v42, %v3729_v25 }
 0x7ea   : > { %v3799_v16 = vmul.f32 %v8056_v26, %v8056_v26  ;;  %v3801_v39 = vmul.f32 %v8069_v47, %v8069_v47  ;;  %v8082_v11 = vsub.f32 %v7966_v34, %v3772_v45 }
 0x7ec   : > { %3837 = vadd.xlane.f32.xlu2 %v3836_v9  ;;  %v3815_v6 = vsel %vm808_vm0, %v3799_v16, 0.0  ;;  %v3821_v38 = vsel %vm808_vm0, %v3801_v39, 0.0  ;;  %v3804_v13 = vmul.f32 %v8082_v11, %v8082_v11 }
 0x7ed   : > { %3816 = vadd.xlane.f32.xlu0 %v3815_v6 }
 0x7ee   : > { %v3830_v27 = vsel %vm808_vm0, %v3804_v13, 0.0 }
 0x7f5   : > { %3731 = vadd.xlane.f32.xlu0 %v3730_v51 }
 0x7f6   : > { %v3684_v28 = vpop.f32.mrf.mxu0 }
 0x7f7   : > { %v3685_v31 = vadd.f32 %v7924_v21, %v3684_v28 }
 0x7f9   : > { %v8091_v29 = vadd.f32 %v5842_v50, %v3685_v31 }
 0x7fb   : > { %v3748_v34 = vsel %vm808_vm0, %v8091_v29, 0.0 }
 0x7fd   : > { %3822 = vadd.xlane.f32.xlu0 %v3821_v38 }
 0x805   : > { %3740 = vadd.xlane.f32.xlu0 %v3739_v7 }
 0x80d   : > { %3831 = vadd.xlane.f32.xlu0 %v3830_v27 }
 0x812   : > { %v3687_v49 = vpop.f32.mrf.mxu0 }
 0x813   : > { %v3688_v22 = vadd.f32 %v7924_v21, %v3687_v49 }
 0x815   : > { %3749 = vadd.xlane.f32.xlu0 %v3748_v34  ;;  %v5844_v34 = vld [vmem:[%s5978_s19 + $0x68] sm:$0xff]  ;;  %s5306_s19 = sshll.u32 %s8856_s22, 6 }
 0x816   : > { %s753_s26 = scalar_lea.vmem %s8763_s12, %s5306_s19 }
 0x81b   : > { %v3690_v0 = vpop.f32.mrf.mxu0 }
 0x81c   : > { %v3691_v54 = vadd.f32 %v7924_v21, %v3690_v0  ;;  %v8144_v0 = vadd.f32 %v5844_v34, %v3688_v22 }
 0x81e   : > { %v8097_v32 = vadd.f32 %v5843_v43, %v3691_v54 }
 0x820   : > { %v3754_v60 = vsel %vm808_vm0, %v8097_v32, 0.0 }
 0x821   : > { %3755 = vadd.xlane.f32.xlu0 %v3754_v60 }
 0x83f   : > { %v3820_v41 = vpop.xlane.xlu2 %3819 }
 0x840   : > { %v3864_v23 = vmul.f32 %v3820_v41, %v7994_v42 }
 0x842   : > { %v3880_v14 = vadd.f32 1e-05, %v3864_v23 }
 0x844   : > { %5766 = vrsqrt.f32 %v3880_v14  ;;  %vm3911_vm10 = vweird.f32 %v3880_v14 }
 0x846   : > { %v3693_v49 = vpop.f32.mrf.mxu0 }
 0x847   : > { %v3738_v40 = vpop.xlane.xlu2 %3737  ;;  %v3826_v55 = vpop.xlane.xlu1 %3825 }
 0x848   : > { %v3775_v3 = vmul.f32 %v7994_v42, %v3738_v40  ;;  %v3866_v30 = vmul.f32 %v3826_v55, %v7994_v42  ;;  %v3694_v40 = vadd.f32 %v7924_v21, %v3693_v49 }
 0x84a   : > { %v8103_v18 = vsub.f32 %v8011_v19, %v3775_v3  ;;  %v8120_v52 = vpop.eup %5766  ;;  %v8125_v8 = vadd.f32 1e-05, %v3866_v30 }
 0x84b   : > { %v3906_v5 = vmul.f32 %v8120_v52, %v3880_v14  ;;  %vm3912_vm7 = vweird.f32 %v8120_v52 }
 0x84c   : > { %v3807_v62 = vmul.f32 %v8103_v18, %v8103_v18  ;;  %vm8152_vm11 = vmor %vm3911_vm10, %vm3912_vm7  ;;  %vm3931_vm1 = vweird.f32 %v8125_v8 }
 0x84d   : > { %v3907_v16 = vmul.f32 %v8120_v52, %v3906_v5 }
 0x84e   : > { %v3839_v36 = vsel %vm808_vm0, %v3807_v62, 0.0  ;;  %v8161_v62 = vld [vmem:[%s737_s29] ss:$0 sm:$0xff] }
 0x84f   : > { %v3744_v53 = vpop.xlane.xlu1 %3743  ;;  %3840 = vadd.xlane.f32.xlu2 %v3839_v36  ;;  %v3829_v9 = vpop.xlane.xlu2 %3828  ;;  %v3908_v39 = vmul.f32 0.5, %v3907_v16 }
 0x850   : > { %v3777_v59 = vmul.f32 %v7994_v42, %v3744_v53  ;;  %v3867_v2 = vmul.f32 %v3829_v9, %v7994_v42  ;;  %v3751_v53 = vsel %vm808_vm0, %v8144_v0, 0.0 }
 0x851   : > { %v3909_v13 = vsub.f32 1.5, %v3908_v39 }
 0x852   : > { %v8110_v17 = vsub.f32 %v8028_v37, %v3777_v59  ;;  %v4112_v37 = vld [vmem:[%s745_s27 + $0x8] sm:$0xff]  ;;  %v8137_v45 = vadd.f32 1e-05, %v3867_v2  ;;  %s762_s27 = scalar_lea.vmem %s8766_s15, %s8856_s22 }
 0x853   : > { %4181 = vmatpush.msra.mxu1 %v4112_v37  ;;  %5318 = vmatpush.msra.mxu3 %v4112_v37  ;;  %v3910_v43 = vmul.f32 %v8120_v52, %v3909_v13  ;;  %v8186_v37 = vadd.f32 %v5845_v35, %v3694_v40 }
 0x854   : > { %v3809_v19 = vmul.f32 %v8110_v17, %v8110_v17  ;;  %vm3941_vm5 = vweird.f32 %v8137_v45 }
 0x855   : > { %4182 = vmatpush.msra.mxu1 %v4111_v1  ;;  %5319 = vmatpush.msra.mxu3 %v4111_v1  ;;  %v3914_v21 = vsel %vm8152_vm11, %v8120_v52, %v3910_v43 }
 0x856   : > { %v3845_v56 = vsel %vm808_vm0, %v3809_v19, 0.0 }
 0x857   : > { %3846 = vadd.xlane.f32.xlu2 %v3845_v56  ;;  %v3747_v23 = vpop.xlane.xlu2 %3746 }
 0x858   : > { %v3778_v52 = vmul.f32 %v7994_v42, %v3747_v23 }
 0x860   : > { %v3817_v57 = vpop.xlane.xlu0 %3816 }
 0x861   : > { %v3863_v20 = vmul.f32 %v3817_v57, %v7994_v42  ;;  %v4056_v57 = vmul.f32 %v3914_v21, %v8000_v33 }
 0x863   : > { %v3879_v63 = vadd.f32 1e-05, %v3863_v20 }
 0x865   : > { %5768 = vrsqrt.f32 %v3879_v63  ;;  %vm3901_vm8 = vweird.f32 %v3879_v63 }
 0x866   : > { %5770 = vrsqrt.f32 %v8125_v8 }
 0x867   : > { %5772 = vrsqrt.f32 %v8137_v45 }
 0x868   : > { %v3732_v24 = vpop.xlane.xlu0 %3731 }
 0x869   : > { %v3773_v6 = vmul.f32 %v7994_v42, %v3732_v24  ;;  %v8203_v24 = vsub.f32 %v8044_v15, %v3778_v52 }
 0x86b   : > { %v5769_v4 = vpop.eup %5768  ;;  %v8132_v51 = vsub.f32 %v8065_v44, %v3773_v6  ;;  %v3757_v6 = vsel %vm808_vm0, %v8186_v37, 0.0  ;;  %v3810_v13 = vmul.f32 %v8203_v24, %v8203_v24 }
 0x86c   : > { %v3896_v61 = vmul.f32 %v5769_v4, %v3879_v63  ;;  %v8140_v27 = vpop.eup %5770  ;;  %vm3902_vm6 = vweird.f32 %v5769_v4 }
 0x86d   : > { %v3805_v38 = vmul.f32 %v8132_v51, %v8132_v51  ;;  %v3926_v60 = vmul.f32 %v8140_v27, %v8125_v8  ;;  %vm3903_vm9 = vmor %vm3901_vm8, %vm3902_vm6  ;;  %v8170_v56 = vpop.eup %5772  ;;  %vm3932_vm13 = vweird.f32 %v8140_v27  ;;  %v3848_v49 = vsel %vm808_vm0, %v3810_v13, 0.0 }
 0x86e   : > { %v3897_v25 = vmul.f32 %v5769_v4, %v3896_v61  ;;  %v3936_v5 = vmul.f32 %v8170_v56, %v8137_v45  ;;  %vm3933_vm3 = vmor %vm3931_vm1, %vm3932_vm13  ;;  %vm3942_vm4 = vweird.f32 %v8170_v56 }
 0x86f   : > { %v3833_v7 = vsel %vm808_vm0, %v3805_v38, 0.0  ;;  %v3927_v59 = vmul.f32 %v8140_v27, %v3926_v60  ;;  %vm3943_vm6 = vmor %vm3941_vm5, %vm3942_vm4 }
 0x870   : > { %v3898_v28 = vmul.f32 0.5, %v3897_v25  ;;  %3834 = vadd.xlane.f32.xlu1 %v3833_v7  ;;  %v3823_v31 = vpop.xlane.xlu0 %3822  ;;  %v3937_v39 = vmul.f32 %v8170_v56, %v3936_v5 }
 0x871   : > { %v3865_v44 = vmul.f32 %v3823_v31, %v7994_v42  ;;  %v3928_v63 = vmul.f32 0.5, %v3927_v59 }
 0x872   : > { %v3899_v50 = vsub.f32 1.5, %v3898_v28  ;;  %v3938_v31 = vmul.f32 0.5, %v3937_v39 }
 0x873   : > { %v3881_v54 = vadd.f32 1e-05, %v3865_v44  ;;  %v3929_v2 = vsub.f32 1.5, %v3928_v63 }
 0x874   : > { %v3900_v41 = vmul.f32 %v5769_v4, %v3899_v50  ;;  %v3939_v60 = vsub.f32 1.5, %v3938_v31 }
 0x875   : > { %5774 = vrsqrt.f32 %v3881_v54  ;;  %v3930_v28 = vmul.f32 %v8140_v27, %v3929_v2  ;;  %vm3921_vm14 = vweird.f32 %v3881_v54 }
 0x876   : > { %v3904_v55 = vsel %vm3903_vm9, %v5769_v4, %v3900_v41  ;;  %v4076_v4 = vmul.f32 %v8161_v62, %v4056_v57 }
 0x877   : > { %v4055_v36 = vmul.f32 %v3904_v55, %v8056_v26  ;;  %v3934_v43 = vsel %vm3933_vm3, %v8140_v27, %v3930_v28 }
 0x878   : > { %3752 = vadd.xlane.f32.xlu1 %v3751_v53  ;;  %v3741_v19 = vpop.xlane.xlu0 %3740  ;;  %v8213_v7 = vadd.f32 %v8177_v12, %v4076_v4  ;;  %v4058_v3 = vmul.f32 %v3934_v43, %v8014_v10 }
 0x879   : > { %v4075_v26 = vmul.f32 %v8161_v62, %v4055_v36  ;;  %v3776_v14 = vmul.f32 %v7994_v42, %v3741_v19 }
 0x87a   : > { %v4078_v21 = vmul.f32 %v8161_v62, %v4058_v3 }
 0x87b   : > { %v5775_v1 = vpop.eup %5774  ;;  %v8191_v20 = vadd.f32 %v8177_v12, %v4075_v26  ;;  %v8194_v30 = vsub.f32 %v8078_v46, %v3776_v14 }
 0x87c   : > { %v3916_v16 = vmul.f32 %v5775_v1, %v3881_v54  ;;  %vm3922_vm12 = vweird.f32 %v5775_v1  ;;  %v8245_v14 = vadd.f32 %v8177_v12, %v4078_v21 }
 0x87d   : > { %5266 = vmatmul.msk.f32.vlgmr.msra.gmra.mxu1 %vm808_vm0, %v8191_v20  ;;  %v3808_v9 = vmul.f32 %v8194_v30, %v8194_v30  ;;  %vm3923_vm15 = vmor %vm3921_vm14, %vm3922_vm12 }
 0x87e   : > { %v3917_v33 = vmul.f32 %v5775_v1, %v3916_v16 }
 0x87f   : > { %v3842_v46 = vsel %vm808_vm0, %v3808_v9, 0.0 }
 0x880   : > { %v3918_v61 = vmul.f32 0.5, %v3917_v33  ;;  %3758 = vadd.xlane.f32.xlu1 %v3757_v6  ;;  %3843 = vadd.xlane.f32.xlu0 %v3842_v46  ;;  %v3832_v38 = vpop.xlane.xlu0 %3831  ;;  %v3838_v33 = vpop.xlane.xlu2 %3837 }
 0x881   : > { %v3868_v25 = vmul.f32 %v3832_v38, %v7994_v42 }
 0x882   : > { %v3919_v22 = vsub.f32 1.5, %v3918_v61 }
 0x883   : > { %v3884_v15 = vadd.f32 1e-05, %v3868_v25 }
 0x884   : > { %v3920_v44 = vmul.f32 %v5775_v1, %v3919_v22 }
 0x885   : > { %5776 = vrsqrt.f32 %v3884_v15  ;;  %5267 = vmatmul.msk.f32.gmra.mxu1 %vm808_vm0, %v8213_v7  ;;  %vm3951_vm8 = vweird.f32 %v3884_v15 }
 0x886   : > { %v3924_v50 = vsel %vm3923_vm15, %v5775_v1, %v3920_v44 }
 0x887   : > { %v4057_v34 = vmul.f32 %v3924_v50, %v8069_v47  ;;  %v3940_v47 = vmul.f32 %v8170_v56, %v3939_v60 }
 0x888   : > { %3849 = vadd.xlane.f32.xlu1 %v3848_v49  ;;  %v3750_v41 = vpop.xlane.xlu0 %3749 }
 0x889   : > { %v3779_v54 = vmul.f32 %v7994_v42, %v3750_v41  ;;  %v4077_v40 = vmul.f32 %v8161_v62, %v4057_v34  ;;  %v3944_v59 = vsel %vm3943_vm6, %v8170_v56, %v3940_v47 }
 0x88a   : > { %v4059_v26 = vmul.f32 %v3944_v59, %v8031_v48 }
 0x88b   : > { %v5777_v55 = vpop.eup %5776  ;;  %v8228_v8 = vsub.f32 %v8091_v29, %v3779_v54  ;;  %v8231_v36 = vadd.f32 %v8177_v12, %v4077_v40 }
 0x88c   : > { %v3946_v27 = vmul.f32 %v5777_v55, %v3884_v15  ;;  %vm3952_vm7 = vweird.f32 %v5777_v55  ;;  %v4079_v57 = vmul.f32 %v8161_v62, %v4059_v26 }
 0x88d   : > { %5268 = vmatmul.msk.f32.gmra.mxu1 %vm808_vm0, %v8231_v36  ;;  %v3811_v53 = vmul.f32 %v8228_v8, %v8228_v8  ;;  %vm3953_vm9 = vmor %vm3951_vm8, %vm3952_vm7 }
 0x88e   : > { %v3947_v10 = vmul.f32 %v5777_v55, %v3946_v27  ;;  %v8259_v16 = vadd.f32 %v8177_v12, %v4079_v57 }
 0x88f   : > { %v3851_v29 = vsel %vm808_vm0, %v3811_v53, 0.0 }
 0x890   : > { %v3948_v23 = vmul.f32 0.5, %v3947_v10  ;;  %3852 = vadd.xlane.f32.xlu0 %v3851_v29 }
 0x892   : > { %v3949_v19 = vsub.f32 1.5, %v3948_v23 }
 0x894   : > { %v3950_v35 = vmul.f32 %v5777_v55, %v3949_v19  ;;  %v3756_v1 = vpop.xlane.xlu0 %3755 }
 0x895   : > { %v3781_v45 = vmul.f32 %v7994_v42, %v3756_v1  ;;  %5269 = vmatmul.msk.f32.gmra.mxu1 %vm808_vm0, %v8245_v14 }
 0x896   : > { %v3954_v52 = vsel %vm3953_vm9, %v5777_v55, %v3950_v35 }
 0x897   : > { %v8251_v56 = vsub.f32 %v8097_v32, %v3781_v45  ;;  %v4060_v63 = vmul.f32 %v3954_v52, %v8082_v11  ;;  %v3870_v11 = vmul.f32 %v3838_v33, %v7994_v42 }
 0x899   : > { %v3813_v48 = vmul.f32 %v8251_v56, %v8251_v56  ;;  %v4080_v32 = vmul.f32 %v8161_v62, %v4060_v63  ;;  %v3886_v6 = vadd.f32 1e-05, %v3870_v11 }
 0x89b   : > { %v3857_v5 = vsel %vm808_vm0, %v3813_v48, 0.0  ;;  %v8265_v9 = vadd.f32 %v8177_v12, %v4080_v32  ;;  %5778 = vrsqrt.f32 %v3886_v6  ;;  %vm3971_vm14 = vweird.f32 %v3886_v6 }
 0x89c   : > { %3858 = vadd.xlane.f32.xlu1 %v3857_v5 }
 0x89d   : > { %5270 = vmatmul.msk.f32.gmra.mxu1 %vm808_vm0, %v8259_v16 }
 0x8a1   : > { %v5779_v61 = vpop.eup %5778 }
 0x8a2   : > { %v3966_v22 = vmul.f32 %v5779_v61, %v3886_v6  ;;  %vm3972_vm11 = vweird.f32 %v5779_v61 }
 0x8a3   : > { %vm3973_vm15 = vmor %vm3971_vm14, %vm3972_vm11 }
 0x8a4   : > { %v3967_v15 = vmul.f32 %v5779_v61, %v3966_v22 }
 0x8a5   : > { %5271 = vmatmul.msk.f32.gmra.mxu1 %vm808_vm0, %v8265_v9 }
 0x8a6   : > { %v3968_v43 = vmul.f32 0.5, %v3967_v15 }
 0x8a8   : > { %v3969_v47 = vsub.f32 1.5, %v3968_v43 }
 0x8aa   : > { %v3970_v26 = vmul.f32 %v5779_v61, %v3969_v47 }
 0x8ac   : > { %v3974_v63 = vsel %vm3973_vm15, %v5779_v61, %v3970_v26 }
 0x8c2   : > { %v3841_v46 = vpop.xlane.xlu2 %3840 }
 0x8c3   : > { %v3871_v4 = vmul.f32 %v3841_v46, %v7994_v42 }
 0x8c5   : > { %v8271_v2 = vadd.f32 1e-05, %v3871_v4  ;;  %v4062_v4 = vmul.f32 %v3974_v63, %v8048_v58 }
 0x8c7   : > { %5780 = vrsqrt.f32 %v8271_v2  ;;  %vm3981_vm3 = vweird.f32 %v8271_v2  ;;  %v4082_v58 = vmul.f32 %v8161_v62, %v4062_v4 }
 0x8ca   : > { %v3847_v13 = vpop.xlane.xlu2 %3846 }
 0x8cb   : > { %v3873_v34 = vmul.f32 %v3847_v13, %v7994_v42 }
 0x8cd   : > { %v8275_v31 = vpop.eup %5780  ;;  %v8286_v55 = vadd.f32 1e-05, %v3873_v34 }
 0x8ce   : > { %v3976_v60 = vmul.f32 %v8275_v31, %v8271_v2  ;;  %vm3982_vm1 = vweird.f32 %v8275_v31 }
 0x8cf   : > { %vm3983_vm4 = vmor %vm3981_vm3, %vm3982_vm1  ;;  %vm4001_vm9 = vweird.f32 %v8286_v55 }
 0x8d0   : > { %v3977_v27 = vmul.f32 %v8275_v31, %v3976_v60 }
 0x8d2   : > { %v3978_v35 = vmul.f32 0.5, %v3977_v27 }
 0x8e3   : > { %v3835_v39 = vpop.xlane.xlu1 %3834 }
 0x8e4   : > { %v3869_v38 = vmul.f32 %v3835_v39, %v7994_v42 }
 0x8e6   : > { %v3885_v25 = vadd.f32 1e-05, %v3869_v38 }
 0x8e8   : > { %5782 = vrsqrt.f32 %v3885_v25  ;;  %vm3961_vm12 = vweird.f32 %v3885_v25 }
 0x8e9   : > { %5784 = vrsqrt.f32 %v8286_v55 }
 0x8eb   : > { %v3753_v28 = vpop.xlane.xlu1 %3752 }
 0x8ec   : > { %v3780_v44 = vmul.f32 %v7994_v42, %v3753_v28 }
 0x8ee   : > { %v5783_v50 = vpop.eup %5782  ;;  %v8280_v49 = vsub.f32 %v8144_v0, %v3780_v44 }
 0x8ef   : > { %v3956_v41 = vmul.f32 %v5783_v50, %v3885_v25  ;;  %vm3962_vm10 = vweird.f32 %v5783_v50  ;;  %v5785_v32 = vpop.eup %5784 }
 0x8f0   : > { %v3812_v54 = vmul.f32 %v8280_v49, %v8280_v49  ;;  %vm3963_vm13 = vmor %vm3961_vm12, %vm3962_vm10  ;;  %v3996_v61 = vmul.f32 %v5785_v32, %v8286_v55  ;;  %vm4002_vm8 = vweird.f32 %v5785_v32 }
 0x8f1   : > { %v3957_v40 = vmul.f32 %v5783_v50, %v3956_v41  ;;  %v8317_v41 = vadd.f32 %v8177_v12, %v4082_v58  ;;  %vm4003_vm10 = vmor %vm4001_vm9, %vm4002_vm8 }
 0x8f2   : > { %v3854_v3 = vsel %vm808_vm0, %v3812_v54, 0.0  ;;  %v3997_v15 = vmul.f32 %v5785_v32, %v3996_v61 }
 0x8f3   : > { %v3958_v53 = vmul.f32 0.5, %v3957_v40  ;;  %3855 = vadd.xlane.f32.xlu2 %v3854_v3  ;;  %v3759_v0 = vpop.xlane.xlu1 %3758  ;;  %v3844_v10 = vpop.xlane.xlu0 %3843 }
 0x8f4   : > { %v3782_v29 = vmul.f32 %v7994_v42, %v3759_v0  ;;  %v3872_v21 = vmul.f32 %v3844_v10, %v7994_v42  ;;  %v3998_v2 = vmul.f32 0.5, %v3997_v15 }
 0x8f5   : > { %v3959_v59 = vsub.f32 1.5, %v3958_v53 }
 0x8f6   : > { %v8294_v23 = vsub.f32 %v8186_v37, %v3782_v29  ;;  %v3888_v19 = vadd.f32 1e-05, %v3872_v21  ;;  %v3979_v37 = vsub.f32 1.5, %v3978_v35  ;;  %v3999_v3 = vsub.f32 1.5, %v3998_v2  ;;  %v4252_v2 = vld [vmem:[%s753_s26 + $0x20] sm:$0xff] }
 0x8f7   : > { %v3960_v1 = vmul.f32 %v5783_v50, %v3959_v59 }
 0x8f8   : > { %5786 = vrsqrt.f32 %v3888_v19  ;;  %v3814_v45 = vmul.f32 %v8294_v23, %v8294_v23  ;;  %vm3991_vm6 = vweird.f32 %v3888_v19  ;;  %v4000_v10 = vmul.f32 %v5785_v32, %v3999_v3  ;;  %v4250_v3 = vld [vmem:[%s753_s26 + $0x10] sm:$0xff] }
 0x8f9   : > { %v3964_v57 = vsel %vm3963_vm13, %v5783_v50, %v3960_v1 }
 0x8fa   : > { %v4061_v52 = vmul.f32 %v3964_v57, %v8132_v51  ;;  %v3860_v48 = vsel %vm808_vm0, %v3814_v45, 0.0  ;;  %v3980_v51 = vmul.f32 %v8275_v31, %v3979_v37 }
 0x8fb   : > { %v3850_v5 = vpop.xlane.xlu1 %3849  ;;  %3861 = vadd.xlane.f32.xlu0 %v3860_v48 }
 0x8fc   : > { %v3874_v33 = vmul.f32 %v3850_v5, %v7994_v42  ;;  %v4081_v11 = vmul.f32 %v8161_v62, %v4061_v52  ;;  %v3984_v22 = vsel %vm3983_vm4, %v8275_v31, %v3980_v51 }
 0x8fd   : > { %v4063_v43 = vmul.f32 %v3984_v22, %v8103_v18 }
 0x8fe   : > { %v5787_v46 = vpop.eup %5786  ;;  %v3890_v39 = vadd.f32 1e-05, %v3874_v33  ;;  %v8304_v6 = vadd.f32 %v8177_v12, %v4081_v11 }
 0x8ff   : > { %v3986_v38 = vmul.f32 %v5787_v46, %v3888_v19  ;;  %vm3992_vm5 = vweird.f32 %v5787_v46  ;;  %v4083_v31 = vmul.f32 %v8161_v62, %v4063_v43 }
 0x900   : > { %5788 = vrsqrt.f32 %v3890_v39  ;;  %5272 = vmatmul.msk.f32.gmra.mxu1 %vm808_vm0, %v8304_v6  ;;  %vm3993_vm7 = vmor %vm3991_vm6, %vm3992_vm5  ;;  %vm4011_vm12 = vweird.f32 %v3890_v39 }
 0x901   : > { %v3987_v25 = vmul.f32 %v5787_v46, %v3986_v38  ;;  %v8324_v0 = vadd.f32 %v8177_v12, %v4083_v31 }
 0x903   : > { %v3988_v13 = vmul.f32 0.5, %v3987_v25  ;;  %v3853_v28 = vpop.xlane.xlu0 %3852 }
 0x904   : > { %v3875_v44 = vmul.f32 %v3853_v28, %v7994_v42 }
 0x905   : > { %v3989_v50 = vsub.f32 1.5, %v3988_v13 }
 0x906   : > { %v5789_v34 = vpop.eup %5788  ;;  %v3891_v60 = vadd.f32 1e-05, %v3875_v44 }
 0x907   : > { %v3990_v54 = vmul.f32 %v5787_v46, %v3989_v50  ;;  %v4006_v40 = vmul.f32 %v5789_v34, %v3890_v39  ;;  %vm4012_vm11 = vweird.f32 %v5789_v34 }
 0x908   : > { %5790 = vrsqrt.f32 %v3891_v60  ;;  %5273 = vmatmul.msk.f32.gmra.mxu1 %vm808_vm0, %v8317_v41  ;;  %vm4013_vm13 = vmor %vm4011_vm12, %vm4012_vm11  ;;  %vm4021_vm15 = vweird.f32 %v3891_v60 }
 0x909   : > { %v3994_v47 = vsel %vm3993_vm7, %v5787_v46, %v3990_v54  ;;  %v4007_v27 = vmul.f32 %v5789_v34, %v4006_v40  ;;  %v4251_v40 = vld [vmem:[%s753_s26 + $0x18] sm:$0xff] }
 0x90a   : > { %v4064_v53 = vmul.f32 %v3994_v47, %v8194_v30  ;;  %v4004_v30 = vsel %vm4003_vm10, %v5785_v32, %v4000_v10 }
 0x90b   : > { %v4008_v29 = vmul.f32 0.5, %v4007_v27  ;;  %v4065_v57 = vmul.f32 %v4004_v30, %v8110_v17  ;;  %v4249_v27 = vld [vmem:[%s753_s26 + $0x8] sm:$0xff] }
 0x90c   : > { %v4084_v35 = vmul.f32 %v8161_v62, %v4064_v53 }
 0x90d   : > { %v4009_v1 = vsub.f32 1.5, %v4008_v29  ;;  %v4085_v37 = vmul.f32 %v8161_v62, %v4065_v57 }
 0x90e   : > { %v5791_v18 = vpop.eup %5790  ;;  %v8333_v52 = vadd.f32 %v8177_v12, %v4084_v35 }
 0x90f   : > { %v4016_v21 = vmul.f32 %v5791_v18, %v3891_v60  ;;  %v3859_v59 = vpop.xlane.xlu1 %3858  ;;  %v4010_v48 = vmul.f32 %v5789_v34, %v4009_v1  ;;  %v8340_v46 = vadd.f32 %v8177_v12, %v4085_v37  ;;  %vm4022_vm14 = vweird.f32 %v5791_v18  ;;  %v4253_v60 = vld [vmem:[%s753_s26 + $0x28] sm:$0xff] }
 0x910   : > { %v3877_v26 = vmul.f32 %v3859_v59, %v7994_v42  ;;  %5274 = vmatmul.msk.f32.gmra.mxu1 %vm808_vm0, %v8324_v0  ;;  %vm4023_vm3 = vmor %vm4021_vm15, %vm4022_vm14 }
 0x911   : > { %v4017_v45 = vmul.f32 %v5791_v18, %v4016_v21  ;;  %v4014_v5 = vsel %vm4013_vm13, %v5789_v34, %v4010_v48  ;;  %v4254_v34 = vld [vmem:[%s753_s26 + $0x30] sm:$0xff]  ;;  %v4184_v21 = vpop.f32.mrf.mxu1 }
 0x912   : > { %v3893_v19 = vadd.f32 1e-05, %v3877_v26  ;;  %v4066_v17 = vmul.f32 %v4014_v5, %v8203_v24 }
 0x913   : > { %v4018_v63 = vmul.f32 0.5, %v4017_v45 }
 0x914   : > { %5792 = vrsqrt.f32 %v3893_v19  ;;  %v4086_v61 = vmul.f32 %v8161_v62, %v4066_v17  ;;  %vm4041_vm4 = vweird.f32 %v3893_v19 }
 0x915   : > { %v4019_v32 = vsub.f32 1.5, %v4018_v63 }
 0x916   : > { %v8348_v15 = vadd.f32 %v8177_v12, %v4086_v61 }
 0x917   : > { %v4020_v4 = vmul.f32 %v5791_v18, %v4019_v32 }
 0x918   : > { %5275 = vmatmul.msk.f32.gmra.mxu1 %vm808_vm0, %v8333_v52 }
 0x919   : > { %v4024_v38 = vsel %vm4023_vm3, %v5791_v18, %v4020_v4  ;;  %v4248_v18 = vld [vmem:[%s753_s26] sm:$0xff]  ;;  %v4187_v63 = vpop.f32.mrf.mxu1 }
 0x91a   : > { %v5793_v55 = vpop.eup %5792  ;;  %v4067_v58 = vmul.f32 %v4024_v38, %v8228_v8 }
 0x91b   : > { %v4036_v33 = vmul.f32 %v5793_v55, %v3893_v19  ;;  %vm4042_vm1 = vweird.f32 %v5793_v55 }
 0x91c   : > { %vm4043_vm5 = vmor %vm4041_vm4, %vm4042_vm1  ;;  %v4087_v44 = vmul.f32 %v8161_v62, %v4067_v58 }
 0x91d   : > { %v4037_v11 = vmul.f32 %v5793_v55, %v4036_v33 }
 0x91e   : > { %v8360_v8 = vadd.f32 %v8177_v12, %v4087_v44 }
 0x91f   : > { %v4038_v51 = vmul.f32 0.5, %v4037_v11 }
 0x920   : > { %5276 = vmatmul.msk.f32.gmra.mxu1 %vm808_vm0, %v8340_v46 }
 0x921   : > { %v4039_v39 = vsub.f32 1.5, %v4038_v51  ;;  %v4190_v4 = vpop.f32.mrf.mxu1  ;;  %v5504_v51 = vld [vmem:[%s748_s17] ss:$0 sm:$0xff]  ;;  %s8656_s17 = scalar_lea.vmem %s8767_s16, %s5964_s24 }
 0x922   : > { %v4185_v61 = vadd.f32 %v5504_v51, %v4184_v21  ;;  %v4191_v58 = vadd.f32 %v5504_v51, %v4190_v4  ;;  %v8413_v4 = vld [vmem:[%s756_s25] ss:$0 sm:$0xff] }
 0x923   : > { %v4040_v25 = vmul.f32 %v5793_v55, %v4039_v39 }
 0x924   : > { %v4232_v38 = vmax.f32 %v4185_v61, 0.0 }
 0x925   : > { %v4044_v24 = vsel %vm4043_vm5, %v5793_v55, %v4040_v25 }
 0x926   : > { %v4069_v22 = vmul.f32 %v4044_v24, %v8251_v56  ;;  %v4255_v56 = vld [vmem:[%s753_s26 + $0x38] sm:$0xff] }
 0x927   : > { %4316 = vmatpush.msrb.mxu3 %v4255_v56 }
 0x928   : > { %v4089_v13 = vmul.f32 %v8161_v62, %v4069_v22  ;;  %5277 = vmatmul.msk.f32.gmra.mxu1 %vm808_vm0, %v8348_v15 }
 0x929   : > { %4317 = vmatpush.msrb.mxu3 %v4254_v34  ;;  %v4193_v25 = vpop.f32.mrf.mxu1 }
 0x92a   : > { %v8354_v28 = vadd.f32 %v8177_v12, %v4089_v13  ;;  %v4194_v22 = vadd.f32 %v5504_v51, %v4193_v25 }
 0x92b   : > { %4318 = vmatpush.msrb.mxu3 %v4253_v60 }
 0x92c   : > { %5280 = vmatmul.msk.f32.vlgmr.msra.gmra.mxu3 %vm808_vm0, %v8354_v28  ;;  %v4235_v44 = vmax.f32 %v4194_v22, 0.0 }
 0x92d   : > { %4319 = vmatpush.msrb.mxu3 %v4252_v2 }
 0x92f   : > { %4320 = vmatpush.msrb.mxu3 %v4251_v40 }
 0x930   : > { %5278 = vmatmul.msk.f32.gmra.mxu1 %vm808_vm0, %v8360_v8 }
 0x931   : > { %4321 = vmatpush.msrb.mxu3 %v4250_v3  ;;  %v4196_v24 = vpop.f32.mrf.mxu1 }
 0x932   : > { %v4197_v56 = vadd.f32 %v5504_v51, %v4196_v24 }
 0x933   : > { %4322 = vmatpush.msrb.mxu3 %v4249_v27 }
 0x934   : > { %v4236_v34 = vmax.f32 %v4197_v56, 0.0 }
 0x935   : > { %4323 = vmatpush.msrb.mxu3 %v4248_v18 }
 0x939   : > { %v4199_v13 = vpop.f32.mrf.mxu1 }
 0x966   : > { %v3856_v50 = vpop.xlane.xlu2 %3855 }
 0x967   : > { %v3876_v43 = vmul.f32 %v3856_v50, %v7994_v42 }
 0x969   : > { %v3892_v54 = vadd.f32 1e-05, %v3876_v43  ;;  %v4200_v43 = vadd.f32 %v5504_v51, %v4199_v13 }
 0x96b   : > { %5794 = vrsqrt.f32 %v3892_v54  ;;  %vm4031_vm7 = vweird.f32 %v3892_v54  ;;  %v4237_v2 = vmax.f32 %v4200_v43, 0.0 }
 0x96e   : > { %v3862_v31 = vpop.xlane.xlu0 %3861 }
 0x96f   : > { %v3878_v47 = vmul.f32 %v3862_v31, %v7994_v42 }
 0x971   : > { %v5795_v53 = vpop.eup %5794  ;;  %v3894_v10 = vadd.f32 1e-05, %v3878_v47 }
 0x972   : > { %v4026_v29 = vmul.f32 %v5795_v53, %v3892_v54  ;;  %vm4032_vm6 = vweird.f32 %v5795_v53 }
 0x973   : > { %5796 = vrsqrt.f32 %v3894_v10  ;;  %vm4033_vm8 = vmor %vm4031_vm7, %vm4032_vm6  ;;  %vm4051_vm10 = vweird.f32 %v3894_v10 }
 0x974   : > { %v4027_v59 = vmul.f32 %v5795_v53, %v4026_v29 }
 0x976   : > { %v4028_v26 = vmul.f32 0.5, %v4027_v59 }
 0x978   : > { %v4029_v19 = vsub.f32 1.5, %v4028_v26 }
 0x979   : > { %v5797_v35 = vpop.eup %5796 }
 0x97a   : > { %v4030_v30 = vmul.f32 %v5795_v53, %v4029_v19  ;;  %v4046_v1 = vmul.f32 %v5797_v35, %v3894_v10  ;;  %vm4052_vm9 = vweird.f32 %v5797_v35 }
 0x97b   : > { %vm4053_vm11 = vmor %vm4051_vm10, %vm4052_vm9 }
 0x97c   : > { %v4034_v45 = vsel %vm4033_vm8, %v5795_v53, %v4030_v30  ;;  %v4047_v57 = vmul.f32 %v5797_v35, %v4046_v1 }
 0x97d   : > { %v4068_v48 = vmul.f32 %v4034_v45, %v8280_v49  ;;  %v4202_v50 = vpop.f32.mrf.mxu1 }
 0x97e   : > { %v4048_v55 = vmul.f32 0.5, %v4047_v57  ;;  %v4203_v54 = vadd.f32 %v5504_v51, %v4202_v50 }
 0x97f   : > { %v4088_v37 = vmul.f32 %v8161_v62, %v4068_v48 }
 0x980   : > { %v4049_v5 = vsub.f32 1.5, %v4048_v55  ;;  %v4238_v40 = vmax.f32 %v4203_v54, 0.0 }
 0x981   : > { %v8373_v32 = vadd.f32 %v8177_v12, %v4088_v37 }
 0x982   : > { %v4050_v33 = vmul.f32 %v5797_v35, %v4049_v5 }
 0x983   : > { %5279 = vmatmul.msk.f32.gmra.mxu1 %vm808_vm0, %v8373_v32 }
 0x984   : > { %v4054_v11 = vsel %vm4053_vm11, %v5797_v35, %v4050_v33 }
 0x985   : > { %v4070_v17 = vmul.f32 %v4054_v11, %v8294_v23  ;;  %v4188_v23 = vadd.f32 %v5504_v51, %v4187_v63  ;;  %v4205_v60 = vpop.f32.mrf.mxu1 }
 0x986   : > { %v4206_v3 = vadd.f32 %v5504_v51, %v4205_v60 }
 0x987   : > { %v4090_v49 = vmul.f32 %v8161_v62, %v4070_v17  ;;  %v4233_v62 = vmax.f32 %v4188_v23, 0.0 }
 0x988   : > { %v4239_v47 = vmax.f32 %v4206_v3, 0.0 }
 0x989   : > { %v8385_v39 = vadd.f32 %v8177_v12, %v4090_v49  ;;  %v4234_v12 = vmax.f32 %v4191_v58, 0.0 }
 0x98b   : > { %5281 = vmatmul.msk.f32.gmra.mxu3 %vm808_vm0, %v8385_v39 }
 0x98d   : > { %v4208_v31 = vpop.f32.mrf.mxu1 }
 0x98e   : > { %v4209_v18 = vadd.f32 %v5504_v51, %v4208_v31 }
 0x990   : > { %v4240_v53 = vmax.f32 %v4209_v18, 0.0 }
 0x993   : > { %5282 = vmatmul.msk.f32.vlgmr.msrb.gmra.mxu3 %vm1141_vm2, %v4232_v38 }
 0x995   : > { %v4211_v27 = vpop.f32.mrf.mxu1 }
 0x996   : > { %v4212_v10 = vadd.f32 %v5504_v51, %v4211_v27 }
 0x998   : > { %v4241_v21 = vmax.f32 %v4212_v10, 0.0 }
 0x99b   : > { %5283 = vmatmul.msk.f32.gmra.mxu3 %vm1141_vm2, %v4233_v62 }
 0x99d   : > { %v4214_v29 = vpop.f32.mrf.mxu1 }
 0x99e   : > { %v4215_v59 = vadd.f32 %v5504_v51, %v4214_v29 }
 0x9a0   : > { %v4242_v19 = vmax.f32 %v4215_v59, 0.0 }
 0x9a3   : > { %5284 = vmatmul.msk.f32.gmra.mxu3 %vm1141_vm2, %v4234_v12 }
 0x9a5   : > { %v4217_v26 = vpop.f32.mrf.mxu1 }
 0x9a6   : > { %v4218_v35 = vadd.f32 %v5504_v51, %v4217_v26 }
 0x9a8   : > { %v4243_v30 = vmax.f32 %v4218_v35, 0.0 }
 0x9ab   : > { %5285 = vmatmul.msk.f32.gmra.mxu3 %vm1141_vm2, %v4235_v44 }
 0x9ad   : > { %v4220_v1 = vpop.f32.mrf.mxu1 }
 0x9ae   : > { %v4221_v45 = vadd.f32 %v5504_v51, %v4220_v1 }
 0x9af   : > { %v4226_v37 = vpop.f32.mrf.mxu3 }
 0x9b0   : > { %v4244_v57 = vmax.f32 %v4221_v45, 0.0  ;;  %v4227_v5 = vadd.f32 %v5504_v51, %v4226_v37 }
 0x9b2   : > { %v4246_v33 = vmax.f32 %v4227_v5, 0.0 }
 0x9b3   : > { %5286 = vmatmul.msk.f32.gmra.mxu3 %vm1141_vm2, %v4236_v34 }
 0x9bb   : > { %5287 = vmatmul.msk.f32.gmra.mxu3 %vm1141_vm2, %v4237_v2 }
 0x9c3   : > { %5288 = vmatmul.msk.f32.gmra.mxu3 %vm1141_vm2, %v4238_v40 }
 0x9cb   : > { %5289 = vmatmul.msk.f32.gmra.mxu3 %vm1141_vm2, %v4239_v47 }
 0x9d3   : > { %5290 = vmatmul.msk.f32.gmra.mxu3 %vm1141_vm2, %v4240_v53 }
 0x9db   : > { %5291 = vmatmul.msk.f32.gmra.mxu3 %vm1141_vm2, %v4241_v21 }
 0x9e3   : > { %5292 = vmatmul.msk.f32.gmra.mxu3 %vm1141_vm2, %v4242_v19 }
 0x9eb   : > { %5293 = vmatmul.msk.f32.gmra.mxu3 %vm1141_vm2, %v4243_v30 }
 0x9f3   : > { %5294 = vmatmul.msk.f32.gmra.mxu3 %vm1141_vm2, %v4244_v57 }
 0xa00   : > { %v4223_v48 = vpop.f32.mrf.mxu1 }
 0xa01   : > { %v4224_v63 = vadd.f32 %v5504_v51, %v4223_v48 }
 0xa03   : > { %v4245_v55 = vmax.f32 %v4224_v63, 0.0 }
 0xa05   : > { %5295 = vmatmul.msk.f32.gmra.mxu3 %vm1141_vm2, %v4245_v55 }
 0xa0d   : > { %5296 = vmatmul.msk.f32.gmra.mxu3 %vm1141_vm2, %v4246_v33 }
 0xa0e   : > { %v4229_v11 = vpop.f32.mrf.mxu3 }
 0xa0f   : > { %v4230_v17 = vadd.f32 %v5504_v51, %v4229_v11 }
 0xa11   : > { %v4247_v49 = vmax.f32 %v4230_v17, 0.0 }
 0xa15   : > { %5297 = vmatmul.msk.f32.gmra.mxu3 %vm1141_vm2, %v4247_v49 }
 0xa16   : > { %v4325_v61 = vpop.f32.mrf.mxu3 }
 0xa17   : > { %v4326_v38 = vadd.f32 %v8413_v4, %v4325_v61 }
 0xa19   : > { %v8418_v25 = vadd.f32 %v4326_v38, %v8191_v20 }
 0xa1b   : > { %v4389_v23 = vsel %vm808_vm0, %v8418_v25, 0.0 }
 0xa1c   : > { %4390 = vadd.xlane.f32.xlu2 %v4389_v23 }
 0xa1e   : > { %v4328_v51 = vpop.f32.mrf.mxu3 }
 0xa1f   : > { %v4329_v62 = vadd.f32 %v8413_v4, %v4328_v51 }
 0xa21   : > { %v8424_v24 = vadd.f32 %v4329_v62, %v8213_v7 }
 0xa23   : > { %v4392_v58 = vsel %vm808_vm0, %v8424_v24, 0.0 }
 0xa24   : > { %4393 = vadd.xlane.f32.xlu1 %v4392_v58 }
 0xa26   : > { %v4331_v12 = vpop.f32.mrf.mxu3 }
 0xa27   : > { %v4332_v22 = vadd.f32 %v8413_v4, %v4331_v12 }
 0xa29   : > { %v8430_v20 = vadd.f32 %v4332_v22, %v8231_v36 }
 0xa2b   : > { %v4395_v13 = vsel %vm808_vm0, %v8430_v20, 0.0 }
 0xa2c   : > { %4396 = vadd.xlane.f32.xlu0 %v4395_v13 }
 0xa2e   : > { %v4334_v44 = vpop.f32.mrf.mxu3 }
 0xa2f   : > { %v4335_v56 = vadd.f32 %v8413_v4, %v4334_v44 }
 0xa31   : > { %v8436_v7 = vadd.f32 %v4335_v56, %v8245_v14 }
 0xa33   : > { %v4398_v50 = vsel %vm808_vm0, %v8436_v7, 0.0 }
 0xa34   : > { %4399 = vadd.xlane.f32.xlu2 %v4398_v50 }
 0xa36   : > { %v4337_v34 = vpop.f32.mrf.mxu3 }
 0xa37   : > { %v4338_v43 = vadd.f32 %v8413_v4, %v4337_v34 }
 0xa39   : > { %v8442_v36 = vadd.f32 %v4338_v43, %v8259_v16 }
 0xa3b   : > { %v4401_v60 = vsel %vm808_vm0, %v8442_v36, 0.0 }
 0xa3c   : > { %4402 = vadd.xlane.f32.xlu1 %v4401_v60 }
 0xa3e   : > { %v4340_v2 = vpop.f32.mrf.mxu3 }
 0xa3f   : > { %v4341_v54 = vadd.f32 %v8413_v4, %v4340_v2 }
 0xa41   : > { %v8448_v14 = vadd.f32 %v4341_v54, %v8265_v9 }
 0xa43   : > { %v4404_v40 = vsel %vm808_vm0, %v8448_v14, 0.0 }
 0xa44   : > { %4405 = vadd.xlane.f32.xlu0 %v4404_v40 }
 0xa46   : > { %v4343_v31 = vpop.f32.mrf.mxu3 }
 0xa47   : > { %v4344_v3 = vadd.f32 %v8413_v4, %v4343_v31 }
 0xa49   : > { %v8454_v16 = vadd.f32 %v4344_v3, %v8304_v6 }
 0xa4b   : > { %v4407_v47 = vsel %vm808_vm0, %v8454_v16, 0.0 }
 0xa4c   : > { %4408 = vadd.xlane.f32.xlu2 %v4407_v47 }
 0xa4e   : > { %v4346_v27 = vpop.f32.mrf.mxu3 }
 0xa4f   : > { %v4347_v18 = vadd.f32 %v8413_v4, %v4346_v27 }
 0xa51   : > { %v8460_v9 = vadd.f32 %v4347_v18, %v8317_v41 }
 0xa53   : > { %v4410_v53 = vsel %vm808_vm0, %v8460_v9, 0.0 }
 0xa54   : > { %4411 = vadd.xlane.f32.xlu1 %v4410_v53 }
 0xa56   : > { %v4349_v10 = vpop.f32.mrf.mxu3 }
 0xa57   : > { %v4350_v29 = vadd.f32 %v8413_v4, %v4349_v10 }
 0xa59   : > { %v8466_v6 = vadd.f32 %v4350_v29, %v8324_v0 }
 0xa5b   : > { %v4413_v21 = vsel %vm808_vm0, %v8466_v6, 0.0 }
 0xa5c   : > { %4414 = vadd.xlane.f32.xlu0 %v4413_v21 }
 0xa5e   : > { %v4352_v59 = vpop.f32.mrf.mxu3 }
 0xa5f   : > { %v4353_v26 = vadd.f32 %v8413_v4, %v4352_v59 }
 0xa61   : > { %v8472_v41 = vadd.f32 %v4353_v26, %v8333_v52 }
 0xa63   : > { %v4416_v19 = vsel %vm808_vm0, %v8472_v41, 0.0 }
 0xa64   : > { %4417 = vadd.xlane.f32.xlu2 %v4416_v19 }
 0xa66   : > { %v4355_v35 = vpop.f32.mrf.mxu3 }
 0xa67   : > { %v4356_v30 = vadd.f32 %v8413_v4, %v4355_v35 }
 0xa69   : > { %v8478_v0 = vadd.f32 %v4356_v30, %v8340_v46 }
 0xa6b   : > { %v4419_v1 = vsel %vm808_vm0, %v8478_v0, 0.0 }
 0xa6c   : > { %4420 = vadd.xlane.f32.xlu1 %v4419_v1 }
 0xa6e   : > { %v4358_v45 = vpop.f32.mrf.mxu3 }
 0xa6f   : > { %v4359_v52 = vadd.f32 %v8413_v4, %v4358_v45 }
 0xa71   : > { %v8484_v57 = vadd.f32 %v4359_v52, %v8348_v15 }
 0xa73   : > { %v4422_v48 = vsel %vm808_vm0, %v8484_v57, 0.0 }
 0xa74   : > { %4423 = vadd.xlane.f32.xlu0 %v4422_v48 }
 0xa76   : > { %v4361_v63 = vpop.f32.mrf.mxu3 }
 0xa77   : > { %v4362_v46 = vadd.f32 %v8413_v4, %v4361_v63 }
 0xa79   : > { %v8490_v55 = vadd.f32 %v4362_v46, %v8360_v8 }
 0xa7b   : > { %v4425_v37 = vsel %vm808_vm0, %v8490_v55, 0.0 }
 0xa7c   : > { %4426 = vadd.xlane.f32.xlu2 %v4425_v37 }
 0xa88   : > { %v4364_v5 = vpop.f32.mrf.mxu3 }
 0xa89   : > { %v4365_v33 = vadd.f32 %v8413_v4, %v4364_v5 }
 0xa8b   : > { %v8496_v15 = vadd.f32 %v4365_v33, %v8373_v32 }
 0xa8d   : > { %v4428_v8 = vsel %vm808_vm0, %v8496_v15, 0.0 }
 0xa8e   : > { %4429 = vadd.xlane.f32.xlu1 %v4428_v8 }
 0xa8f   : > { %v4391_v11 = vpop.xlane.xlu2 %4390 }
 0xa90   : > { %v4437_v17 = vmul.f32 %v4391_v11, %v7994_v42  ;;  %v4367_v49 = vpop.f32.mrf.mxu3 }
 0xa91   : > { %v4368_v61 = vadd.f32 %v8413_v4, %v4367_v49 }
 0xa92   : > { %v8511_v32 = vsub.f32 %v8418_v25, %v4437_v17 }
 0xa93   : > { %v8514_v38 = vadd.f32 %v4368_v61, %v8354_v28 }
 0xa94   : > { %v4469_v23 = vmul.f32 %v8511_v32, %v8511_v32 }
 0xa95   : > { %v4431_v51 = vsel %vm808_vm0, %v8514_v38, 0.0 }
 0xa96   : > { %4432 = vadd.xlane.f32.xlu0 %v4431_v51  ;;  %v4485_v62 = vsel %vm808_vm0, %v4469_v23, 0.0 }
 0xa97   : > { %v4394_v58 = vpop.xlane.xlu1 %4393  ;;  %4486 = vadd.xlane.f32.xlu1 %v4485_v62 }
 0xa98   : > { %v4438_v12 = vmul.f32 %v4394_v58, %v7994_v42  ;;  %v4370_v22 = vpop.f32.mrf.mxu3 }
 0xa99   : > { %v4371_v25 = vadd.f32 %v8413_v4, %v4370_v22 }
 0xa9a   : > { %v8524_v13 = vsub.f32 %v8424_v24, %v4438_v12 }
 0xa9b   : > { %v8527_v28 = vadd.f32 %v4371_v25, %v8385_v39 }
 0xa9c   : > { %v4470_v44 = vmul.f32 %v8524_v13, %v8524_v13 }
 0xa9d   : > { %v4434_v56 = vsel %vm808_vm0, %v8527_v28, 0.0 }
 0xa9e   : > { %4435 = vadd.xlane.f32.xlu2 %v4434_v56  ;;  %v4488_v50 = vsel %vm808_vm0, %v4470_v44, 0.0 }
 0xa9f   : > { %v4397_v34 = vpop.xlane.xlu0 %4396  ;;  %4489 = vadd.xlane.f32.xlu0 %v4488_v50 }
 0xaa0   : > { %v4439_v43 = vmul.f32 %v4397_v34, %v7994_v42 }
 0xaa2   : > { %v8536_v4 = vsub.f32 %v8430_v20, %v4439_v43 }
 0xaa4   : > { %v4471_v39 = vmul.f32 %v8536_v4, %v8536_v4 }
 0xaa6   : > { %v4491_v24 = vsel %vm808_vm0, %v4471_v39, 0.0 }
 0xaa7   : > { %v4400_v60 = vpop.xlane.xlu2 %4399  ;;  %4492 = vadd.xlane.f32.xlu2 %v4491_v24 }
 0xaa8   : > { %v4440_v2 = vmul.f32 %v4400_v60, %v7994_v42 }
 0xaaa   : > { %v8543_v54 = vsub.f32 %v8436_v7, %v4440_v2 }
 0xaac   : > { %v4472_v40 = vmul.f32 %v8543_v54, %v8543_v54 }
 0xaae   : > { %v4494_v31 = vsel %vm808_vm0, %v4472_v40, 0.0 }
 0xaaf   : > { %v4403_v3 = vpop.xlane.xlu1 %4402  ;;  %4495 = vadd.xlane.f32.xlu1 %v4494_v31 }
 0xab0   : > { %v4441_v20 = vmul.f32 %v4403_v3, %v7994_v42 }
 0xab2   : > { %v8550_v47 = vsub.f32 %v8442_v36, %v4441_v20 }
 0xab4   : > { %v4473_v27 = vmul.f32 %v8550_v47, %v8550_v47 }
 0xab6   : > { %v4497_v18 = vsel %vm808_vm0, %v4473_v27, 0.0 }
 0xab7   : > { %v4406_v53 = vpop.xlane.xlu0 %4405  ;;  %4498 = vadd.xlane.f32.xlu0 %v4497_v18 }
 0xab8   : > { %v4442_v7 = vmul.f32 %v4406_v53, %v7994_v42 }
 0xaba   : > { %v8557_v10 = vsub.f32 %v8448_v14, %v4442_v7 }
 0xabc   : > { %v4474_v29 = vmul.f32 %v8557_v10, %v8557_v10 }
 0xabe   : > { %v4500_v21 = vsel %vm808_vm0, %v4474_v29, 0.0 }
 0xabf   : > { %v4409_v59 = vpop.xlane.xlu2 %4408  ;;  %4501 = vadd.xlane.f32.xlu2 %v4500_v21 }
 0xac0   : > { %v4443_v36 = vmul.f32 %v4409_v59, %v7994_v42 }
 0xac2   : > { %v8564_v26 = vsub.f32 %v8454_v16, %v4443_v36 }
 0xac4   : > { %v4475_v19 = vmul.f32 %v8564_v26, %v8564_v26 }
 0xac6   : > { %v4503_v35 = vsel %vm808_vm0, %v4475_v19, 0.0 }
 0xac7   : > { %v4412_v30 = vpop.xlane.xlu1 %4411  ;;  %4504 = vadd.xlane.f32.xlu1 %v4503_v35 }
 0xac8   : > { %v4444_v14 = vmul.f32 %v4412_v30, %v7994_v42 }
 0xaca   : > { %v8571_v1 = vsub.f32 %v8460_v9, %v4444_v14 }
 0xacc   : > { %v4476_v45 = vmul.f32 %v8571_v1, %v8571_v1 }
 0xace   : > { %v4506_v52 = vsel %vm808_vm0, %v4476_v45, 0.0 }
 0xacf   : > { %v4415_v48 = vpop.xlane.xlu0 %4414  ;;  %4507 = vadd.xlane.f32.xlu0 %v4506_v52 }
 0xad0   : > { %v4445_v16 = vmul.f32 %v4415_v48, %v7994_v42 }
 0xad2   : > { %v8578_v63 = vsub.f32 %v8466_v6, %v4445_v16 }
 0xad4   : > { %v4477_v46 = vmul.f32 %v8578_v63, %v8578_v63 }
 0xad6   : > { %v4509_v37 = vsel %vm808_vm0, %v4477_v46, 0.0  ;;  %v8640_v46 = vld [vmem:[%s759_s18] ss:$0 sm:$0xff] }
 0xad7   : > { %v4418_v5 = vpop.xlane.xlu2 %4417  ;;  %4510 = vadd.xlane.f32.xlu2 %v4509_v37 }
 0xad8   : > { %v4446_v9 = vmul.f32 %v4418_v5, %v7994_v42 }
 0xada   : > { %v8585_v33 = vsub.f32 %v8472_v41, %v4446_v9  ;;  %v8647_v9 = vld [vmem:[%s762_s27] ss:$0 sm:$0xff] }
 0xadc   : > { %v4478_v8 = vmul.f32 %v8585_v33, %v8585_v33 }
 0xade   : > { %v4512_v11 = vsel %vm808_vm0, %v4478_v8, 0.0 }
 0xadf   : > { %v4421_v17 = vpop.xlane.xlu1 %4420  ;;  %4513 = vadd.xlane.f32.xlu1 %v4512_v11 }
 0xae0   : > { %v4447_v6 = vmul.f32 %v4421_v17, %v7994_v42 }
 0xae2   : > { %v8592_v49 = vsub.f32 %v8478_v0, %v4447_v6 }
 0xae4   : > { %v4479_v61 = vmul.f32 %v8592_v49, %v8592_v49 }
 0xae6   : > { %v4515_v23 = vsel %vm808_vm0, %v4479_v61, 0.0 }
 0xae7   : > { %v4424_v51 = vpop.xlane.xlu0 %4423  ;;  %4516 = vadd.xlane.f32.xlu0 %v4515_v23 }
 0xae8   : > { %v4448_v41 = vmul.f32 %v4424_v51, %v7994_v42 }
 0xaea   : > { %v8599_v62 = vsub.f32 %v8484_v57, %v4448_v41 }
 0xaec   : > { %v4480_v58 = vmul.f32 %v8599_v62, %v8599_v62 }
 0xaee   : > { %v4518_v12 = vsel %vm808_vm0, %v4480_v58, 0.0 }
 0xaef   : > { %v4427_v22 = vpop.xlane.xlu2 %4426  ;;  %4519 = vadd.xlane.f32.xlu2 %v4518_v12 }
 0xaf0   : > { %v4449_v0 = vmul.f32 %v4427_v22, %v7994_v42 }
 0xaf2   : > { %v8606_v25 = vsub.f32 %v8490_v55, %v4449_v0 }
 0xaf4   : > { %v4481_v44 = vmul.f32 %v8606_v25, %v8606_v25 }
 0xaf6   : > { %v4521_v56 = vsel %vm808_vm0, %v4481_v44, 0.0 }
 0xaf7   : > { %4522 = vadd.xlane.f32.xlu1 %v4521_v56 }
 0xb01   : > { %v4430_v57 = vpop.xlane.xlu1 %4429 }
 0xb02   : > { %v4450_v50 = vmul.f32 %v4430_v57, %v7994_v42 }
 0xb04   : > { %v8613_v34 = vsub.f32 %v8496_v15, %v4450_v50 }
 0xb06   : > { %v4482_v43 = vmul.f32 %v8613_v34, %v8613_v34 }
 0xb08   : > { %v4524_v39 = vsel %vm808_vm0, %v4482_v43, 0.0 }
 0xb09   : > { %v4433_v24 = vpop.xlane.xlu0 %4432  ;;  %4525 = vadd.xlane.f32.xlu0 %v4524_v39 }
 0xb0a   : > { %v4451_v55 = vmul.f32 %v4433_v24, %v7994_v42  ;;  %v4487_v60 = vpop.xlane.xlu1 %4486 }
 0xb0b   : > { %v4533_v2 = vmul.f32 %v4487_v60, %v7994_v42 }
 0xb0c   : > { %v8621_v40 = vsub.f32 %v8514_v38, %v4451_v55 }
 0xb0d   : > { %v4549_v31 = vadd.f32 1e-05, %v4533_v2 }
 0xb0e   : > { %v4483_v15 = vmul.f32 %v8621_v40, %v8621_v40 }
 0xb0f   : > { %5798 = vrsqrt.f32 %v4549_v31  ;;  %vm4571_vm12 = vweird.f32 %v4549_v31 }
 0xb10   : > { %v4527_v3 = vsel %vm808_vm0, %v4483_v15, 0.0 }
 0xb11   : > { %4528 = vadd.xlane.f32.xlu2 %v4527_v3  ;;  %v4436_v20 = vpop.xlane.xlu2 %4435 }
 0xb12   : > { %v4452_v27 = vmul.f32 %v4436_v20, %v7994_v42  ;;  %v4490_v18 = vpop.xlane.xlu0 %4489 }
 0xb13   : > { %v4534_v53 = vmul.f32 %v4490_v18, %v7994_v42 }
 0xb14   : > { %v8629_v7 = vsub.f32 %v8527_v28, %v4452_v27 }
 0xb15   : > { %v5799_v29 = vpop.eup %5798  ;;  %v4550_v38 = vadd.f32 1e-05, %v4534_v53 }
 0xb16   : > { %v4566_v21 = vmul.f32 %v5799_v29, %v4549_v31  ;;  %v4484_v59 = vmul.f32 %v8629_v7, %v8629_v7  ;;  %vm4572_vm2 = vweird.f32 %v5799_v29 }
 0xb17   : > { %5800 = vrsqrt.f32 %v4550_v38  ;;  %vm4573_vm13 = vmor %vm4571_vm12, %vm4572_vm2  ;;  %vm4581_vm15 = vweird.f32 %v4550_v38 }
 0xb18   : > { %v4567_v36 = vmul.f32 %v5799_v29, %v4566_v21  ;;  %v4530_v19 = vsel %vm808_vm0, %v4484_v59, 0.0 }
 0xb19   : > { %4531 = vadd.xlane.f32.xlu1 %v4530_v19 }
 0xb1a   : > { %v4568_v35 = vmul.f32 0.5, %v4567_v36  ;;  %v4493_v30 = vpop.xlane.xlu2 %4492 }
 0xb1b   : > { %v4535_v14 = vmul.f32 %v4493_v30, %v7994_v42 }
 0xb1c   : > { %v4569_v45 = vsub.f32 1.5, %v4568_v35 }
 0xb1d   : > { %v5801_v28 = vpop.eup %5800  ;;  %v4551_v52 = vadd.f32 1e-05, %v4535_v14 }
 0xb1e   : > { %v4570_v48 = vmul.f32 %v5799_v29, %v4569_v45  ;;  %v4576_v16 = vmul.f32 %v5801_v28, %v4550_v38  ;;  %vm4582_vm14 = vweird.f32 %v5801_v28 }
 0xb1f   : > { %5802 = vrsqrt.f32 %v4551_v52  ;;  %vm4583_vm1 = vmor %vm4581_vm15, %vm4582_vm14  ;;  %vm4591_vm4 = vweird.f32 %v4551_v52 }
 0xb20   : > { %v4574_v37 = vsel %vm4573_vm13, %v5799_v29, %v4570_v48  ;;  %v4577_v5 = vmul.f32 %v5801_v28, %v4576_v16 }
 0xb21   : > { %v4725_v8 = vmul.f32 %v4574_v37, %v8511_v32 }
 0xb22   : > { %v4578_v11 = vmul.f32 0.5, %v4577_v5  ;;  %v4496_v17 = vpop.xlane.xlu1 %4495 }
 0xb23   : > { %v4745_v6 = vmul.f32 %v8640_v46, %v4725_v8  ;;  %v4536_v61 = vmul.f32 %v4496_v17, %v7994_v42 }
 0xb24   : > { %v4579_v23 = vsub.f32 1.5, %v4578_v11 }
 0xb25   : > { %v5803_v51 = vpop.eup %5802  ;;  %v4765_v41 = vadd.f32 %v8647_v9, %v4745_v6  ;;  %v4552_v58 = vadd.f32 1e-05, %v4536_v61 }
 0xb26   : > { %v4580_v12 = vmul.f32 %v5801_v28, %v4579_v23  ;;  %v4586_v32 = vmul.f32 %v5803_v51, %v4551_v52  ;;  %vm4592_vm3 = vweird.f32 %v5803_v51 }
 0xb27   : > { %4781 = vst.msk [vmem:[%s8656_s17] sm:$0xff] %vm808_vm0, %v4765_v41  ;;  %5804 = vrsqrt.f32 %v4552_v58  ;;  %vm4593_vm5 = vmor %vm4591_vm4, %vm4592_vm3  ;;  %vm4601_vm7 = vweird.f32 %v4552_v58 }
 0xb28   : > { %v4584_v22 = vsel %vm4583_vm1, %v5801_v28, %v4580_v12  ;;  %v4587_v0 = vmul.f32 %v5803_v51, %v4586_v32 }
 0xb29   : > { %v4726_v44 = vmul.f32 %v4584_v22, %v8524_v13 }
 0xb2a   : > { %v4588_v56 = vmul.f32 0.5, %v4587_v0  ;;  %v4499_v57 = vpop.xlane.xlu0 %4498 }
 0xb2b   : > { %v4746_v50 = vmul.f32 %v8640_v46, %v4726_v44  ;;  %v4537_v43 = vmul.f32 %v4499_v57, %v7994_v42 }
 0xb2c   : > { %v4589_v39 = vsub.f32 1.5, %v4588_v56 }
 0xb2d   : > { %v5805_v24 = vpop.eup %5804  ;;  %v4766_v55 = vadd.f32 %v8647_v9, %v4746_v50  ;;  %v4553_v60 = vadd.f32 1e-05, %v4537_v43 }
 0xb2e   : > { %v4590_v2 = vmul.f32 %v5803_v51, %v4589_v39  ;;  %v4596_v31 = vmul.f32 %v5805_v24, %v4552_v58  ;;  %vm4602_vm6 = vweird.f32 %v5805_v24 }
 0xb2f   : > { %4782 = vst.msk [vmem:[%s8656_s17 + $0x8] sm:$0xff] %vm808_vm0, %v4766_v55  ;;  %5806 = vrsqrt.f32 %v4553_v60  ;;  %vm4603_vm8 = vmor %vm4601_vm7, %vm4602_vm6  ;;  %vm4611_vm10 = vweird.f32 %v4553_v60 }
 0xb30   : > { %v4594_v13 = vsel %vm4593_vm5, %v5803_v51, %v4590_v2  ;;  %v4597_v15 = vmul.f32 %v5805_v24, %v4596_v31 }
 0xb31   : > { %v4727_v3 = vmul.f32 %v4594_v13, %v8536_v4 }
 0xb32   : > { %v4598_v20 = vmul.f32 0.5, %v4597_v15  ;;  %v4502_v27 = vpop.xlane.xlu2 %4501 }
 0xb33   : > { %v4747_v18 = vmul.f32 %v8640_v46, %v4727_v3  ;;  %v4538_v53 = vmul.f32 %v4502_v27, %v7994_v42 }
 0xb34   : > { %v4599_v29 = vsub.f32 1.5, %v4598_v20 }
 0xb35   : > { %v5807_v38 = vpop.eup %5806  ;;  %v4767_v21 = vadd.f32 %v8647_v9, %v4747_v18  ;;  %v4554_v59 = vadd.f32 1e-05, %v4538_v53 }
 0xb36   : > { %v4600_v36 = vmul.f32 %v5805_v24, %v4599_v29  ;;  %v4606_v19 = vmul.f32 %v5807_v38, %v4553_v60  ;;  %vm4612_vm9 = vweird.f32 %v5807_v38 }
 0xb37   : > { %4783 = vst.msk [vmem:[%s8656_s17 + $0x10] sm:$0xff] %vm808_vm0, %v4767_v21  ;;  %5808 = vrsqrt.f32 %v4554_v59  ;;  %vm4613_vm11 = vmor %vm4611_vm10, %vm4612_vm9  ;;  %vm4621_vm12 = vweird.f32 %v4554_v59 }
 0xb38   : > { %v4604_v4 = vsel %vm4603_vm8, %v5805_v24, %v4600_v36  ;;  %v4607_v35 = vmul.f32 %v5807_v38, %v4606_v19 }
 0xb39   : > { %v4728_v30 = vmul.f32 %v4604_v4, %v8543_v54 }
 0xb3a   : > { %v4608_v14 = vmul.f32 0.5, %v4607_v35  ;;  %v4505_v45 = vpop.xlane.xlu1 %4504 }
 0xb3b   : > { %v4748_v28 = vmul.f32 %v8640_v46, %v4728_v30  ;;  %v4539_v52 = vmul.f32 %v4505_v45, %v7994_v42 }
 0xb3c   : > { %v4609_v48 = vsub.f32 1.5, %v4608_v14 }
 0xb3d   : > { %v5809_v16 = vpop.eup %5808  ;;  %v4768_v37 = vadd.f32 %v8647_v9, %v4748_v28  ;;  %v4555_v5 = vadd.f32 1e-05, %v4539_v52 }
 0xb3e   : > { %v4610_v8 = vmul.f32 %v5807_v38, %v4609_v48  ;;  %v4616_v11 = vmul.f32 %v5809_v16, %v4554_v59  ;;  %vm4622_vm2 = vweird.f32 %v5809_v16 }
 0xb3f   : > { %4784 = vst.msk [vmem:[%s8656_s17 + $0x18] sm:$0xff] %vm808_vm0, %v4768_v37  ;;  %5810 = vrsqrt.f32 %v4555_v5  ;;  %vm4623_vm13 = vmor %vm4621_vm12, %vm4622_vm2  ;;  %vm4631_vm15 = vweird.f32 %v4555_v5 }
 0xb40   : > { %v4614_v54 = vsel %vm4613_vm11, %v5807_v38, %v4610_v8  ;;  %v4617_v17 = vmul.f32 %v5809_v16, %v4616_v11 }
 0xb41   : > { %v4729_v6 = vmul.f32 %v4614_v54, %v8550_v47 }
 0xb42   : > { %v4618_v61 = vmul.f32 0.5, %v4617_v17  ;;  %v4508_v23 = vpop.xlane.xlu0 %4507 }
 0xb43   : > { %v4749_v51 = vmul.f32 %v8640_v46, %v4729_v6  ;;  %v4540_v41 = vmul.f32 %v4508_v23, %v7994_v42 }
 0xb44   : > { %v4619_v58 = vsub.f32 1.5, %v4618_v61 }
 0xb45   : > { %v5811_v12 = vpop.eup %5810  ;;  %v4769_v32 = vadd.f32 %v8647_v9, %v4749_v51  ;;  %v4556_v22 = vadd.f32 1e-05, %v4540_v41 }
 0xb46   : > { %v4620_v0 = vmul.f32 %v5809_v16, %v4619_v58  ;;  %v4626_v44 = vmul.f32 %v5811_v12, %v4555_v5  ;;  %vm4632_vm14 = vweird.f32 %v5811_v12 }
 0xb47   : > { %4785 = vst.msk [vmem:[%s8656_s17 + $0x20] sm:$0xff] %vm808_vm0, %v4769_v32  ;;  %5812 = vrsqrt.f32 %v4556_v22  ;;  %vm4633_vm1 = vmor %vm4631_vm15, %vm4632_vm14  ;;  %vm4641_vm4 = vweird.f32 %v4556_v22 }
 0xb48   : > { %v4624_v47 = vsel %vm4623_vm13, %v5809_v16, %v4620_v0  ;;  %v4627_v56 = vmul.f32 %v5811_v12, %v4626_v44 }
 0xb49   : > { %v4730_v57 = vmul.f32 %v4624_v47, %v8557_v10 }
 0xb4a   : > { %v4628_v50 = vmul.f32 0.5, %v4627_v56  ;;  %v4511_v43 = vpop.xlane.xlu2 %4510 }
 0xb4b   : > { %v4750_v39 = vmul.f32 %v8640_v46, %v4730_v57  ;;  %v4541_v24 = vmul.f32 %v4511_v43, %v7994_v42 }
 0xb4c   : > { %v4629_v55 = vsub.f32 1.5, %v4628_v50 }
 0xb4d   : > { %v5813_v60 = vpop.eup %5812  ;;  %v4770_v2 = vadd.f32 %v8647_v9, %v4750_v39  ;;  %v4557_v31 = vadd.f32 1e-05, %v4541_v24 }
 0xb4e   : > { %v4630_v13 = vmul.f32 %v5811_v12, %v4629_v55  ;;  %v4636_v15 = vmul.f32 %v5813_v60, %v4556_v22  ;;  %vm4642_vm3 = vweird.f32 %v5813_v60 }
 0xb4f   : > { %4786 = vst.msk [vmem:[%s8656_s17 + $0x28] sm:$0xff] %vm808_vm0, %v4770_v2  ;;  %5814 = vrsqrt.f32 %v4557_v31  ;;  %vm4643_vm5 = vmor %vm4641_vm4, %vm4642_vm3  ;;  %vm4651_vm7 = vweird.f32 %v4557_v31 }
 0xb50   : > { %v4634_v10 = vsel %vm4633_vm1, %v5811_v12, %v4630_v13  ;;  %v4637_v3 = vmul.f32 %v5813_v60, %v4636_v15 }
 0xb51   : > { %v4731_v20 = vmul.f32 %v4634_v10, %v8564_v26 }
 0xb52   : > { %v4638_v27 = vmul.f32 0.5, %v4637_v3  ;;  %v4514_v18 = vpop.xlane.xlu1 %4513 }
 0xb53   : > { %v4751_v53 = vmul.f32 %v8640_v46, %v4731_v20  ;;  %v4542_v29 = vmul.f32 %v4514_v18, %v7994_v42 }
 0xb54   : > { %v4639_v38 = vsub.f32 1.5, %v4638_v27 }
 0xb55   : > { %v5815_v21 = vpop.eup %5814  ;;  %v4771_v59 = vadd.f32 %v8647_v9, %v4751_v53  ;;  %v4558_v36 = vadd.f32 1e-05, %v4542_v29 }
 0xb56   : > { %v4640_v19 = vmul.f32 %v5813_v60, %v4639_v38  ;;  %v4646_v4 = vmul.f32 %v5815_v21, %v4557_v31  ;;  %vm4652_vm6 = vweird.f32 %v5815_v21 }
 0xb57   : > { %4787 = vst.msk [vmem:[%s8656_s17 + $0x30] sm:$0xff] %vm808_vm0, %v4771_v59  ;;  %5816 = vrsqrt.f32 %v4558_v36  ;;  %vm4653_vm8 = vmor %vm4651_vm7, %vm4652_vm6  ;;  %vm4661_vm10 = vweird.f32 %v4558_v36 }
 0xb58   : > { %v4644_v26 = vsel %vm4643_vm5, %v5813_v60, %v4640_v19  ;;  %v4647_v35 = vmul.f32 %v5815_v21, %v4646_v4 }
 0xb59   : > { %v4732_v30 = vmul.f32 %v4644_v26, %v8571_v1 }
 0xb5a   : > { %v4648_v14 = vmul.f32 0.5, %v4647_v35  ;;  %v4517_v45 = vpop.xlane.xlu0 %4516 }
 0xb5b   : > { %v4752_v28 = vmul.f32 %v8640_v46, %v4732_v30  ;;  %v4543_v52 = vmul.f32 %v4517_v45, %v7994_v42 }
 0xb5c   : > { %v4649_v48 = vsub.f32 1.5, %v4648_v14 }
 0xb5d   : > { %v5817_v16 = vpop.eup %5816  ;;  %v4772_v37 = vadd.f32 %v8647_v9, %v4752_v28  ;;  %v4559_v5 = vadd.f32 1e-05, %v4543_v52 }
 0xb5e   : > { %v4650_v8 = vmul.f32 %v5815_v21, %v4649_v48  ;;  %v4656_v11 = vmul.f32 %v5817_v16, %v4558_v36  ;;  %vm4662_vm9 = vweird.f32 %v5817_v16 }
 0xb5f   : > { %4788 = vst.msk [vmem:[%s8656_s17 + $0x38] sm:$0xff] %vm808_vm0, %v4772_v37  ;;  %5818 = vrsqrt.f32 %v4559_v5  ;;  %vm4663_vm11 = vmor %vm4661_vm10, %vm4662_vm9  ;;  %vm4671_vm12 = vweird.f32 %v4559_v5 }
 0xb60   : > { %v4654_v1 = vsel %vm4653_vm8, %v5815_v21, %v4650_v8  ;;  %v4657_v54 = vmul.f32 %v5817_v16, %v4656_v11 }
 0xb61   : > { %v4733_v17 = vmul.f32 %v4654_v1, %v8578_v63 }
 0xb62   : > { %v4658_v6 = vmul.f32 0.5, %v4657_v54  ;;  %v4520_v61 = vpop.xlane.xlu2 %4519 }
 0xb63   : > { %v4753_v23 = vmul.f32 %v8640_v46, %v4733_v17  ;;  %v4544_v51 = vmul.f32 %v4520_v61, %v7994_v42 }
 0xb64   : > { %v4659_v41 = vsub.f32 1.5, %v4658_v6 }
 0xb65   : > { %v5819_v58 = vpop.eup %5818  ;;  %v4773_v12 = vadd.f32 %v8647_v9, %v4753_v23  ;;  %v4560_v32 = vadd.f32 1e-05, %v4544_v51 }
 0xb66   : > { %v4660_v22 = vmul.f32 %v5817_v16, %v4659_v41  ;;  %v4666_v0 = vmul.f32 %v5819_v58, %v4559_v5  ;;  %vm4672_vm2 = vweird.f32 %v5819_v58 }
 0xb67   : > { %4789 = vst.msk [vmem:[%s8656_s17 + $0x40] sm:$0xff] %vm808_vm0, %v4773_v12  ;;  %5820 = vrsqrt.f32 %v4560_v32  ;;  %vm4673_vm13 = vmor %vm4671_vm12, %vm4672_vm2  ;;  %vm4681_vm15 = vweird.f32 %v4560_v32 }
 0xb68   : > { %v4664_v63 = vsel %vm4663_vm11, %v5817_v16, %v4660_v22  ;;  %v4667_v44 = vmul.f32 %v5819_v58, %v4666_v0 }
 0xb69   : > { %v4734_v47 = vmul.f32 %v4664_v63, %v8585_v33 }
 0xb6a   : > { %v4668_v56 = vmul.f32 0.5, %v4667_v44  ;;  %v4523_v57 = vpop.xlane.xlu1 %4522 }
 0xb6b   : > { %v4754_v50 = vmul.f32 %v8640_v46, %v4734_v47  ;;  %v4545_v43 = vmul.f32 %v4523_v57, %v7994_v42 }
 0xb6c   : > { %v4669_v39 = vsub.f32 1.5, %v4668_v56 }
 0xb6d   : > { %v5821_v24 = vpop.eup %5820  ;;  %v4774_v55 = vadd.f32 %v8647_v9, %v4754_v50  ;;  %v4561_v60 = vadd.f32 1e-05, %v4545_v43 }
 0xb6e   : > { %v4670_v2 = vmul.f32 %v5819_v58, %v4669_v39  ;;  %v4676_v31 = vmul.f32 %v5821_v24, %v4560_v32  ;;  %vm4682_vm14 = vweird.f32 %v5821_v24 }
 0xb6f   : > { %4790 = vst.msk [vmem:[%s8656_s17 + $0x48] sm:$0xff] %vm808_vm0, %v4774_v55  ;;  %5822 = vrsqrt.f32 %v4561_v60  ;;  %vm4683_vm1 = vmor %vm4681_vm15, %vm4682_vm14  ;;  %vm4691_vm4 = vweird.f32 %v4561_v60 }
 0xb70   : > { %v4674_v33 = vsel %vm4673_vm13, %v5819_v58, %v4670_v2  ;;  %v4677_v13 = vmul.f32 %v5821_v24, %v4676_v31 }
 0xb71   : > { %v4735_v15 = vmul.f32 %v4674_v33, %v8592_v49 }
 0xb72   : > { %v4678_v10 = vmul.f32 0.5, %v4677_v13 }
 0xb73   : > { %v4755_v3 = vmul.f32 %v8640_v46, %v4735_v15 }
 0xb74   : > { %v4679_v20 = vsub.f32 1.5, %v4678_v10 }
 0xb75   : > { %v5823_v27 = vpop.eup %5822  ;;  %v4775_v18 = vadd.f32 %v8647_v9, %v4755_v3 }
 0xb76   : > { %v4680_v53 = vmul.f32 %v5821_v24, %v4679_v20  ;;  %v4686_v29 = vmul.f32 %v5823_v27, %v4561_v60  ;;  %vm4692_vm3 = vweird.f32 %v5823_v27 }
 0xb77   : > { %4791 = vst.msk [vmem:[%s8656_s17 + $0x50] sm:$0xff] %vm808_vm0, %v4775_v18  ;;  %vm4693_vm5 = vmor %vm4691_vm4, %vm4692_vm3 }
 0xb78   : > { %v4684_v38 = vsel %vm4683_vm1, %v5821_v24, %v4680_v53  ;;  %v4687_v21 = vmul.f32 %v5823_v27, %v4686_v29 }
 0xb79   : > { %v4736_v59 = vmul.f32 %v4684_v38, %v8599_v62 }
 0xb7a   : > { %v4688_v49 = vmul.f32 0.5, %v4687_v21 }
 0xb7b   : > { %v4756_v36 = vmul.f32 %v8640_v46, %v4736_v59 }
 0xb7c   : > { %v4689_v19 = vsub.f32 1.5, %v4688_v49  ;;  %v4526_v4 = vpop.xlane.xlu0 %4525 }
 0xb7d   : > { %v4776_v26 = vadd.f32 %v8647_v9, %v4756_v36  ;;  %v4546_v35 = vmul.f32 %v4526_v4, %v7994_v42 }
 0xb7e   : > { %v4690_v30 = vmul.f32 %v5823_v27, %v4689_v19 }
 0xb7f   : > { %4792 = vst.msk [vmem:[%s8656_s17 + $0x58] sm:$0xff] %vm808_vm0, %v4776_v26  ;;  %v4562_v14 = vadd.f32 1e-05, %v4546_v35 }
 0xb80   : > { %v4694_v45 = vsel %vm4693_vm5, %v5823_v27, %v4690_v30 }
 0xb81   : > { %v4737_v62 = vmul.f32 %v4694_v45, %v8606_v25  ;;  %5824 = vrsqrt.f32 %v4562_v14  ;;  %vm4701_vm7 = vweird.f32 %v4562_v14 }
 0xb83   : > { %v4757_v28 = vmul.f32 %v8640_v46, %v4737_v62 }
 0xb84   : > { %v4529_v52 = vpop.xlane.xlu2 %4528 }
 0xb85   : > { %v4777_v48 = vadd.f32 %v8647_v9, %v4757_v28  ;;  %v4547_v16 = vmul.f32 %v4529_v52, %v7994_v42 }
 0xb87   : > { %v5825_v37 = vpop.eup %5824  ;;  %4793 = vst.msk [vmem:[%s8656_s17 + $0x60] sm:$0xff] %vm808_vm0, %v4777_v48  ;;  %v4563_v5 = vadd.f32 1e-05, %v4547_v16 }
 0xb88   : > { %v4696_v8 = vmul.f32 %v5825_v37, %v4562_v14  ;;  %vm4702_vm6 = vweird.f32 %v5825_v37 }
 0xb89   : > { %5826 = vrsqrt.f32 %v4563_v5  ;;  %vm4703_vm8 = vmor %vm4701_vm7, %vm4702_vm6  ;;  %vm4711_vm10 = vweird.f32 %v4563_v5 }
 0xb8a   : > { %v4697_v11 = vmul.f32 %v5825_v37, %v4696_v8 }
 0xb8c   : > { %v4698_v1 = vmul.f32 0.5, %v4697_v11  ;;  %v4532_v54 = vpop.xlane.xlu1 %4531 }
 0xb8d   : > { %v4548_v17 = vmul.f32 %v4532_v54, %v7994_v42 }
 0xb8e   : > { %v4699_v25 = vsub.f32 1.5, %v4698_v1 }
 0xb8f   : > { %v5827_v6 = vpop.eup %5826  ;;  %v4564_v61 = vadd.f32 1e-05, %v4548_v17 }
 0xb90   : > { %v4700_v23 = vmul.f32 %v5825_v37, %v4699_v25  ;;  %v4706_v51 = vmul.f32 %v5827_v6, %v4563_v5  ;;  %vm4712_vm9 = vweird.f32 %v5827_v6 }
 0xb91   : > { %5828 = vrsqrt.f32 %v4564_v61  ;;  %vm4713_vm11 = vmor %vm4711_vm10, %vm4712_vm9  ;;  %vm4721_vm12 = vweird.f32 %v4564_v61 }
 0xb92   : > { %v4704_v41 = vsel %vm4703_vm8, %v5825_v37, %v4700_v23  ;;  %v4707_v58 = vmul.f32 %v5827_v6, %v4706_v51 }
 0xb93   : > { %v4738_v12 = vmul.f32 %v4704_v41, %v8613_v34 }
 0xb94   : > { %v4708_v32 = vmul.f32 0.5, %v4707_v58 }
 0xb95   : > { %v4758_v22 = vmul.f32 %v8640_v46, %v4738_v12 }
 0xb96   : > { %v4709_v0 = vsub.f32 1.5, %v4708_v32 }
 0xb97   : > { %v5829_v42 = vpop.eup %5828  ;;  %v4778_v63 = vadd.f32 %v8647_v9, %v4758_v22 }
 0xb98   : > { %v4710_v44 = vmul.f32 %v5827_v6, %v4709_v0  ;;  %v4716_v47 = vmul.f32 %v5829_v42, %v4564_v61  ;;  %vm4722_vm2 = vweird.f32 %v5829_v42 }
 0xb99   : > { %4794 = vst.msk [vmem:[%s8656_s17 + $0x68] sm:$0xff] %vm808_vm0, %v4778_v63  ;;  %vm4723_vm13 = vmor %vm4721_vm12, %vm4722_vm2 }
 0xb9a   : > { %v4714_v56 = vsel %vm4713_vm11, %v5827_v6, %v4710_v44  ;;  %v4717_v57 = vmul.f32 %v5829_v42, %v4716_v47 }
 0xb9b   : > { %v4739_v34 = vmul.f32 %v4714_v56, %v8621_v40 }
 0xb9c   : > { %v4718_v50 = vmul.f32 0.5, %v4717_v57 }
 0xb9d   : > { %v4759_v43 = vmul.f32 %v8640_v46, %v4739_v34 }
 0xb9e   : > { %v4719_v39 = vsub.f32 1.5, %v4718_v50 }
 0xb9f   : > { %v4779_v24 = vadd.f32 %v8647_v9, %v4759_v43 }
 0xba0   : > { %v4720_v55 = vmul.f32 %v5829_v42, %v4719_v39 }
 0xba1   : > { %4795 = vst.msk [vmem:[%s8656_s17 + $0x70] sm:$0xff] %vm808_vm0, %v4779_v24 }
 0xba2   : > { %v4724_v60 = vsel %vm4723_vm13, %v5829_v42, %v4720_v55 }
 0xba3   : > { %v4740_v2 = vmul.f32 %v4724_v60, %v8629_v7 }
 0xba5   : > { %v4760_v31 = vmul.f32 %v8640_v46, %v4740_v2 }
 0xba7   : > { %v4780_v33 = vadd.f32 %v8647_v9, %v4760_v31 }
 0xba9   : > { %4796 = vst.msk [vmem:[%s8656_s17 + $0x78] sm:$0xff] %vm808_vm0, %v4780_v33 }
 0xbaa PF: > { %s26_s21 = sadd.s32 1, %s5852_s21  }
 0xbab   : > { %p23_p4 = scmp.ge.s32.totalorder %s26_s21, 4  }
 0xbad   :  { %25 = sbr.rel (!%p23_p4) target bundleno = 2 (0x2), region = 159 }

</bundles_post_ra>
